<compile_context>
chip_gen: v5e
topology: v5e:2x2
jax: 0.10.0
libtpu: 0.0.40
codegen_flags: <defaults>
</compile_context>

<pallas_src>
import jax
import jax.numpy as jnp
from jax import lax
from jax.experimental import pallas as pl
from jax.experimental.pallas import tpu as pltpu

KSIZE = 7
PAD = KSIZE // 2           # 3
ROW_OFF = 8                # sublane-aligned interior row offset in the halo scratch
COL_OFF = 128              # lane-aligned interior column offset in the halo scratch


def _make_kernel(C, H, W, Hs, Ws):
    inv_c = 1.0 / float(C)

    def kernel(w_ref, x_ref, o_ref, sum_ref, max_ref, pad_ref):
        # w_ref  : SMEM (98,) f32  [49 taps for avg channel, 49 taps for max channel]
        # x_ref  : VMEM (1, Cb, H, W)  unpadded input channel tile
        # o_ref  : VMEM (1, H, W)      output (resident across the channel axis)
        # sum_ref/max_ref : VMEM (H, W) f32 running channel sum / max
        # pad_ref: VMEM (2, Hs, Ws) f32 zero-haloed (avg, max) planes
        c = pl.program_id(1)
        nc = pl.num_programs(1)

        blk = x_ref[0].astype(jnp.float32)           # (Cb, H, W)
        s = jnp.sum(blk, axis=0)                     # (H, W)
        m = jnp.max(blk, axis=0)                     # (H, W)

        @pl.when(c == 0)
        def _():
            sum_ref[...] = s
            max_ref[...] = m
            # Zero the halo scratch once per image (border must be zero for 'same').
            pad_ref[...] = jnp.zeros_like(pad_ref)

        @pl.when(c > 0)
        def _():
            sum_ref[...] = sum_ref[...] + s
            max_ref[...] = jnp.maximum(max_ref[...], m)

        @pl.when(c == nc - 1)
        def _():
            # Write the (avg, max) planes into the zero-filled halo scratch at a
            # tile-aligned offset, then run the 7x7 conv as shifted-window MACs.
            pad_ref[0, ROW_OFF:ROW_OFF + H, COL_OFF:COL_OFF + W] = sum_ref[...] * inv_c
            pad_ref[1, ROW_OFF:ROW_OFF + H, COL_OFF:COL_OFF + W] = max_ref[...]
            a_plane = pad_ref[0]                     # (Hs, Ws)
            m_plane = pad_ref[1]

            r_base = ROW_OFF - PAD                   # 5
            c_base = COL_OFF - PAD                   # 125
            # Hoist the 7 lane shifts: one column window per dw, reused for every dh.
            a_cols = [lax.slice(a_plane, (0, c_base + dw), (Hs, c_base + dw + W))
                      for dw in range(KSIZE)]
            m_cols = [lax.slice(m_plane, (0, c_base + dw), (Hs, c_base + dw + W))
                      for dw in range(KSIZE)]

            acc = jnp.zeros((H, W), jnp.float32)
            for dh in range(KSIZE):
                r0 = r_base + dh
                for dw in range(KSIZE):
                    wa = w_ref[dh * KSIZE + dw]                     # avg-channel tap
                    wm = w_ref[KSIZE * KSIZE + dh * KSIZE + dw]     # max-channel tap
                    acc = acc \
                        + wa * lax.slice(a_cols[dw], (r0, 0), (r0 + H, W)) \
                        + wm * lax.slice(m_cols[dw], (r0, 0), (r0 + H, W))

            o_ref[0] = (1.0 / (1.0 + jnp.exp(-acc))).astype(o_ref.dtype)   # sigmoid

    return kernel


def _pick_chan_tile(C, H, W, itemsize, budget_bytes):
    per_chan = H * W * itemsize
    best = 1
    for cb in range(1, C + 1):
        if C % cb == 0 and cb * per_chan <= budget_bytes:
            best = cb
    return best


def spatial_attention_pallas(x_nchw, w_oihw, *, chan_tile=None,
                             input_tile_budget_bytes=8 * 1024 * 1024):
    """x_nchw: (N, C, H, W); w_oihw: (1, 2, 7, 7) PyTorch Conv2d weight (no bias)."""
    N, C, H, W = x_nchw.shape
    if chan_tile is None:
        chan_tile = _pick_chan_tile(C, H, W, x_nchw.dtype.itemsize,
                                    input_tile_budget_bytes)
    assert C % chan_tile == 0, (C, chan_tile)

    Hs = H + 2 * ROW_OFF
    Ws = W + 2 * COL_OFF

    # (1, 2, 7, 7) -> flat (98,) scalar taps living in SMEM.
    w_flat = w_oihw.reshape(2 * KSIZE * KSIZE).astype(jnp.float32)

    kernel = _make_kernel(C, H, W, Hs, Ws)

    # VMEM sizing: double-buffered input tile + resident output block + scratch,
    # with headroom; safe on v5e (16 MiB default scoped) through v7x (64 MiB phys).
    itemsize = x_nchw.dtype.itemsize
    blk_bytes = chan_tile * H * W * itemsize
    out_bytes = H * W * itemsize
    scratch_bytes = (2 * H * W + 2 * Hs * Ws) * 4
    need = 2 * blk_bytes + 2 * out_bytes + scratch_bytes + (2 << 20)
    vmem_limit = int(min(max(need, 16 << 20), 48 << 20))

    grid_spec = pltpu.PrefetchScalarGridSpec(
        num_scalar_prefetch=0,
        grid=(N, C // chan_tile),                    # channel-reduction axis last
        in_specs=[
            pl.BlockSpec(memory_space=pltpu.MemorySpace.SMEM),              # conv taps
            pl.BlockSpec((1, chan_tile, H, W), lambda n, c: (n, c, 0, 0)),  # input tile
        ],
        out_specs=pl.BlockSpec((1, H, W), lambda n, c: (n, 0, 0)),
        scratch_shapes=[
            pltpu.VMEM((H, W), jnp.float32),         # running channel sum
            pltpu.VMEM((H, W), jnp.float32),         # running channel max
            pltpu.VMEM((2, Hs, Ws), jnp.float32),    # zero-haloed (avg, max) planes
        ],
    )
    out = pl.pallas_call(
        kernel,
        out_shape=jax.ShapeDtypeStruct((N, H, W), x_nchw.dtype),
        grid_spec=grid_spec,
        compiler_params=pltpu.CompilerParams(
            dimension_semantics=("parallel", "arbitrary"),
            vmem_limit_bytes=vmem_limit),
    )(w_flat, x_nchw)
    return out.reshape(N, 1, H, W)     # match PyTorch (N, 1, H, W)


def spatial_attention_ref(x_nchw, w_oihw):
    avg = jnp.mean(x_nchw, axis=1, keepdims=True)
    mx = jnp.max(x_nchw, axis=1, keepdims=True)
    cat = jnp.concatenate([avg, mx], axis=1)                 # (N, 2, H, W)
    dn = ("NCHW", "OIHW", "NCHW")
    y = lax.conv_general_dilated(cat, w_oihw, (1, 1), "SAME",
                                 dimension_numbers=dn)       # (N, 1, H, W)
    return jax.nn.sigmoid(y)


if __name__ == "__main__":
    N, C, H, W = 2, 4, 16, 16

    key = jax.random.PRNGKey(0)
    k_x, k_w = jax.random.split(key, 2)

    x = jax.random.normal(k_x, (N, C, H, W), jnp.float32)
    # PyTorch nn.Conv2d(2, 1, kernel_size=7, padding='same', bias=False) weight: (1, 2, 7, 7)
    w = jax.random.normal(k_w, (1, 2, KSIZE, KSIZE), jnp.float32) * 0.1

    # chan_tile=2 exercises the multi-step channel-reduction (accumulator) path.
    out = spatial_attention_pallas(x, w, chan_tile=2)
    out = jax.block_until_ready(out)

    ref = spatial_attention_ref(x, w)
    assert out.shape == (N, 1, H, W), out.shape
    assert jnp.allclose(out, ref, atol=1e-5, rtol=1e-5), (
        float(jnp.max(jnp.abs(out - ref))))

    print("KERNEL_OK")
</pallas_src>

<mosaic_0001>
module attributes {stable_mosaic.version = 11 : i64} {
  func.func @kernel(%arg0: i32, %arg1: i32, %arg2: memref<98xf32, #tpu.memory_space<smem>>, %arg3: memref<1x2x16x16xf32, #tpu.memory_space<vmem>>, %arg4: memref<1x16x16xf32, #tpu.memory_space<vmem>>, %arg5: memref<16x16xf32, #tpu.memory_space<vmem>>, %arg6: memref<16x16xf32, #tpu.memory_space<vmem>>, %arg7: memref<2x32x272xf32, #tpu.memory_space<vmem>>) attributes {dimension_semantics = [#tpu.dimension_semantics<parallel>, #tpu.dimension_semantics<arbitrary>], iteration_bounds = array<i64: 2, 2>, scalar_prefetch = 0 : i64, scratch_operands = 3 : i64, tpu.core_type = #tpu.core_type<tc>, window_params = [{transform_indices = @transform_0, window_bounds = array<i64: 98>}, {transform_indices = @transform_1, window_bounds = array<i64: 1, 2, 16, 16>}, {transform_indices = @transform_2, window_bounds = array<i64: 1, 16, 16>}]} {
    %c0 = arith.constant 0 : index
    %c0_0 = arith.constant 0 : index
    %c0_1 = arith.constant 0 : index
    %c0_2 = arith.constant 0 : index
    %0 = vector.load %arg3[%c0, %c0_0, %c0_1, %c0_2] : memref<1x2x16x16xf32, #tpu.memory_space<vmem>>, vector<1x2x16x16xf32>
    %1 = vector.shape_cast %0 : vector<1x2x16x16xf32> to vector<2x16x16xf32>
    %cst = arith.constant dense<0.000000e+00> : vector<16x16xf32>
    %2 = vector.multi_reduction <add>, %1, %cst [0] : vector<2x16x16xf32> to vector<16x16xf32>
    %cst_3 = arith.constant dense<0xFF800000> : vector<16x16xf32>
    %3 = vector.multi_reduction <maximumf>, %1, %cst_3 [0] : vector<2x16x16xf32> to vector<16x16xf32>
    %c0_i32 = arith.constant 0 : i32
    %4 = arith.cmpi eq, %arg1, %c0_i32 : i32
    %5 = arith.extui %4 : i1 to i32
    %c0_i32_4 = arith.constant 0 : i32
    %6 = arith.cmpi ne, %5, %c0_i32_4 : i32
    scf.if %6 {
      %c0_8 = arith.constant 0 : index
      %c0_9 = arith.constant 0 : index
      %13 = vector.load %arg5[%c0_8, %c0_9] : memref<16x16xf32, #tpu.memory_space<vmem>>, vector<16x16xf32>
      tpu.vector_store %arg5[%c0_8, %c0_9], %2 {strides = array<i32>} : memref<16x16xf32, #tpu.memory_space<vmem>>, vector<16x16xf32>,
      %c0_10 = arith.constant 0 : index
      %c0_11 = arith.constant 0 : index
      %14 = vector.load %arg6[%c0_10, %c0_11] : memref<16x16xf32, #tpu.memory_space<vmem>>, vector<16x16xf32>
      tpu.vector_store %arg6[%c0_10, %c0_11], %3 {strides = array<i32>} : memref<16x16xf32, #tpu.memory_space<vmem>>, vector<16x16xf32>,
      %cst_12 = arith.constant 0.000000e+00 : f32
      %15 = vector.broadcast %cst_12 : f32 to vector<2x32x272xf32>
      %c0_13 = arith.constant 0 : index
      %c0_14 = arith.constant 0 : index
      %c0_15 = arith.constant 0 : index
      %16 = vector.load %arg7[%c0_13, %c0_14, %c0_15] : memref<2x32x272xf32, #tpu.memory_space<vmem>>, vector<2x32x272xf32>
      tpu.vector_store %arg7[%c0_13, %c0_14, %c0_15], %15 {strides = array<i32>} : memref<2x32x272xf32, #tpu.memory_space<vmem>>, vector<2x32x272xf32>,
    } else {
    }
    %c0_i32_5 = arith.constant 0 : i32
    %7 = arith.cmpi sgt, %arg1, %c0_i32_5 : i32
    %8 = arith.extui %7 : i1 to i32
    %c0_i32_6 = arith.constant 0 : i32
    %9 = arith.cmpi ne, %8, %c0_i32_6 : i32
    scf.if %9 {
      %c0_8 = arith.constant 0 : index
      %c0_9 = arith.constant 0 : index
      %13 = vector.load %arg5[%c0_8, %c0_9] : memref<16x16xf32, #tpu.memory_space<vmem>>, vector<16x16xf32>
      %14 = arith.addf %13, %2 : vector<16x16xf32>
      %c0_10 = arith.constant 0 : index
      %c0_11 = arith.constant 0 : index
      %15 = vector.load %arg5[%c0_10, %c0_11] : memref<16x16xf32, #tpu.memory_space<vmem>>, vector<16x16xf32>
      tpu.vector_store %arg5[%c0_10, %c0_11], %14 {strides = array<i32>} : memref<16x16xf32, #tpu.memory_space<vmem>>, vector<16x16xf32>,
      %c0_12 = arith.constant 0 : index
      %c0_13 = arith.constant 0 : index
      %16 = vector.load %arg6[%c0_12, %c0_13] : memref<16x16xf32, #tpu.memory_space<vmem>>, vector<16x16xf32>
      %17 = arith.maximumf %16, %3 : vector<16x16xf32>
      %c0_14 = arith.constant 0 : index
      %c0_15 = arith.constant 0 : index
      %18 = vector.load %arg6[%c0_14, %c0_15] : memref<16x16xf32, #tpu.memory_space<vmem>>, vector<16x16xf32>
      tpu.vector_store %arg6[%c0_14, %c0_15], %17 {strides = array<i32>} : memref<16x16xf32, #tpu.memory_space<vmem>>, vector<16x16xf32>,
    } else {
    }
    %c1_i32 = arith.constant 1 : i32
    %10 = arith.cmpi eq, %arg1, %c1_i32 : i32
    %11 = arith.extui %10 : i1 to i32
    %c0_i32_7 = arith.constant 0 : i32
    %12 = arith.cmpi ne, %11, %c0_i32_7 : i32
    scf.if %12 {
      %c0_8 = arith.constant 0 : index
      %c0_9 = arith.constant 0 : index
      %13 = vector.load %arg5[%c0_8, %c0_9] : memref<16x16xf32, #tpu.memory_space<vmem>>, vector<16x16xf32>
      %cst_10 = arith.constant 2.500000e-01 : f32
      %14 = vector.broadcast %cst_10 : f32 to vector<16x16xf32>
      %15 = arith.mulf %13, %14 : vector<16x16xf32>
      %c0_11 = arith.constant 0 : index
      %c8 = arith.constant 8 : index
      %c128 = arith.constant 128 : index
      %16 = vector.load %arg7[%c0_11, %c8, %c128] : memref<2x32x272xf32, #tpu.memory_space<vmem>>, vector<1x16x16xf32>
      %17 = vector.shape_cast %16 : vector<1x16x16xf32> to vector<16x16xf32>
      %18 = vector.shape_cast %15 : vector<16x16xf32> to vector<1x16x16xf32>
      tpu.vector_store %arg7[%c0_11, %c8, %c128], %18 {strides = array<i32>} : memref<2x32x272xf32, #tpu.memory_space<vmem>>, vector<1x16x16xf32>,
      %c0_12 = arith.constant 0 : index
      %c0_13 = arith.constant 0 : index
      %19 = vector.load %arg6[%c0_12, %c0_13] : memref<16x16xf32, #tpu.memory_space<vmem>>, vector<16x16xf32>
      %c1 = arith.constant 1 : index
      %c8_14 = arith.constant 8 : index
      %c128_15 = arith.constant 128 : index
      %20 = vector.load %arg7[%c1, %c8_14, %c128_15] : memref<2x32x272xf32, #tpu.memory_space<vmem>>, vector<1x16x16xf32>
      %21 = vector.shape_cast %20 : vector<1x16x16xf32> to vector<16x16xf32>
      %22 = vector.shape_cast %19 : vector<16x16xf32> to vector<1x16x16xf32>
      tpu.vector_store %arg7[%c1, %c8_14, %c128_15], %22 {strides = array<i32>} : memref<2x32x272xf32, #tpu.memory_space<vmem>>, vector<1x16x16xf32>,
      %c0_16 = arith.constant 0 : index
      %c0_17 = arith.constant 0 : index
      %c0_18 = arith.constant 0 : index
      %23 = vector.load %arg7[%c0_16, %c0_17, %c0_18] : memref<2x32x272xf32, #tpu.memory_space<vmem>>, vector<1x32x272xf32>
      %24 = vector.shape_cast %23 : vector<1x32x272xf32> to vector<32x272xf32>
      %c1_19 = arith.constant 1 : index
      %c0_20 = arith.constant 0 : index
      %c0_21 = arith.constant 0 : index
      %25 = vector.load %arg7[%c1_19, %c0_20, %c0_21] : memref<2x32x272xf32, #tpu.memory_space<vmem>>, vector<1x32x272xf32>
      %26 = vector.shape_cast %25 : vector<1x32x272xf32> to vector<32x272xf32>
      %27 = vector.extract_strided_slice %24 {offsets = [0, 125], sizes = [32, 16], strides = [1, 1]} : vector<32x272xf32> to vector<32x16xf32>
      %28 = vector.extract_strided_slice %24 {offsets = [0, 126], sizes = [32, 16], strides = [1, 1]} : vector<32x272xf32> to vector<32x16xf32>
      %29 = vector.extract_strided_slice %24 {offsets = [0, 127], sizes = [32, 16], strides = [1, 1]} : vector<32x272xf32> to vector<32x16xf32>
      %30 = vector.extract_strided_slice %24 {offsets = [0, 128], sizes = [32, 16], strides = [1, 1]} : vector<32x272xf32> to vector<32x16xf32>
      %31 = vector.extract_strided_slice %24 {offsets = [0, 129], sizes = [32, 16], strides = [1, 1]} : vector<32x272xf32> to vector<32x16xf32>
      %32 = vector.extract_strided_slice %24 {offsets = [0, 130], sizes = [32, 16], strides = [1, 1]} : vector<32x272xf32> to vector<32x16xf32>
      %33 = vector.extract_strided_slice %24 {offsets = [0, 131], sizes = [32, 16], strides = [1, 1]} : vector<32x272xf32> to vector<32x16xf32>
      %34 = vector.extract_strided_slice %26 {offsets = [0, 125], sizes = [32, 16], strides = [1, 1]} : vector<32x272xf32> to vector<32x16xf32>
      %35 = vector.extract_strided_slice %26 {offsets = [0, 126], sizes = [32, 16], strides = [1, 1]} : vector<32x272xf32> to vector<32x16xf32>
      %36 = vector.extract_strided_slice %26 {offsets = [0, 127], sizes = [32, 16], strides = [1, 1]} : vector<32x272xf32> to vector<32x16xf32>
      %37 = vector.extract_strided_slice %26 {offsets = [0, 128], sizes = [32, 16], strides = [1, 1]} : vector<32x272xf32> to vector<32x16xf32>
      %38 = vector.extract_strided_slice %26 {offsets = [0, 129], sizes = [32, 16], strides = [1, 1]} : vector<32x272xf32> to vector<32x16xf32>
      %39 = vector.extract_strided_slice %26 {offsets = [0, 130], sizes = [32, 16], strides = [1, 1]} : vector<32x272xf32> to vector<32x16xf32>
      %40 = vector.extract_strided_slice %26 {offsets = [0, 131], sizes = [32, 16], strides = [1, 1]} : vector<32x272xf32> to vector<32x16xf32>
      %cst_22 = arith.constant 0.000000e+00 : f32
      %41 = vector.broadcast %cst_22 : f32 to vector<16x16xf32>
      %c0_23 = arith.constant 0 : index
      %42 = memref.load %arg2[%c0_23] : memref<98xf32, #tpu.memory_space<smem>>
      %c49 = arith.constant 49 : index
      %43 = memref.load %arg2[%c49] : memref<98xf32, #tpu.memory_space<smem>>
      %44 = vector.extract_strided_slice %27 {offsets = [5, 0], sizes = [16, 16], strides = [1, 1]} : vector<32x16xf32> to vector<16x16xf32>
      %45 = vector.broadcast %42 : f32 to vector<16x16xf32>
      %46 = arith.mulf %45, %44 : vector<16x16xf32>
      %47 = arith.addf %41, %46 : vector<16x16xf32>
      %48 = vector.extract_strided_slice %34 {offsets = [5, 0], sizes = [16, 16], strides = [1, 1]} : vector<32x16xf32> to vector<16x16xf32>
      %49 = vector.broadcast %43 : f32 to vector<16x16xf32>
      %50 = arith.mulf %49, %48 : vector<16x16xf32>
      %51 = arith.addf %47, %50 : vector<16x16xf32>
      %c1_24 = arith.constant 1 : index
      %52 = memref.load %arg2[%c1_24] : memref<98xf32, #tpu.memory_space<smem>>
      %c50 = arith.constant 50 : index
      %53 = memref.load %arg2[%c50] : memref<98xf32, #tpu.memory_space<smem>>
      %54 = vector.extract_strided_slice %28 {offsets = [5, 0], sizes = [16, 16], strides = [1, 1]} : vector<32x16xf32> to vector<16x16xf32>
      %55 = vector.broadcast %52 : f32 to vector<16x16xf32>
      %56 = arith.mulf %55, %54 : vector<16x16xf32>
      %57 = arith.addf %51, %56 : vector<16x16xf32>
      %58 = vector.extract_strided_slice %35 {offsets = [5, 0], sizes = [16, 16], strides = [1, 1]} : vector<32x16xf32> to vector<16x16xf32>
      %59 = vector.broadcast %53 : f32 to vector<16x16xf32>
      %60 = arith.mulf %59, %58 : vector<16x16xf32>
      %61 = arith.addf %57, %60 : vector<16x16xf32>
      %c2 = arith.constant 2 : index
      %62 = memref.load %arg2[%c2] : memref<98xf32, #tpu.memory_space<smem>>
      %c51 = arith.constant 51 : index
      %63 = memref.load %arg2[%c51] : memref<98xf32, #tpu.memory_space<smem>>
      %64 = vector.extract_strided_slice %29 {offsets = [5, 0], sizes = [16, 16], strides = [1, 1]} : vector<32x16xf32> to vector<16x16xf32>
      %65 = vector.broadcast %62 : f32 to vector<16x16xf32>
      %66 = arith.mulf %65, %64 : vector<16x16xf32>
      %67 = arith.addf %61, %66 : vector<16x16xf32>
      %68 = vector.extract_strided_slice %36 {offsets = [5, 0], sizes = [16, 16], strides = [1, 1]} : vector<32x16xf32> to vector<16x16xf32>
      %69 = vector.broadcast %63 : f32 to vector<16x16xf32>
      %70 = arith.mulf %69, %68 : vector<16x16xf32>
      %71 = arith.addf %67, %70 : vector<16x16xf32>
      %c3 = arith.constant 3 : index
      %72 = memref.load %arg2[%c3] : memref<98xf32, #tpu.memory_space<smem>>
      %c52 = arith.constant 52 : index
      %73 = memref.load %arg2[%c52] : memref<98xf32, #tpu.memory_space<smem>>
      %74 = vector.extract_strided_slice %30 {offsets = [5, 0], sizes = [16, 16], strides = [1, 1]} : vector<32x16xf32> to vector<16x16xf32>
      %75 = vector.broadcast %72 : f32 to vector<16x16xf32>
      %76 = arith.mulf %75, %74 : vector<16x16xf32>
      %77 = arith.addf %71, %76 : vector<16x16xf32>
      %78 = vector.extract_strided_slice %37 {offsets = [5, 0], sizes = [16, 16], strides = [1, 1]} : vector<32x16xf32> to vector<16x16xf32>
      %79 = vector.broadcast %73 : f32 to vector<16x16xf32>
      %80 = arith.mulf %79, %78 : vector<16x16xf32>
      %81 = arith.addf %77, %80 : vector<16x16xf32>
      %c4 = arith.constant 4 : index
      %82 = memref.load %arg2[%c4] : memref<98xf32, #tpu.memory_space<smem>>
      %c53 = arith.constant 53 : index
      %83 = memref.load %arg2[%c53] : memref<98xf32, #tpu.memory_space<smem>>
      %84 = vector.extract_strided_slice %31 {offsets = [5, 0], sizes = [16, 16], strides = [1, 1]} : vector<32x16xf32> to vector<16x16xf32>
      %85 = vector.broadcast %82 : f32 to vector<16x16xf32>
      %86 = arith.mulf %85, %84 : vector<16x16xf32>
      %87 = arith.addf %81, %86 : vector<16x16xf32>
      %88 = vector.extract_strided_slice %38 {offsets = [5, 0], sizes = [16, 16], strides = [1, 1]} : vector<32x16xf32> to vector<16x16xf32>
      %89 = vector.broadcast %83 : f32 to vector<16x16xf32>
      %90 = arith.mulf %89, %88 : vector<16x16xf32>
      %91 = arith.addf %87, %90 : vector<16x16xf32>
      %c5 = arith.constant 5 : index
      %92 = memref.load %arg2[%c5] : memref<98xf32, #tpu.memory_space<smem>>
      %c54 = arith.constant 54 : index
      %93 = memref.load %arg2[%c54] : memref<98xf32, #tpu.memory_space<smem>>
      %94 = vector.extract_strided_slice %32 {offsets = [5, 0], sizes = [16, 16], strides = [1, 1]} : vector<32x16xf32> to vector<16x16xf32>
      %95 = vector.broadcast %92 : f32 to vector<16x16xf32>
      %96 = arith.mulf %95, %94 : vector<16x16xf32>
      %97 = arith.addf %91, %96 : vector<16x16xf32>
      %98 = vector.extract_strided_slice %39 {offsets = [5, 0], sizes = [16, 16], strides = [1, 1]} : vector<32x16xf32> to vector<16x16xf32>
      %99 = vector.broadcast %93 : f32 to vector<16x16xf32>
      %100 = arith.mulf %99, %98 : vector<16x16xf32>
      %101 = arith.addf %97, %100 : vector<16x16xf32>
      %c6 = arith.constant 6 : index
      %102 = memref.load %arg2[%c6] : memref<98xf32, #tpu.memory_space<smem>>
      %c55 = arith.constant 55 : index
      %103 = memref.load %arg2[%c55] : memref<98xf32, #tpu.memory_space<smem>>
      %104 = vector.extract_strided_slice %33 {offsets = [5, 0], sizes = [16, 16], strides = [1, 1]} : vector<32x16xf32> to vector<16x16xf32>
      %105 = vector.broadcast %102 : f32 to vector<16x16xf32>
      %106 = arith.mulf %105, %104 : vector<16x16xf32>
      %107 = arith.addf %101, %106 : vector<16x16xf32>
      %108 = vector.extract_strided_slice %40 {offsets = [5, 0], sizes = [16, 16], strides = [1, 1]} : vector<32x16xf32> to vector<16x16xf32>
      %109 = vector.broadcast %103 : f32 to vector<16x16xf32>
      %110 = arith.mulf %109, %108 : vector<16x16xf32>
      %111 = arith.addf %107, %110 : vector<16x16xf32>
      %c7 = arith.constant 7 : index
      %112 = memref.load %arg2[%c7] : memref<98xf32, #tpu.memory_space<smem>>
      %c56 = arith.constant 56 : index
      %113 = memref.load %arg2[%c56] : memref<98xf32, #tpu.memory_space<smem>>
      %114 = vector.extract_strided_slice %27 {offsets = [6, 0], sizes = [16, 16], strides = [1, 1]} : vector<32x16xf32> to vector<16x16xf32>
      %115 = vector.broadcast %112 : f32 to vector<16x16xf32>
      %116 = arith.mulf %115, %114 : vector<16x16xf32>
      %117 = arith.addf %111, %116 : vector<16x16xf32>
      %118 = vector.extract_strided_slice %34 {offsets = [6, 0], sizes = [16, 16], strides = [1, 1]} : vector<32x16xf32> to vector<16x16xf32>
      %119 = vector.broadcast %113 : f32 to vector<16x16xf32>
      %120 = arith.mulf %119, %118 : vector<16x16xf32>
      %121 = arith.addf %117, %120 : vector<16x16xf32>
      %c8_25 = arith.constant 8 : index
      %122 = memref.load %arg2[%c8_25] : memref<98xf32, #tpu.memory_space<smem>>
      %c57 = arith.constant 57 : index
      %123 = memref.load %arg2[%c57] : memref<98xf32, #tpu.memory_space<smem>>
      %124 = vector.extract_strided_slice %28 {offsets = [6, 0], sizes = [16, 16], strides = [1, 1]} : vector<32x16xf32> to vector<16x16xf32>
      %125 = vector.broadcast %122 : f32 to vector<16x16xf32>
      %126 = arith.mulf %125, %124 : vector<16x16xf32>
      %127 = arith.addf %121, %126 : vector<16x16xf32>
      %128 = vector.extract_strided_slice %35 {offsets = [6, 0], sizes = [16, 16], strides = [1, 1]} : vector<32x16xf32> to vector<16x16xf32>
      %129 = vector.broadcast %123 : f32 to vector<16x16xf32>
      %130 = arith.mulf %129, %128 : vector<16x16xf32>
      %131 = arith.addf %127, %130 : vector<16x16xf32>
      %c9 = arith.constant 9 : index
      %132 = memref.load %arg2[%c9] : memref<98xf32, #tpu.memory_space<smem>>
      %c58 = arith.constant 58 : index
      %133 = memref.load %arg2[%c58] : memref<98xf32, #tpu.memory_space<smem>>
      %134 = vector.extract_strided_slice %29 {offsets = [6, 0], sizes = [16, 16], strides = [1, 1]} : vector<32x16xf32> to vector<16x16xf32>
      %135 = vector.broadcast %132 : f32 to vector<16x16xf32>
      %136 = arith.mulf %135, %134 : vector<16x16xf32>
      %137 = arith.addf %131, %136 : vector<16x16xf32>
      %138 = vector.extract_strided_slice %36 {offsets = [6, 0], sizes = [16, 16], strides = [1, 1]} : vector<32x16xf32> to vector<16x16xf32>
      %139 = vector.broadcast %133 : f32 to vector<16x16xf32>
      %140 = arith.mulf %139, %138 : vector<16x16xf32>
      %141 = arith.addf %137, %140 : vector<16x16xf32>
      %c10 = arith.constant 10 : index
      %142 = memref.load %arg2[%c10] : memref<98xf32, #tpu.memory_space<smem>>
      %c59 = arith.constant 59 : index
      %143 = memref.load %arg2[%c59] : memref<98xf32, #tpu.memory_space<smem>>
      %144 = vector.extract_strided_slice %30 {offsets = [6, 0], sizes = [16, 16], strides = [1, 1]} : vector<32x16xf32> to vector<16x16xf32>
      %145 = vector.broadcast %142 : f32 to vector<16x16xf32>
      %146 = arith.mulf %145, %144 : vector<16x16xf32>
      %147 = arith.addf %141, %146 : vector<16x16xf32>
      %148 = vector.extract_strided_slice %37 {offsets = [6, 0], sizes = [16, 16], strides = [1, 1]} : vector<32x16xf32> to vector<16x16xf32>
      %149 = vector.broadcast %143 : f32 to vector<16x16xf32>
      %150 = arith.mulf %149, %148 : vector<16x16xf32>
      %151 = arith.addf %147, %150 : vector<16x16xf32>
      %c11 = arith.constant 11 : index
      %152 = memref.load %arg2[%c11] : memref<98xf32, #tpu.memory_space<smem>>
      %c60 = arith.constant 60 : index
      %153 = memref.load %arg2[%c60] : memref<98xf32, #tpu.memory_space<smem>>
      %154 = vector.extract_strided_slice %31 {offsets = [6, 0], sizes = [16, 16], strides = [1, 1]} : vector<32x16xf32> to vector<16x16xf32>
      %155 = vector.broadcast %152 : f32 to vector<16x16xf32>
      %156 = arith.mulf %155, %154 : vector<16x16xf32>
      %157 = arith.addf %151, %156 : vector<16x16xf32>
      %158 = vector.extract_strided_slice %38 {offsets = [6, 0], sizes = [16, 16], strides = [1, 1]} : vector<32x16xf32> to vector<16x16xf32>
      %159 = vector.broadcast %153 : f32 to vector<16x16xf32>
      %160 = arith.mulf %159, %158 : vector<16x16xf32>
      %161 = arith.addf %157, %160 : vector<16x16xf32>
      %c12 = arith.constant 12 : index
      %162 = memref.load %arg2[%c12] : memref<98xf32, #tpu.memory_space<smem>>
      %c61 = arith.constant 61 : index
      %163 = memref.load %arg2[%c61] : memref<98xf32, #tpu.memory_space<smem>>
      %164 = vector.extract_strided_slice %32 {offsets = [6, 0], sizes = [16, 16], strides = [1, 1]} : vector<32x16xf32> to vector<16x16xf32>
      %165 = vector.broadcast %162 : f32 to vector<16x16xf32>
      %166 = arith.mulf %165, %164 : vector<16x16xf32>
      %167 = arith.addf %161, %166 : vector<16x16xf32>
      %168 = vector.extract_strided_slice %39 {offsets = [6, 0], sizes = [16, 16], strides = [1, 1]} : vector<32x16xf32> to vector<16x16xf32>
      %169 = vector.broadcast %163 : f32 to vector<16x16xf32>
      %170 = arith.mulf %169, %168 : vector<16x16xf32>
      %171 = arith.addf %167, %170 : vector<16x16xf32>
      %c13 = arith.constant 13 : index
      %172 = memref.load %arg2[%c13] : memref<98xf32, #tpu.memory_space<smem>>
      %c62 = arith.constant 62 : index
      %173 = memref.load %arg2[%c62] : memref<98xf32, #tpu.memory_space<smem>>
      %174 = vector.extract_strided_slice %33 {offsets = [6, 0], sizes = [16, 16], strides = [1, 1]} : vector<32x16xf32> to vector<16x16xf32>
      %175 = vector.broadcast %172 : f32 to vector<16x16xf32>
      %176 = arith.mulf %175, %174 : vector<16x16xf32>
      %177 = arith.addf %171, %176 : vector<16x16xf32>
      %178 = vector.extract_strided_slice %40 {offsets = [6, 0], sizes = [16, 16], strides = [1, 1]} : vector<32x16xf32> to vector<16x16xf32>
      %179 = vector.broadcast %173 : f32 to vector<16x16xf32>
      %180 = arith.mulf %179, %178 : vector<16x16xf32>
      %181 = arith.addf %177, %180 : vector<16x16xf32>
      %c14 = arith.constant 14 : index
      %182 = memref.load %arg2[%c14] : memref<98xf32, #tpu.memory_space<smem>>
      %c63 = arith.constant 63 : index
      %183 = memref.load %arg2[%c63] : memref<98xf32, #tpu.memory_space<smem>>
      %184 = vector.extract_strided_slice %27 {offsets = [7, 0], sizes = [16, 16], strides = [1, 1]} : vector<32x16xf32> to vector<16x16xf32>
      %185 = vector.broadcast %182 : f32 to vector<16x16xf32>
      %186 = arith.mulf %185, %184 : vector<16x16xf32>
      %187 = arith.addf %181, %186 : vector<16x16xf32>
      %188 = vector.extract_strided_slice %34 {offsets = [7, 0], sizes = [16, 16], strides = [1, 1]} : vector<32x16xf32> to vector<16x16xf32>
      %189 = vector.broadcast %183 : f32 to vector<16x16xf32>
      %190 = arith.mulf %189, %188 : vector<16x16xf32>
      %191 = arith.addf %187, %190 : vector<16x16xf32>
      %c15 = arith.constant 15 : index
      %192 = memref.load %arg2[%c15] : memref<98xf32, #tpu.memory_space<smem>>
      %c64 = arith.constant 64 : index
      %193 = memref.load %arg2[%c64] : memref<98xf32, #tpu.memory_space<smem>>
      %194 = vector.extract_strided_slice %28 {offsets = [7, 0], sizes = [16, 16], strides = [1, 1]} : vector<32x16xf32> to vector<16x16xf32>
      %195 = vector.broadcast %192 : f32 to vector<16x16xf32>
      %196 = arith.mulf %195, %194 : vector<16x16xf32>
      %197 = arith.addf %191, %196 : vector<16x16xf32>
      %198 = vector.extract_strided_slice %35 {offsets = [7, 0], sizes = [16, 16], strides = [1, 1]} : vector<32x16xf32> to vector<16x16xf32>
      %199 = vector.broadcast %193 : f32 to vector<16x16xf32>
      %200 = arith.mulf %199, %198 : vector<16x16xf32>
      %201 = arith.addf %197, %200 : vector<16x16xf32>
      %c16 = arith.constant 16 : index
      %202 = memref.load %arg2[%c16] : memref<98xf32, #tpu.memory_space<smem>>
      %c65 = arith.constant 65 : index
      %203 = memref.load %arg2[%c65] : memref<98xf32, #tpu.memory_space<smem>>
      %204 = vector.extract_strided_slice %29 {offsets = [7, 0], sizes = [16, 16], strides = [1, 1]} : vector<32x16xf32> to vector<16x16xf32>
      %205 = vector.broadcast %202 : f32 to vector<16x16xf32>
      %206 = arith.mulf %205, %204 : vector<16x16xf32>
      %207 = arith.addf %201, %206 : vector<16x16xf32>
      %208 = vector.extract_strided_slice %36 {offsets = [7, 0], sizes = [16, 16], strides = [1, 1]} : vector<32x16xf32> to vector<16x16xf32>
      %209 = vector.broadcast %203 : f32 to vector<16x16xf32>
      %210 = arith.mulf %209, %208 : vector<16x16xf32>
      %211 = arith.addf %207, %210 : vector<16x16xf32>
      %c17 = arith.constant 17 : index
      %212 = memref.load %arg2[%c17] : memref<98xf32, #tpu.memory_space<smem>>
      %c66 = arith.constant 66 : index
      %213 = memref.load %arg2[%c66] : memref<98xf32, #tpu.memory_space<smem>>
      %214 = vector.extract_strided_slice %30 {offsets = [7, 0], sizes = [16, 16], strides = [1, 1]} : vector<32x16xf32> to vector<16x16xf32>
      %215 = vector.broadcast %212 : f32 to vector<16x16xf32>
      %216 = arith.mulf %215, %214 : vector<16x16xf32>
      %217 = arith.addf %211, %216 : vector<16x16xf32>
      %218 = vector.extract_strided_slice %37 {offsets = [7, 0], sizes = [16, 16], strides = [1, 1]} : vector<32x16xf32> to vector<16x16xf32>
      %219 = vector.broadcast %213 : f32 to vector<16x16xf32>
      %220 = arith.mulf %219, %218 : vector<16x16xf32>
      %221 = arith.addf %217, %220 : vector<16x16xf32>
      %c18 = arith.constant 18 : index
      %222 = memref.load %arg2[%c18] : memref<98xf32, #tpu.memory_space<smem>>
      %c67 = arith.constant 67 : index
      %223 = memref.load %arg2[%c67] : memref<98xf32, #tpu.memory_space<smem>>
      %224 = vector.extract_strided_slice %31 {offsets = [7, 0], sizes = [16, 16], strides = [1, 1]} : vector<32x16xf32> to vector<16x16xf32>
      %225 = vector.broadcast %222 : f32 to vector<16x16xf32>
      %226 = arith.mulf %225, %224 : vector<16x16xf32>
      %227 = arith.addf %221, %226 : vector<16x16xf32>
      %228 = vector.extract_strided_slice %38 {offsets = [7, 0], sizes = [16, 16], strides = [1, 1]} : vector<32x16xf32> to vector<16x16xf32>
      %229 = vector.broadcast %223 : f32 to vector<16x16xf32>
      %230 = arith.mulf %229, %228 : vector<16x16xf32>
      %231 = arith.addf %227, %230 : vector<16x16xf32>
      %c19 = arith.constant 19 : index
      %232 = memref.load %arg2[%c19] : memref<98xf32, #tpu.memory_space<smem>>
      %c68 = arith.constant 68 : index
      %233 = memref.load %arg2[%c68] : memref<98xf32, #tpu.memory_space<smem>>
      %234 = vector.extract_strided_slice %32 {offsets = [7, 0], sizes = [16, 16], strides = [1, 1]} : vector<32x16xf32> to vector<16x16xf32>
      %235 = vector.broadcast %232 : f32 to vector<16x16xf32>
      %236 = arith.mulf %235, %234 : vector<16x16xf32>
      %237 = arith.addf %231, %236 : vector<16x16xf32>
      %238 = vector.extract_strided_slice %39 {offsets = [7, 0], sizes = [16, 16], strides = [1, 1]} : vector<32x16xf32> to vector<16x16xf32>
      %239 = vector.broadcast %233 : f32 to vector<16x16xf32>
      %240 = arith.mulf %239, %238 : vector<16x16xf32>
      %241 = arith.addf %237, %240 : vector<16x16xf32>
      %c20 = arith.constant 20 : index
      %242 = memref.load %arg2[%c20] : memref<98xf32, #tpu.memory_space<smem>>
      %c69 = arith.constant 69 : index
      %243 = memref.load %arg2[%c69] : memref<98xf32, #tpu.memory_space<smem>>
      %244 = vector.extract_strided_slice %33 {offsets = [7, 0], sizes = [16, 16], strides = [1, 1]} : vector<32x16xf32> to vector<16x16xf32>
      %245 = vector.broadcast %242 : f32 to vector<16x16xf32>
      %246 = arith.mulf %245, %244 : vector<16x16xf32>
      %247 = arith.addf %241, %246 : vector<16x16xf32>
      %248 = vector.extract_strided_slice %40 {offsets = [7, 0], sizes = [16, 16], strides = [1, 1]} : vector<32x16xf32> to vector<16x16xf32>
      %249 = vector.broadcast %243 : f32 to vector<16x16xf32>
      %250 = arith.mulf %249, %248 : vector<16x16xf32>
      %251 = arith.addf %247, %250 : vector<16x16xf32>
      %c21 = arith.constant 21 : index
      %252 = memref.load %arg2[%c21] : memref<98xf32, #tpu.memory_space<smem>>
      %c70 = arith.constant 70 : index
      %253 = memref.load %arg2[%c70] : memref<98xf32, #tpu.memory_space<smem>>
      %254 = vector.extract_strided_slice %27 {offsets = [8, 0], sizes = [16, 16], strides = [1, 1]} : vector<32x16xf32> to vector<16x16xf32>
      %255 = vector.broadcast %252 : f32 to vector<16x16xf32>
      %256 = arith.mulf %255, %254 : vector<16x16xf32>
      %257 = arith.addf %251, %256 : vector<16x16xf32>
      %258 = vector.extract_strided_slice %34 {offsets = [8, 0], sizes = [16, 16], strides = [1, 1]} : vector<32x16xf32> to vector<16x16xf32>
      %259 = vector.broadcast %253 : f32 to vector<16x16xf32>
      %260 = arith.mulf %259, %258 : vector<16x16xf32>
      %261 = arith.addf %257, %260 : vector<16x16xf32>
      %c22 = arith.constant 22 : index
      %262 = memref.load %arg2[%c22] : memref<98xf32, #tpu.memory_space<smem>>
      %c71 = arith.constant 71 : index
      %263 = memref.load %arg2[%c71] : memref<98xf32, #tpu.memory_space<smem>>
      %264 = vector.extract_strided_slice %28 {offsets = [8, 0], sizes = [16, 16], strides = [1, 1]} : vector<32x16xf32> to vector<16x16xf32>
      %265 = vector.broadcast %262 : f32 to vector<16x16xf32>
      %266 = arith.mulf %265, %264 : vector<16x16xf32>
      %267 = arith.addf %261, %266 : vector<16x16xf32>
      %268 = vector.extract_strided_slice %35 {offsets = [8, 0], sizes = [16, 16], strides = [1, 1]} : vector<32x16xf32> to vector<16x16xf32>
      %269 = vector.broadcast %263 : f32 to vector<16x16xf32>
      %270 = arith.mulf %269, %268 : vector<16x16xf32>
      %271 = arith.addf %267, %270 : vector<16x16xf32>
      %c23 = arith.constant 23 : index
      %272 = memref.load %arg2[%c23] : memref<98xf32, #tpu.memory_space<smem>>
      %c72 = arith.constant 72 : index
      %273 = memref.load %arg2[%c72] : memref<98xf32, #tpu.memory_space<smem>>
      %274 = vector.extract_strided_slice %29 {offsets = [8, 0], sizes = [16, 16], strides = [1, 1]} : vector<32x16xf32> to vector<16x16xf32>
      %275 = vector.broadcast %272 : f32 to vector<16x16xf32>
      %276 = arith.mulf %275, %274 : vector<16x16xf32>
      %277 = arith.addf %271, %276 : vector<16x16xf32>
      %278 = vector.extract_strided_slice %36 {offsets = [8, 0], sizes = [16, 16], strides = [1, 1]} : vector<32x16xf32> to vector<16x16xf32>
      %279 = vector.broadcast %273 : f32 to vector<16x16xf32>
      %280 = arith.mulf %279, %278 : vector<16x16xf32>
      %281 = arith.addf %277, %280 : vector<16x16xf32>
      %c24 = arith.constant 24 : index
      %282 = memref.load %arg2[%c24] : memref<98xf32, #tpu.memory_space<smem>>
      %c73 = arith.constant 73 : index
      %283 = memref.load %arg2[%c73] : memref<98xf32, #tpu.memory_space<smem>>
      %284 = vector.extract_strided_slice %30 {offsets = [8, 0], sizes = [16, 16], strides = [1, 1]} : vector<32x16xf32> to vector<16x16xf32>
      %285 = vector.broadcast %282 : f32 to vector<16x16xf32>
      %286 = arith.mulf %285, %284 : vector<16x16xf32>
      %287 = arith.addf %281, %286 : vector<16x16xf32>
      %288 = vector.extract_strided_slice %37 {offsets = [8, 0], sizes = [16, 16], strides = [1, 1]} : vector<32x16xf32> to vector<16x16xf32>
      %289 = vector.broadcast %283 : f32 to vector<16x16xf32>
      %290 = arith.mulf %289, %288 : vector<16x16xf32>
      %291 = arith.addf %287, %290 : vector<16x16xf32>
      %c25 = arith.constant 25 : index
      %292 = memref.load %arg2[%c25] : memref<98xf32, #tpu.memory_space<smem>>
      %c74 = arith.constant 74 : index
      %293 = memref.load %arg2[%c74] : memref<98xf32, #tpu.memory_space<smem>>
      %294 = vector.extract_strided_slice %31 {offsets = [8, 0], sizes = [16, 16], strides = [1, 1]} : vector<32x16xf32> to vector<16x16xf32>
      %295 = vector.broadcast %292 : f32 to vector<16x16xf32>
      %296 = arith.mulf %295, %294 : vector<16x16xf32>
      %297 = arith.addf %291, %296 : vector<16x16xf32>
      %298 = vector.extract_strided_slice %38 {offsets = [8, 0], sizes = [16, 16], strides = [1, 1]} : vector<32x16xf32> to vector<16x16xf32>
      %299 = vector.broadcast %293 : f32 to vector<16x16xf32>
      %300 = arith.mulf %299, %298 : vector<16x16xf32>
      %301 = arith.addf %297, %300 : vector<16x16xf32>
      %c26 = arith.constant 26 : index
      %302 = memref.load %arg2[%c26] : memref<98xf32, #tpu.memory_space<smem>>
      %c75 = arith.constant 75 : index
      %303 = memref.load %arg2[%c75] : memref<98xf32, #tpu.memory_space<smem>>
      %304 = vector.extract_strided_slice %32 {offsets = [8, 0], sizes = [16, 16], strides = [1, 1]} : vector<32x16xf32> to vector<16x16xf32>
      %305 = vector.broadcast %302 : f32 to vector<16x16xf32>
      %306 = arith.mulf %305, %304 : vector<16x16xf32>
      %307 = arith.addf %301, %306 : vector<16x16xf32>
      %308 = vector.extract_strided_slice %39 {offsets = [8, 0], sizes = [16, 16], strides = [1, 1]} : vector<32x16xf32> to vector<16x16xf32>
      %309 = vector.broadcast %303 : f32 to vector<16x16xf32>
      %310 = arith.mulf %309, %308 : vector<16x16xf32>
      %311 = arith.addf %307, %310 : vector<16x16xf32>
      %c27 = arith.constant 27 : index
      %312 = memref.load %arg2[%c27] : memref<98xf32, #tpu.memory_space<smem>>
      %c76 = arith.constant 76 : index
      %313 = memref.load %arg2[%c76] : memref<98xf32, #tpu.memory_space<smem>>
      %314 = vector.extract_strided_slice %33 {offsets = [8, 0], sizes = [16, 16], strides = [1, 1]} : vector<32x16xf32> to vector<16x16xf32>
      %315 = vector.broadcast %312 : f32 to vector<16x16xf32>
      %316 = arith.mulf %315, %314 : vector<16x16xf32>
      %317 = arith.addf %311, %316 : vector<16x16xf32>
      %318 = vector.extract_strided_slice %40 {offsets = [8, 0], sizes = [16, 16], strides = [1, 1]} : vector<32x16xf32> to vector<16x16xf32>
      %319 = vector.broadcast %313 : f32 to vector<16x16xf32>
      %320 = arith.mulf %319, %318 : vector<16x16xf32>
      %321 = arith.addf %317, %320 : vector<16x16xf32>
      %c28 = arith.constant 28 : index
      %322 = memref.load %arg2[%c28] : memref<98xf32, #tpu.memory_space<smem>>
      %c77 = arith.constant 77 : index
      %323 = memref.load %arg2[%c77] : memref<98xf32, #tpu.memory_space<smem>>
      %324 = vector.extract_strided_slice %27 {offsets = [9, 0], sizes = [16, 16], strides = [1, 1]} : vector<32x16xf32> to vector<16x16xf32>
      %325 = vector.broadcast %322 : f32 to vector<16x16xf32>
      %326 = arith.mulf %325, %324 : vector<16x16xf32>
      %327 = arith.addf %321, %326 : vector<16x16xf32>
      %328 = vector.extract_strided_slice %34 {offsets = [9, 0], sizes = [16, 16], strides = [1, 1]} : vector<32x16xf32> to vector<16x16xf32>
      %329 = vector.broadcast %323 : f32 to vector<16x16xf32>
      %330 = arith.mulf %329, %328 : vector<16x16xf32>
      %331 = arith.addf %327, %330 : vector<16x16xf32>
      %c29 = arith.constant 29 : index
      %332 = memref.load %arg2[%c29] : memref<98xf32, #tpu.memory_space<smem>>
      %c78 = arith.constant 78 : index
      %333 = memref.load %arg2[%c78] : memref<98xf32, #tpu.memory_space<smem>>
      %334 = vector.extract_strided_slice %28 {offsets = [9, 0], sizes = [16, 16], strides = [1, 1]} : vector<32x16xf32> to vector<16x16xf32>
      %335 = vector.broadcast %332 : f32 to vector<16x16xf32>
      %336 = arith.mulf %335, %334 : vector<16x16xf32>
      %337 = arith.addf %331, %336 : vector<16x16xf32>
      %338 = vector.extract_strided_slice %35 {offsets = [9, 0], sizes = [16, 16], strides = [1, 1]} : vector<32x16xf32> to vector<16x16xf32>
      %339 = vector.broadcast %333 : f32 to vector<16x16xf32>
      %340 = arith.mulf %339, %338 : vector<16x16xf32>
      %341 = arith.addf %337, %340 : vector<16x16xf32>
      %c30 = arith.constant 30 : index
      %342 = memref.load %arg2[%c30] : memref<98xf32, #tpu.memory_space<smem>>
      %c79 = arith.constant 79 : index
      %343 = memref.load %arg2[%c79] : memref<98xf32, #tpu.memory_space<smem>>
      %344 = vector.extract_strided_slice %29 {offsets = [9, 0], sizes = [16, 16], strides = [1, 1]} : vector<32x16xf32> to vector<16x16xf32>
      %345 = vector.broadcast %342 : f32 to vector<16x16xf32>
      %346 = arith.mulf %345, %344 : vector<16x16xf32>
      %347 = arith.addf %341, %346 : vector<16x16xf32>
      %348 = vector.extract_strided_slice %36 {offsets = [9, 0], sizes = [16, 16], strides = [1, 1]} : vector<32x16xf32> to vector<16x16xf32>
      %349 = vector.broadcast %343 : f32 to vector<16x16xf32>
      %350 = arith.mulf %349, %348 : vector<16x16xf32>
      %351 = arith.addf %347, %350 : vector<16x16xf32>
      %c31 = arith.constant 31 : index
      %352 = memref.load %arg2[%c31] : memref<98xf32, #tpu.memory_space<smem>>
      %c80 = arith.constant 80 : index
      %353 = memref.load %arg2[%c80] : memref<98xf32, #tpu.memory_space<smem>>
      %354 = vector.extract_strided_slice %30 {offsets = [9, 0], sizes = [16, 16], strides = [1, 1]} : vector<32x16xf32> to vector<16x16xf32>
      %355 = vector.broadcast %352 : f32 to vector<16x16xf32>
      %356 = arith.mulf %355, %354 : vector<16x16xf32>
      %357 = arith.addf %351, %356 : vector<16x16xf32>
      %358 = vector.extract_strided_slice %37 {offsets = [9, 0], sizes = [16, 16], strides = [1, 1]} : vector<32x16xf32> to vector<16x16xf32>
      %359 = vector.broadcast %353 : f32 to vector<16x16xf32>
      %360 = arith.mulf %359, %358 : vector<16x16xf32>
      %361 = arith.addf %357, %360 : vector<16x16xf32>
      %c32 = arith.constant 32 : index
      %362 = memref.load %arg2[%c32] : memref<98xf32, #tpu.memory_space<smem>>
      %c81 = arith.constant 81 : index
      %363 = memref.load %arg2[%c81] : memref<98xf32, #tpu.memory_space<smem>>
      %364 = vector.extract_strided_slice %31 {offsets = [9, 0], sizes = [16, 16], strides = [1, 1]} : vector<32x16xf32> to vector<16x16xf32>
      %365 = vector.broadcast %362 : f32 to vector<16x16xf32>
      %366 = arith.mulf %365, %364 : vector<16x16xf32>
      %367 = arith.addf %361, %366 : vector<16x16xf32>
      %368 = vector.extract_strided_slice %38 {offsets = [9, 0], sizes = [16, 16], strides = [1, 1]} : vector<32x16xf32> to vector<16x16xf32>
      %369 = vector.broadcast %363 : f32 to vector<16x16xf32>
      %370 = arith.mulf %369, %368 : vector<16x16xf32>
      %371 = arith.addf %367, %370 : vector<16x16xf32>
      %c33 = arith.constant 33 : index
      %372 = memref.load %arg2[%c33] : memref<98xf32, #tpu.memory_space<smem>>
      %c82 = arith.constant 82 : index
      %373 = memref.load %arg2[%c82] : memref<98xf32, #tpu.memory_space<smem>>
      %374 = vector.extract_strided_slice %32 {offsets = [9, 0], sizes = [16, 16], strides = [1, 1]} : vector<32x16xf32> to vector<16x16xf32>
      %375 = vector.broadcast %372 : f32 to vector<16x16xf32>
      %376 = arith.mulf %375, %374 : vector<16x16xf32>
      %377 = arith.addf %371, %376 : vector<16x16xf32>
      %378 = vector.extract_strided_slice %39 {offsets = [9, 0], sizes = [16, 16], strides = [1, 1]} : vector<32x16xf32> to vector<16x16xf32>
      %379 = vector.broadcast %373 : f32 to vector<16x16xf32>
      %380 = arith.mulf %379, %378 : vector<16x16xf32>
      %381 = arith.addf %377, %380 : vector<16x16xf32>
      %c34 = arith.constant 34 : index
      %382 = memref.load %arg2[%c34] : memref<98xf32, #tpu.memory_space<smem>>
      %c83 = arith.constant 83 : index
      %383 = memref.load %arg2[%c83] : memref<98xf32, #tpu.memory_space<smem>>
      %384 = vector.extract_strided_slice %33 {offsets = [9, 0], sizes = [16, 16], strides = [1, 1]} : vector<32x16xf32> to vector<16x16xf32>
      %385 = vector.broadcast %382 : f32 to vector<16x16xf32>
      %386 = arith.mulf %385, %384 : vector<16x16xf32>
      %387 = arith.addf %381, %386 : vector<16x16xf32>
      %388 = vector.extract_strided_slice %40 {offsets = [9, 0], sizes = [16, 16], strides = [1, 1]} : vector<32x16xf32> to vector<16x16xf32>
      %389 = vector.broadcast %383 : f32 to vector<16x16xf32>
      %390 = arith.mulf %389, %388 : vector<16x16xf32>
      %391 = arith.addf %387, %390 : vector<16x16xf32>
      %c35 = arith.constant 35 : index
      %392 = memref.load %arg2[%c35] : memref<98xf32, #tpu.memory_space<smem>>
      %c84 = arith.constant 84 : index
      %393 = memref.load %arg2[%c84] : memref<98xf32, #tpu.memory_space<smem>>
      %394 = vector.extract_strided_slice %27 {offsets = [10, 0], sizes = [16, 16], strides = [1, 1]} : vector<32x16xf32> to vector<16x16xf32>
      %395 = vector.broadcast %392 : f32 to vector<16x16xf32>
      %396 = arith.mulf %395, %394 : vector<16x16xf32>
      %397 = arith.addf %391, %396 : vector<16x16xf32>
      %398 = vector.extract_strided_slice %34 {offsets = [10, 0], sizes = [16, 16], strides = [1, 1]} : vector<32x16xf32> to vector<16x16xf32>
      %399 = vector.broadcast %393 : f32 to vector<16x16xf32>
      %400 = arith.mulf %399, %398 : vector<16x16xf32>
      %401 = arith.addf %397, %400 : vector<16x16xf32>
      %c36 = arith.constant 36 : index
      %402 = memref.load %arg2[%c36] : memref<98xf32, #tpu.memory_space<smem>>
      %c85 = arith.constant 85 : index
      %403 = memref.load %arg2[%c85] : memref<98xf32, #tpu.memory_space<smem>>
      %404 = vector.extract_strided_slice %28 {offsets = [10, 0], sizes = [16, 16], strides = [1, 1]} : vector<32x16xf32> to vector<16x16xf32>
      %405 = vector.broadcast %402 : f32 to vector<16x16xf32>
      %406 = arith.mulf %405, %404 : vector<16x16xf32>
      %407 = arith.addf %401, %406 : vector<16x16xf32>
      %408 = vector.extract_strided_slice %35 {offsets = [10, 0], sizes = [16, 16], strides = [1, 1]} : vector<32x16xf32> to vector<16x16xf32>
      %409 = vector.broadcast %403 : f32 to vector<16x16xf32>
      %410 = arith.mulf %409, %408 : vector<16x16xf32>
      %411 = arith.addf %407, %410 : vector<16x16xf32>
      %c37 = arith.constant 37 : index
      %412 = memref.load %arg2[%c37] : memref<98xf32, #tpu.memory_space<smem>>
      %c86 = arith.constant 86 : index
      %413 = memref.load %arg2[%c86] : memref<98xf32, #tpu.memory_space<smem>>
      %414 = vector.extract_strided_slice %29 {offsets = [10, 0], sizes = [16, 16], strides = [1, 1]} : vector<32x16xf32> to vector<16x16xf32>
      %415 = vector.broadcast %412 : f32 to vector<16x16xf32>
      %416 = arith.mulf %415, %414 : vector<16x16xf32>
      %417 = arith.addf %411, %416 : vector<16x16xf32>
      %418 = vector.extract_strided_slice %36 {offsets = [10, 0], sizes = [16, 16], strides = [1, 1]} : vector<32x16xf32> to vector<16x16xf32>
      %419 = vector.broadcast %413 : f32 to vector<16x16xf32>
      %420 = arith.mulf %419, %418 : vector<16x16xf32>
      %421 = arith.addf %417, %420 : vector<16x16xf32>
      %c38 = arith.constant 38 : index
      %422 = memref.load %arg2[%c38] : memref<98xf32, #tpu.memory_space<smem>>
      %c87 = arith.constant 87 : index
      %423 = memref.load %arg2[%c87] : memref<98xf32, #tpu.memory_space<smem>>
      %424 = vector.extract_strided_slice %30 {offsets = [10, 0], sizes = [16, 16], strides = [1, 1]} : vector<32x16xf32> to vector<16x16xf32>
      %425 = vector.broadcast %422 : f32 to vector<16x16xf32>
      %426 = arith.mulf %425, %424 : vector<16x16xf32>
      %427 = arith.addf %421, %426 : vector<16x16xf32>
      %428 = vector.extract_strided_slice %37 {offsets = [10, 0], sizes = [16, 16], strides = [1, 1]} : vector<32x16xf32> to vector<16x16xf32>
      %429 = vector.broadcast %423 : f32 to vector<16x16xf32>
      %430 = arith.mulf %429, %428 : vector<16x16xf32>
      %431 = arith.addf %427, %430 : vector<16x16xf32>
      %c39 = arith.constant 39 : index
      %432 = memref.load %arg2[%c39] : memref<98xf32, #tpu.memory_space<smem>>
      %c88 = arith.constant 88 : index
      %433 = memref.load %arg2[%c88] : memref<98xf32, #tpu.memory_space<smem>>
      %434 = vector.extract_strided_slice %31 {offsets = [10, 0], sizes = [16, 16], strides = [1, 1]} : vector<32x16xf32> to vector<16x16xf32>
      %435 = vector.broadcast %432 : f32 to vector<16x16xf32>
      %436 = arith.mulf %435, %434 : vector<16x16xf32>
      %437 = arith.addf %431, %436 : vector<16x16xf32>
      %438 = vector.extract_strided_slice %38 {offsets = [10, 0], sizes = [16, 16], strides = [1, 1]} : vector<32x16xf32> to vector<16x16xf32>
      %439 = vector.broadcast %433 : f32 to vector<16x16xf32>
      %440 = arith.mulf %439, %438 : vector<16x16xf32>
      %441 = arith.addf %437, %440 : vector<16x16xf32>
      %c40 = arith.constant 40 : index
      %442 = memref.load %arg2[%c40] : memref<98xf32, #tpu.memory_space<smem>>
      %c89 = arith.constant 89 : index
      %443 = memref.load %arg2[%c89] : memref<98xf32, #tpu.memory_space<smem>>
      %444 = vector.extract_strided_slice %32 {offsets = [10, 0], sizes = [16, 16], strides = [1, 1]} : vector<32x16xf32> to vector<16x16xf32>
      %445 = vector.broadcast %442 : f32 to vector<16x16xf32>
      %446 = arith.mulf %445, %444 : vector<16x16xf32>
      %447 = arith.addf %441, %446 : vector<16x16xf32>
      %448 = vector.extract_strided_slice %39 {offsets = [10, 0], sizes = [16, 16], strides = [1, 1]} : vector<32x16xf32> to vector<16x16xf32>
      %449 = vector.broadcast %443 : f32 to vector<16x16xf32>
      %450 = arith.mulf %449, %448 : vector<16x16xf32>
      %451 = arith.addf %447, %450 : vector<16x16xf32>
      %c41 = arith.constant 41 : index
      %452 = memref.load %arg2[%c41] : memref<98xf32, #tpu.memory_space<smem>>
      %c90 = arith.constant 90 : index
      %453 = memref.load %arg2[%c90] : memref<98xf32, #tpu.memory_space<smem>>
      %454 = vector.extract_strided_slice %33 {offsets = [10, 0], sizes = [16, 16], strides = [1, 1]} : vector<32x16xf32> to vector<16x16xf32>
      %455 = vector.broadcast %452 : f32 to vector<16x16xf32>
      %456 = arith.mulf %455, %454 : vector<16x16xf32>
      %457 = arith.addf %451, %456 : vector<16x16xf32>
      %458 = vector.extract_strided_slice %40 {offsets = [10, 0], sizes = [16, 16], strides = [1, 1]} : vector<32x16xf32> to vector<16x16xf32>
      %459 = vector.broadcast %453 : f32 to vector<16x16xf32>
      %460 = arith.mulf %459, %458 : vector<16x16xf32>
      %461 = arith.addf %457, %460 : vector<16x16xf32>
      %c42 = arith.constant 42 : index
      %462 = memref.load %arg2[%c42] : memref<98xf32, #tpu.memory_space<smem>>
      %c91 = arith.constant 91 : index
      %463 = memref.load %arg2[%c91] : memref<98xf32, #tpu.memory_space<smem>>
      %464 = vector.extract_strided_slice %27 {offsets = [11, 0], sizes = [16, 16], strides = [1, 1]} : vector<32x16xf32> to vector<16x16xf32>
      %465 = vector.broadcast %462 : f32 to vector<16x16xf32>
      %466 = arith.mulf %465, %464 : vector<16x16xf32>
      %467 = arith.addf %461, %466 : vector<16x16xf32>
      %468 = vector.extract_strided_slice %34 {offsets = [11, 0], sizes = [16, 16], strides = [1, 1]} : vector<32x16xf32> to vector<16x16xf32>
      %469 = vector.broadcast %463 : f32 to vector<16x16xf32>
      %470 = arith.mulf %469, %468 : vector<16x16xf32>
      %471 = arith.addf %467, %470 : vector<16x16xf32>
      %c43 = arith.constant 43 : index
      %472 = memref.load %arg2[%c43] : memref<98xf32, #tpu.memory_space<smem>>
      %c92 = arith.constant 92 : index
      %473 = memref.load %arg2[%c92] : memref<98xf32, #tpu.memory_space<smem>>
      %474 = vector.extract_strided_slice %28 {offsets = [11, 0], sizes = [16, 16], strides = [1, 1]} : vector<32x16xf32> to vector<16x16xf32>
      %475 = vector.broadcast %472 : f32 to vector<16x16xf32>
      %476 = arith.mulf %475, %474 : vector<16x16xf32>
      %477 = arith.addf %471, %476 : vector<16x16xf32>
      %478 = vector.extract_strided_slice %35 {offsets = [11, 0], sizes = [16, 16], strides = [1, 1]} : vector<32x16xf32> to vector<16x16xf32>
      %479 = vector.broadcast %473 : f32 to vector<16x16xf32>
      %480 = arith.mulf %479, %478 : vector<16x16xf32>
      %481 = arith.addf %477, %480 : vector<16x16xf32>
      %c44 = arith.constant 44 : index
      %482 = memref.load %arg2[%c44] : memref<98xf32, #tpu.memory_space<smem>>
      %c93 = arith.constant 93 : index
      %483 = memref.load %arg2[%c93] : memref<98xf32, #tpu.memory_space<smem>>
      %484 = vector.extract_strided_slice %29 {offsets = [11, 0], sizes = [16, 16], strides = [1, 1]} : vector<32x16xf32> to vector<16x16xf32>
      %485 = vector.broadcast %482 : f32 to vector<16x16xf32>
      %486 = arith.mulf %485, %484 : vector<16x16xf32>
      %487 = arith.addf %481, %486 : vector<16x16xf32>
      %488 = vector.extract_strided_slice %36 {offsets = [11, 0], sizes = [16, 16], strides = [1, 1]} : vector<32x16xf32> to vector<16x16xf32>
      %489 = vector.broadcast %483 : f32 to vector<16x16xf32>
      %490 = arith.mulf %489, %488 : vector<16x16xf32>
      %491 = arith.addf %487, %490 : vector<16x16xf32>
      %c45 = arith.constant 45 : index
      %492 = memref.load %arg2[%c45] : memref<98xf32, #tpu.memory_space<smem>>
      %c94 = arith.constant 94 : index
      %493 = memref.load %arg2[%c94] : memref<98xf32, #tpu.memory_space<smem>>
      %494 = vector.extract_strided_slice %30 {offsets = [11, 0], sizes = [16, 16], strides = [1, 1]} : vector<32x16xf32> to vector<16x16xf32>
      %495 = vector.broadcast %492 : f32 to vector<16x16xf32>
      %496 = arith.mulf %495, %494 : vector<16x16xf32>
      %497 = arith.addf %491, %496 : vector<16x16xf32>
      %498 = vector.extract_strided_slice %37 {offsets = [11, 0], sizes = [16, 16], strides = [1, 1]} : vector<32x16xf32> to vector<16x16xf32>
      %499 = vector.broadcast %493 : f32 to vector<16x16xf32>
      %500 = arith.mulf %499, %498 : vector<16x16xf32>
      %501 = arith.addf %497, %500 : vector<16x16xf32>
      %c46 = arith.constant 46 : index
      %502 = memref.load %arg2[%c46] : memref<98xf32, #tpu.memory_space<smem>>
      %c95 = arith.constant 95 : index
      %503 = memref.load %arg2[%c95] : memref<98xf32, #tpu.memory_space<smem>>
      %504 = vector.extract_strided_slice %31 {offsets = [11, 0], sizes = [16, 16], strides = [1, 1]} : vector<32x16xf32> to vector<16x16xf32>
      %505 = vector.broadcast %502 : f32 to vector<16x16xf32>
      %506 = arith.mulf %505, %504 : vector<16x16xf32>
      %507 = arith.addf %501, %506 : vector<16x16xf32>
      %508 = vector.extract_strided_slice %38 {offsets = [11, 0], sizes = [16, 16], strides = [1, 1]} : vector<32x16xf32> to vector<16x16xf32>
      %509 = vector.broadcast %503 : f32 to vector<16x16xf32>
      %510 = arith.mulf %509, %508 : vector<16x16xf32>
      %511 = arith.addf %507, %510 : vector<16x16xf32>
      %c47 = arith.constant 47 : index
      %512 = memref.load %arg2[%c47] : memref<98xf32, #tpu.memory_space<smem>>
      %c96 = arith.constant 96 : index
      %513 = memref.load %arg2[%c96] : memref<98xf32, #tpu.memory_space<smem>>
      %514 = vector.extract_strided_slice %32 {offsets = [11, 0], sizes = [16, 16], strides = [1, 1]} : vector<32x16xf32> to vector<16x16xf32>
      %515 = vector.broadcast %512 : f32 to vector<16x16xf32>
      %516 = arith.mulf %515, %514 : vector<16x16xf32>
      %517 = arith.addf %511, %516 : vector<16x16xf32>
      %518 = vector.extract_strided_slice %39 {offsets = [11, 0], sizes = [16, 16], strides = [1, 1]} : vector<32x16xf32> to vector<16x16xf32>
      %519 = vector.broadcast %513 : f32 to vector<16x16xf32>
      %520 = arith.mulf %519, %518 : vector<16x16xf32>
      %521 = arith.addf %517, %520 : vector<16x16xf32>
      %c48 = arith.constant 48 : index
      %522 = memref.load %arg2[%c48] : memref<98xf32, #tpu.memory_space<smem>>
      %c97 = arith.constant 97 : index
      %523 = memref.load %arg2[%c97] : memref<98xf32, #tpu.memory_space<smem>>
      %524 = vector.extract_strided_slice %33 {offsets = [11, 0], sizes = [16, 16], strides = [1, 1]} : vector<32x16xf32> to vector<16x16xf32>
      %525 = vector.broadcast %522 : f32 to vector<16x16xf32>
      %526 = arith.mulf %525, %524 : vector<16x16xf32>
      %527 = arith.addf %521, %526 : vector<16x16xf32>
      %528 = vector.extract_strided_slice %40 {offsets = [11, 0], sizes = [16, 16], strides = [1, 1]} : vector<32x16xf32> to vector<16x16xf32>
      %529 = vector.broadcast %523 : f32 to vector<16x16xf32>
      %530 = arith.mulf %529, %528 : vector<16x16xf32>
      %531 = arith.addf %527, %530 : vector<16x16xf32>
      %cst_26 = arith.constant 0.000000e+00 : f32
      %532 = vector.broadcast %cst_26 : f32 to vector<16x16xf32>
      %533 = arith.subf %532, %531 : vector<16x16xf32>
      %534 = math.exp %533 : vector<16x16xf32>
      %cst_27 = arith.constant 1.000000e+00 : f32
      %535 = vector.broadcast %cst_27 : f32 to vector<16x16xf32>
      %536 = arith.addf %535, %534 : vector<16x16xf32>
      %cst_28 = arith.constant 1.000000e+00 : f32
      %537 = vector.broadcast %cst_28 : f32 to vector<16x16xf32>
      %538 = arith.divf %537, %536 : vector<16x16xf32>
      %c0_29 = arith.constant 0 : index
      %c0_30 = arith.constant 0 : index
      %c0_31 = arith.constant 0 : index
      %539 = vector.load %arg4[%c0_29, %c0_30, %c0_31] : memref<1x16x16xf32, #tpu.memory_space<vmem>>, vector<1x16x16xf32>
      %540 = vector.shape_cast %539 : vector<1x16x16xf32> to vector<16x16xf32>
      %541 = vector.shape_cast %538 : vector<16x16xf32> to vector<1x16x16xf32>
      tpu.vector_store %arg4[%c0_29, %c0_30, %c0_31], %541 {strides = array<i32>} : memref<1x16x16xf32, #tpu.memory_space<vmem>>, vector<1x16x16xf32>,
    } else {
    }
    return
  }
  func.func @transform_0(%arg0: i32, %arg1: i32) -> i32 {
    %c0_i32 = arith.constant 0 : i32
    %c0_i32_0 = arith.constant 0 : i32
    return %c0_i32 : i32
  }
  func.func @transform_1(%arg0: i32, %arg1: i32) -> (i32, i32, i32, i32) {
    %c0_i32 = arith.constant 0 : i32
    %c0_i32_0 = arith.constant 0 : i32
    %c0_i32_1 = arith.constant 0 : i32
    return %arg0, %arg1, %c0_i32, %c0_i32_0 : i32, i32, i32, i32
  }
  func.func @transform_2(%arg0: i32, %arg1: i32) -> (i32, i32, i32) {
    %c0_i32 = arith.constant 0 : i32
    %c0_i32_0 = arith.constant 0 : i32
    %c0_i32_1 = arith.constant 0 : i32
    return %arg0, %c0_i32, %c0_i32_0 : i32, i32, i32
  }
}

</mosaic_0001>

<bundles_post_ra>
// kernel: tpu_custom_call.1
= control target key start
LH: loop header
LB: loop body
LE: loop exit
PB: predicated region body
PF: predicated region fallthrough
CT: control target
= control target key end

     0   :  { %s7015_s0 = inlined_call_operand.hbm [shape: f32[98], index: 0, kind: input, shape index: {}]   ;;  %s7016_s1 = inlined_call_operand.hbm [shape: f32[2,4,16,16], index: 1, kind: input, shape index: {}]   ;;  %s7017_s2 = inlined_call_operand.hbm [shape: f32[2,16,16], index: 2, kind: output, shape index: {}]  }
   0x1   :  { %7126 = sst [smem:[#allocation126_spill]] %s7015_s0 }
   0x2   :  { %7127 = sst [smem:[#allocation127_spill]] %s7017_s2 }
   0x3   :  { %7 = vsyncpa [#allocation8], 0 }
   0x4   :  { %8 = vsyncpa [#allocation6], 0 }
   0x5   :  { %10 = vsyncpa [#allocation6 + $0x1], 0 }
   0x6   :  { %11 = vsyncpa [#allocation7], 0 }
   0x7   :  { %13 = vsyncpa [#allocation7 + $0x1], 0  ;;  %s4370_s9 = smov 0   ;;  %s4372_s10 = smov 0  }
   0x8   :  { %s4374_s11 = smov 0   ;;  %s4376_s12 = smov 0  }
   0x9   :  { %s4378_s13 = smov 0   ;;  %s4380_s14 = smov 0  }
   0xa   :  { %s4382_s15 = smov 0   ;;  %s4384_s16 = smov 0  }
   0xb   :  { %s4386_s17 = smov 0   ;;  %s4388_s18 = smov 0  }
   0xc   :  { %s4390_s19 = smov 0  }
   0xd LB: > { %7128 = sst [smem:[#allocation14_spill]] %s4300_s9  ;;  %s3855_s20 = sadd.s32 4294967295, %s4340_s19   ;;  %s4340_s19 = sphi %s4390_s19, %s19_s19   ;;  %s4336_s18 = sphi %s4388_s18, %s7434_s18   ;;  %s4332_s17 = sphi %s4386_s17, %s7433_s17   ;;  %s4328_s16 = sphi %s4384_s16, %s7432_s16   ;;  %s4324_s15 = sphi %s4382_s15, %s7424_s15   ;;  %s4320_s14 = sphi %s4380_s14, %s7431_s14   ;;  %s4316_s13 = sphi %s4378_s13, %s7430_s13   ;;  %s4312_s12 = sphi %s4376_s12, %s7429_s12   ;;  %s4308_s11 = sphi %s4374_s11, %s7428_s11   ;;  %s4304_s10 = sphi %s4372_s10, %s7427_s10   ;;  %s4300_s9 = sphi %s4370_s9, %s7426_s9  }
   0xe   : > { %7129 = sst [smem:[#allocation15_spill]] %s4332_s17  ;;  %s3856_s21 = sadd.s32 4294967294, %s4340_s19  }
   0xf   : > { %7130 = sst [smem:[#allocation16_spill]] %s4340_s19  ;;  %p68_p0 = scmp.ne.s32.totalorder %s4320_s14, %s4316_s13 }
  0x10   : > { %p69_p1 = scmp.eq.s32.totalorder %s4340_s19, 0  ;;  %p74_p2 = scmp.ne.s32.totalorder %s4316_s13, %s4312_s12 }
  0x11   : > { %p4430_p3 = scmp.eq.s32.totalorder %s3855_s20, 0  ;;  %p97_p5 = scmp.ne.s32.totalorder %s4308_s11, %s4304_s10 }
  0x12   : > { %p4435_p4 = por %p69_p1, %p68_p0  ;;  %p98_p7 = scmp.eq.s32.totalorder %s3855_s20, 3 }
  0x13   : > { %p4443_p6 = por %p4430_p3, %p74_p2  ;;  %p103_p8 = scmp.ne.s32.totalorder %s4304_s10, %s4300_s9 }
  0x14   : > { %p104_p9 = scmp.eq.s32.totalorder %s3856_s21, 3  ;;  %p4449_p10 = por %p98_p7, %p97_p5 }
  0x15   : > { %p3857_p11 = scmp.ge.s32.totalorder %s4340_s19, 1  ;;  %p111_p13 = scmp.lt.s32.totalorder %s4340_s19, 5 }
  0x16   : > { %s7134_s27 = scalar_select %p4449_p10, 1, 0 }
  0x17   : > { %p4454_p12 = por %p104_p9, %p103_p8  ;;  %s7138_s0 = sld [smem:[#allocation126_spill]] }
  0x18   : > { %7135 = sst [smem:[#allocation17_spill]] %s7134_s27  ;;  %p4462_p0 = pnand %p3857_p11, %p111_p13 }
  0x19   : > { %s7136_s28 = scalar_select %p4454_p12, 1, 0 }
  0x1a   : > { %p3984_p1 = pneg %p4462_p0  ;;  %p3997_p2 = scmp.lt.s32.totalorder %s4340_s19, 4 }
  0x1b   : > { %7137 = sst [smem:[#allocation18_spill]] %s7136_s28  ;;  %s4342_s6 = smov [#allocation5]  }
  0x1c   : > { %p3985_p5 = pnand %p3984_p1, %p4430_p3  ;;  %p4473_p7 = pnand %p3997_p2, %p4435_p4 }
  0x1d   : > { %s123_s3 = sshll.u32 %s7138_s0, 4  ;;  %s28_s7 = sadd.s32 1, %s4332_s17  ;;  %s124_s3 = int_to_ptr.hbm [resolvable:$true] %s123_s3 }
  0x1e   : > { %3987 = dma.hbm_to_smem (!%p3985_p5), %s124_s3, 16, %s4342_s6, [#allocation8]  }
  0x1f   : > { %s31_s8 = sadd.s32 1, %s4336_s18  ;;  %p29_p8 = scmp.ge.s32.totalorder %s28_s7, 2 }
  0x20   : > { %s134_s12 = sand.u32 1, %s4320_s14   ;;  %s3974_s25 = sshll.u32 %s4332_s17, 2 }
  0x21   : > { %s3860_s20 = sshll.u32 %s134_s12, 5  ;;  %s7436_s7 = smov (%p29_p8, %s28_s7), 0 }
  0x22   : > { %7141 = sst [smem:[#allocation19_spill]] %s7436_s7  ;;  %s7438_s8 = smov (!%p29_p8, %s31_s8), %s4336_s18 }
  0x23   : > { %s57_s21 = ssub.s32 %s4332_s17, %s7436_s7  ;;  %p33_p4 = scmp.ge.s32.totalorder %s7438_s8, 2 }
  0x24   : > { %s3863_s29 = sshll.u32 %s4336_s18, 3  ;;  %s138_s30 = scalar_lea.vmem [#allocation9], %s3860_s20 }
  0x25   : > { %s149_s3 = sshll.u32 %s138_s30, 4  ;;  %s7440_s8 = smov (%p33_p4, %s7438_s8), 0  ;;  %s150_s3 = int_to_ptr.vmem [resolvable:$true] %s149_s3 }
  0x26   : > { %s144_s6 = sadd.s32 %s3974_s25, %s3863_s29  ;;  %s56_s22 = ssub.s32 %s4336_s18, %s7440_s8 }
  0x27   : > { %s3864_s24 = sshll.u32 %s144_s6, 3  ;;  %s58_s0 = sor.u32 %s57_s21, %s56_s22 }
  0x28   : > { %p85_p9 = scmp.eq.s32.totalorder %s56_s22, 0  ;;  %p59_p11 = scmp.eq.s32.totalorder %s58_s0, 0 }
  0x29   : > { %s146_s9 = scalar_lea.hbm %s7016_s1, %s3864_s24  ;;  %s7142_s19 = sadd.s32 1, %s4308_s11 }
  0x2a   : > { %s4497_s17 = scalar_select %p85_p9, %s4308_s11, %s7142_s19  }
  0x2b   : > { %s7143_s20 = sadd.s32 1, %s4320_s14  ;;  %s147_s2 = sshll.u32 %s146_s9, 4  ;;  %s148_s2 = int_to_ptr.hbm [resolvable:$true] %s147_s2 }
  0x2c   : > { %s4502_s30 = scalar_select %p59_p11, %s4320_s14, %s7143_s20  }
  0x2d   : > { %s135_s27 = scalar_lea.sflag [#allocation6], %s134_s12  ;;  %s4343_s25 = smov 128  }
  0x2e   : > { %s4344_s29 = smov 8   ;;  %161 = sbr.rel (%p4462_p0) target bundleno = 1298 (0x512), region = 28 }
  0x2f   : > { %3991 = dma.hbm_to_vmem [thread:$0]  (!%p4473_p7), %s148_s2, 512, %s150_s3, %s135_s27, %s4343_s25, %s4343_s25, %s4344_s29  }
  0x33   : > { %4287 = dma.done.wait (%p4430_p3), [#allocation8], 16  }
  0x34   : > { %4289 = vsyncadd (%p4430_p3), [#allocation8], 4294967280  ;;  %s168_s0 = sand.u32 1, %s4316_s13  }
  0x35   : > { %s3867_s19 = sshll.u32 %s168_s0, 5  ;;  %s169_s9 = scalar_lea.sflag [#allocation6], %s168_s0 }
  0x36   : > { %s172_s22 = scalar_lea.vmem [#allocation9], %s3867_s19 }
  0x37   : > { %4291 = dma.done.wait (%p4443_p6), %s169_s9, 512  }
  0x38   : > { %4293 = vsyncadd (%p4443_p6), %s169_s9, 4294966784 }
  0x39   : > { %178 = sfence }
  0x3a   : > { %s192_s2 = sand.u32 1, %s4304_s10   ;;  %v196_v0 = vld [vmem:[%s172_s22] sm:$0xff]  ;;  %v197_v1 = vld [vmem:[%s172_s22 + $0x8] sm:$0xff]  ;;  %v198_v2 = vld [vmem:[%s172_s22 + $0x10] sm:$0xff]  ;;  %vm200_vm0 = vcmask 130048   ;;  %p3869_p3 = scmp.ne.s32.totalorder %s4324_s15, 0 }
  0x3b   : > { %s3868_s23 = sshll.u32 %s192_s2, 4  ;;  %v199_v3 = vld [vmem:[%s172_s22 + $0x18] sm:$0xff]  ;;  %v201_v4 = vsel %vm200_vm0, %v196_v0, 0.0  ;;  %v202_v5 = vsel %vm200_vm0, %v198_v2, 0.0  ;;  %v204_v6 = vsel %vm200_vm0, %v197_v1, 0.0  ;;  %v207_v7 = vsel %vm200_vm0, %v196_v0, -inf }
  0x3c   : > { %v203_v8 = vadd.f32 %v202_v5, %v201_v4  ;;  %v205_v9 = vsel %vm200_vm0, %v199_v3, 0.0  ;;  %v208_v10 = vsel %vm200_vm0, %v198_v2, -inf  ;;  %v210_v11 = vsel %vm200_vm0, %v197_v1, -inf  ;;  %s4528_s24 = scalar_lea.vmem [#allocation10], %s3868_s23  ;;  %216 = sbr.rel (%p3869_p3) target bundleno = 85 (0x55), region = 40 }
  0x3d   : > { %v206_v12 = vadd.f32 %v205_v9, %v204_v6  ;;  %v209_v13 = vmax.f32 %v207_v7, %v208_v10  ;;  %v211_v14 = vsel %vm200_vm0, %v199_v3, -inf }
  0x3e   : > { %v212_v15 = vmax.f32 %v210_v11, %v211_v14 }
  0x41   : > { %217 = vst.msk [vmem:[#allocation2] sm:$0xff] %vm200_vm0, %v203_v8  ;;  %v4345_v16 = vmov 0.0  }
  0x42   : > { %218 = vst.msk [vmem:[#allocation2 + $0x8] sm:$0xff] %vm200_vm0, %v206_v12 }
  0x43   : > { %219 = vst.msk [vmem:[#allocation3] sm:$0xff] %vm200_vm0, %v209_v13 }
  0x44   : > { %220 = vst.msk [vmem:[#allocation3 + $0x8] sm:$0xff] %vm200_vm0, %v212_v15 }
  0x45   : > { %221 = vst [vmem:[#allocation4] sm:$0xff] %v4345_v16 }
  0x46   : > { %222 = vst [vmem:[#allocation4 + $0x8] sm:$0xff] %v4345_v16 }
  0x47   : > { %224 = vst [vmem:[#allocation4 + $0x18] sm:$0xff] %v4345_v16 }
  0x48   : > { %225 = vst [vmem:[#allocation4 + $0x20] sm:$0xff] %v4345_v16 }
  0x49   : > { %227 = vst [vmem:[#allocation4 + $0x30] sm:$0xff] %v4345_v16 }
  0x4a   : > { %228 = vst [vmem:[#allocation4 + $0x38] sm:$0xff] %v4345_v16 }
  0x4b   : > { %230 = vst [vmem:[#allocation4 + $0x48] sm:$0xff] %v4345_v16 }
  0x4c   : > { %231 = vst [vmem:[#allocation4 + $0x50] sm:$0xff] %v4345_v16 }
  0x4d   : > { %233 = vst [vmem:[#allocation4 + $0x60] sm:$0xff] %v4345_v16 }
  0x4e   : > { %234 = vst [vmem:[#allocation4 + $0x68] sm:$0xff] %v4345_v16 }
  0x4f   : > { %236 = vst [vmem:[#allocation4 + $0x78] sm:$0xff] %v4345_v16 }
  0x50   : > { %237 = vst [vmem:[#allocation4 + $0x80] sm:$0xff] %v4345_v16 }
  0x51   : > { %239 = vst [vmem:[#allocation4 + $0x90] sm:$0xff] %v4345_v16 }
  0x52   : > { %240 = vst [vmem:[#allocation4 + $0x98] sm:$0xff] %v4345_v16 }
  0x53   : > { %242 = vst [vmem:[#allocation4 + $0xa8] sm:$0xff] %v4345_v16 }
  0x54   : > { %243 = vst [vmem:[#allocation4 + $0xb0] sm:$0xff] %v4345_v16 }
  0x55 PF: > { %p3870_p6 = scmp.le.s32.totalorder %s4324_s15, 0 }
  0x57   : > { %248 = sbr.rel (%p3870_p6) target bundleno = 99 (0x63), region = 44 }
  0x5c   : > { %v249_v17 = vld [vmem:[#allocation2] sm:$0xff]  ;;  %v250_v18 = vld [vmem:[#allocation2 + $0x8] sm:$0xff]  ;;  %v255_v19 = vld [vmem:[#allocation3] sm:$0xff] }
  0x5d   : > { %v251_v20 = vadd.f32 %v249_v17, %v203_v8  ;;  %v252_v21 = vadd.f32 %v250_v18, %v206_v12  ;;  %v257_v22 = vmax.f32 %v255_v19, %v209_v13  ;;  %v256_v23 = vld [vmem:[#allocation3 + $0x8] sm:$0xff] }
  0x5e   : > { %v258_v24 = vmax.f32 %v256_v23, %v212_v15 }
  0x5f   : > { %253 = vst.msk [vmem:[#allocation2] sm:$0xff] %vm200_vm0, %v251_v20 }
  0x60   : > { %254 = vst.msk [vmem:[#allocation2 + $0x8] sm:$0xff] %vm200_vm0, %v252_v21 }
  0x61   : > { %259 = vst.msk [vmem:[#allocation3] sm:$0xff] %vm200_vm0, %v257_v22 }
  0x62   : > { %260 = vst.msk [vmem:[#allocation3 + $0x8] sm:$0xff] %vm200_vm0, %v258_v24 }
  0x63 PF: > { %p3871_p13 = scmp.ne.s32.totalorder %s4324_s15, 1 }
  0x65   : > { %264 = sbr.rel (%p3871_p13) target bundleno = 1277 (0x4fd), region = 48 }
  0x6a   : > { %s3873_s26 = sld [smem:[#allocation5 + $0x1]]  ;;  %v266_v25 = vld [vmem:[#allocation2 + $0x8] sm:$0xff]  ;;  %v265_v26 = vld [vmem:[#allocation2] sm:$0xff]  ;;  %v4541_v29 = vld [vmem:[#allocation4 + $0x30] sm:$0xff]  ;;  %s4346_s15 = smov 127   ;;  %vm685_vm1 = vcmask 1046528  }
  0x6b   : > { %v268_v27 = vmul.f32 0.25, %v266_v25  ;;  %v267_v28 = vmul.f32 0.25, %v265_v26  ;;  %v271_v30 = vld [vmem:[#allocation3] sm:$0xff]  ;;  %v4543_v31 = vld [vmem:[#allocation4 + $0x18] sm:$0xff]  ;;  %v4545_v32 = vld [vmem:[#allocation4] sm:$0xff]  ;;  %s3874_s27 = sld [smem:[#allocation5 + $0x32]] }
  0x6c   : > { %v272_v33 = vld [vmem:[#allocation3 + $0x8] sm:$0xff]  ;;  %274 = vst.msk [vmem:[#allocation4 + $0x80] sm:$0xff] %vm200_vm0, %v271_v30  ;;  %v4557_v38 = vld [vmem:[#allocation4 + $0x8] sm:$0xff]  ;;  %v4573_v47 = vld [vmem:[#allocation4 + $0x60] sm:$0xff]  ;;  %s3875_s28 = sld [smem:[#allocation5 + $0x2]]  ;;  %s4347_s4 = smov 126  }
  0x6d   : > { %270 = vst.msk [vmem:[#allocation4 + $0x38] sm:$0xff] %vm200_vm0, %v268_v27  ;;  %v4569_v45 = vld [vmem:[#allocation4 + $0x78] sm:$0xff]  ;;  %v4571_v46 = vld [vmem:[#allocation4 + $0x68] sm:$0xff]  ;;  %v4583_v52 = vld [vmem:[#allocation4 + $0x90] sm:$0xff]  ;;  %s3876_s5 = sld [smem:[#allocation5 + $0x33]]  ;;  %s4348_s21 = smov 125  }
  0x6e   : > { %269 = vst.msk [vmem:[#allocation4 + $0x20] sm:$0xff] %vm200_vm0, %v267_v28  ;;  %s3877_s7 = sld [smem:[#allocation5 + $0x3]]  ;;  %s4349_s20 = smov 124   ;;  %vm1186_vm2 = vcmask 1045504   ;;  %vm1683_vm3 = vcmask 1044480   ;;  %vm347_vm4 = vcmask 1039360  }
  0x6f   : > { %275 = vst.msk [vmem:[#allocation4 + $0x98] sm:$0xff] %vm200_vm0, %v272_v33  ;;  %s3878_s12 = sld [smem:[#allocation5 + $0x34]]  ;;  %s4350_s0 = smov 123   ;;  %vm430_vm5 = vcmask 1031168   ;;  %vm2108_vm6 = vcmask 1043456   ;;  %vm2609_vm7 = vcmask 1042432  }
  0x70   : > { %v322_v34 = vstv %s3873_s26  ;;  %s3879_s3 = sld [smem:[#allocation5 + $0x4]]  ;;  %s4351_s23 = smov 122   ;;  %vm3110_vm8 = vcmask 1041408  }
  0x71   : > { %v327_v35 = vmul.f32 %v322_v34, %v4541_v29  ;;  %v325_v36 = vmul.f32 %v322_v34, %v4543_v31  ;;  %v323_v37 = vmul.f32 %v322_v34, %v4545_v32  ;;  %v324_v43 = vmul.f32 %v322_v34, %v4557_v38  ;;  %s3880_s6 = sld [smem:[#allocation5 + $0x35]] }
  0x72   : > { %v363_v44 = vstv %s3874_s27  ;;  %v405_v57 = vstv %s3875_s28  ;;  %s3881_s25 = sld [smem:[#allocation5 + $0x5]] }
  0x73   : > { %343 = vrot.lane.b32.xlu2 %v327_v35, %s4346_s15  ;;  %339 = vrot.lane.b32.xlu1 %v325_v36, %s4346_s15  ;;  %v366_v48 = vmul.f32 %v363_v44, %v4569_v45  ;;  %v365_v49 = vmul.f32 %v363_v44, %v4571_v46  ;;  %v364_v50 = vmul.f32 %v363_v44, %v4573_v47  ;;  %v4585_v53 = vld [vmem:[#allocation4 + $0x80] sm:$0xff]  ;;  %v446_v0 = vstv %s3876_s5  ;;  %s3882_s29 = sld [smem:[#allocation5 + $0x36]] }
  0x74   : > { %335 = vrot.lane.b32.xlu0 %v323_v37, %s4346_s15  ;;  %v4559_v39 = vld [vmem:[#allocation4 + $0x38] sm:$0xff]  ;;  %v368_v55 = vmul.f32 %v363_v44, %v4583_v52  ;;  %v367_v56 = vmul.f32 %v363_v44, %v4585_v53  ;;  %v408_v58 = vmul.f32 %v405_v57, %v4543_v31  ;;  %v407_v59 = vmul.f32 %v405_v57, %v4557_v38  ;;  %s3883_s19 = sld [smem:[#allocation5 + $0x6]] }
  0x75   : > { %v4561_v40 = vld [vmem:[#allocation4 + $0x20] sm:$0xff]  ;;  %v328_v41 = vmul.f32 %v322_v34, %v4559_v39  ;;  %v406_v60 = vmul.f32 %v405_v57, %v4545_v32  ;;  %v411_v61 = vmul.f32 %v405_v57, %v4559_v39  ;;  %v410_v62 = vmul.f32 %v405_v57, %v4541_v29  ;;  %s3884_s9 = sld [smem:[#allocation5 + $0x37]] }
  0x76   : > { %v326_v42 = vmul.f32 %v322_v34, %v4561_v40  ;;  %v4581_v51 = vld [vmem:[#allocation4 + $0x98] sm:$0xff]  ;;  %v409_v63 = vmul.f32 %v405_v57, %v4561_v40  ;;  %v449_v1 = vmul.f32 %v446_v0, %v4569_v45  ;;  %v448_v2 = vmul.f32 %v446_v0, %v4571_v46  ;;  %s3887_s22 = sld [smem:[#allocation5 + $0x8]] }
  0x77   : > { %v369_v54 = vmul.f32 %v363_v44, %v4581_v51  ;;  %v447_v3 = vmul.f32 %v446_v0, %v4573_v47  ;;  %v452_v4 = vmul.f32 %v446_v0, %v4581_v51  ;;  %v451_v5 = vmul.f32 %v446_v0, %v4583_v52  ;;  %s3888_s26 = sld [smem:[#allocation5 + $0x39]] }
  0x78   : > { %v450_v6 = vmul.f32 %v446_v0, %v4585_v53  ;;  %v488_v7 = vstv %s3877_s7  ;;  %v510_v11 = vstv %s3878_s12  ;;  %v534_v15 = vstv %s3879_s3  ;;  %s3889_s27 = sld [smem:[#allocation5 + $0x9]] }
  0x79   : > { %v491_v8 = vmul.f32 %v488_v7, %v4559_v39  ;;  %v490_v9 = vmul.f32 %v488_v7, %v4561_v40  ;;  %v489_v10 = vmul.f32 %v488_v7, %v4557_v38  ;;  %v513_v12 = vmul.f32 %v510_v11, %v4581_v51  ;;  %s3890_s28 = sld [smem:[#allocation5 + $0x3a]] }
  0x7a   : > { %v512_v13 = vmul.f32 %v510_v11, %v4585_v53  ;;  %v511_v14 = vmul.f32 %v510_v11, %v4571_v46  ;;  %v537_v16 = vmul.f32 %v534_v15, %v4559_v39  ;;  %v536_v17 = vmul.f32 %v534_v15, %v4561_v40  ;;  %s3891_s5 = sld [smem:[#allocation5 + $0xa]] }
  0x7b   : > { %345 = vrot.lane.b32.xlu2 %v328_v41, %s4346_s15  ;;  %341 = vrot.lane.b32.xlu1 %v326_v42, %s4346_s15  ;;  %v535_v18 = vmul.f32 %v534_v15, %v4557_v38  ;;  %v556_v19 = vstv %s3880_s6  ;;  %v580_v23 = vstv %s3881_s25  ;;  %s3892_s7 = sld [smem:[#allocation5 + $0x3b]] }
  0x7c   : > { %337 = vrot.lane.b32.xlu0 %v324_v43, %s4346_s15  ;;  %v559_v20 = vmul.f32 %v556_v19, %v4581_v51  ;;  %v558_v21 = vmul.f32 %v556_v19, %v4585_v53  ;;  %v557_v22 = vmul.f32 %v556_v19, %v4571_v46  ;;  %v583_v25 = vmul.f32 %v580_v23, %v4559_v39  ;;  %s3893_s12 = sld [smem:[#allocation5 + $0xb]] }
  0x7d   : > { %v582_v26 = vmul.f32 %v580_v23, %v4561_v40  ;;  %v581_v27 = vmul.f32 %v580_v23, %v4557_v38  ;;  %v602_v28 = vstv %s3882_s29  ;;  %v626_v36 = vstv %s3883_s19  ;;  %s3894_s3 = sld [smem:[#allocation5 + $0x3c]] }
  0x7e   : > { %v605_v33 = vmul.f32 %v602_v28, %v4581_v51  ;;  %v604_v34 = vmul.f32 %v602_v28, %v4585_v53  ;;  %v603_v35 = vmul.f32 %v602_v28, %v4571_v46  ;;  %v629_v41 = vmul.f32 %v626_v36, %v4559_v39  ;;  %s3895_s6 = sld [smem:[#allocation5 + $0xc]] }
  0x7f   : > { %v628_v42 = vmul.f32 %v626_v36, %v4561_v40  ;;  %v627_v43 = vmul.f32 %v626_v36, %v4557_v38  ;;  %v648_v44 = vstv %s3884_s9  ;;  %s3896_s25 = sld [smem:[#allocation5 + $0x3d]] }
  0x80   : > { %v650_v57 = vmul.f32 %v648_v44, %v4585_v53  ;;  %s3897_s29 = sld [smem:[#allocation5 + $0xd]] }
  0x81   : > { %s3898_s19 = sld [smem:[#allocation5 + $0x3e]] }
  0x82   : > { %s3901_s9 = sld [smem:[#allocation5 + $0xf]] }
  0x83   : > { %380 = vrot.lane.b32.xlu2 %v366_v48, %s4346_s15  ;;  %378 = vrot.lane.b32.xlu1 %v365_v49, %s4346_s15 }
  0x84   : > { %376 = vrot.lane.b32.xlu0 %v364_v50, %s4346_s15  ;;  %v745_v50 = vstv %s3887_s22  ;;  %s3902_s22 = sld [smem:[#allocation5 + $0x40]] }
  0x8b   : > { %386 = vrot.lane.b32.xlu2 %v369_v54, %s4346_s15  ;;  %384 = vrot.lane.b32.xlu1 %v368_v55, %s4346_s15  ;;  %v651_v55 = vmul.f32 %v648_v44, %v4581_v51 }
  0x8c   : > { %382 = vrot.lane.b32.xlu0 %v367_v56, %s4346_s15  ;;  %v649_v56 = vmul.f32 %v648_v44, %v4571_v46 }
  0x93   : > { %422 = vrot.lane.b32.xlu2 %v408_v58, %s4347_s4  ;;  %420 = vrot.lane.b32.xlu1 %v407_v59, %s4347_s4  ;;  %v748_v58 = vmul.f32 %v745_v50, %v4543_v31  ;;  %v750_v59 = vmul.f32 %v745_v50, %v4541_v29 }
  0x94   : > { %418 = vrot.lane.b32.xlu0 %v406_v60, %s4347_s4  ;;  %v747_v60 = vmul.f32 %v745_v50, %v4557_v38 }
  0x95   : > { %v764_v0 = vrot.slane %v750_v59, 1 }
  0x9b   : > { %428 = vrot.lane.b32.xlu2 %v411_v61, %s4347_s4  ;;  %426 = vrot.lane.b32.xlu1 %v410_v62, %s4347_s4  ;;  %v749_v61 = vmul.f32 %v745_v50, %v4561_v40  ;;  %v746_v62 = vmul.f32 %v745_v50, %v4545_v32 }
  0x9c   : > { %424 = vrot.lane.b32.xlu0 %v409_v63, %s4347_s4  ;;  %v759_v63 = vrot.slane %v748_v58, 1 }
  0x9e   : > { %v765_v7 = vsel %vm685_vm1, %v759_v63, %v764_v0 }
  0xa3   : > { %463 = vrot.lane.b32.xlu2 %v449_v1, %s4347_s4  ;;  %461 = vrot.lane.b32.xlu1 %v448_v2, %s4347_s4  ;;  %v761_v1 = vrot.slane %v747_v60, 1  ;;  %v762_v2 = vrot.slane %v749_v61, 1 }
  0xa4   : > { %459 = vrot.lane.b32.xlu0 %v447_v3, %s4347_s4 }
  0xab   : > { %469 = vrot.lane.b32.xlu2 %v452_v4, %s4347_s4  ;;  %467 = vrot.lane.b32.xlu1 %v451_v5, %s4347_s4  ;;  %v758_v5 = vrot.slane %v746_v62, 1 }
  0xac   : > { %465 = vrot.lane.b32.xlu0 %v450_v6, %s4347_s4 }
  0xb3   : > { %499 = vrot.lane.b32.xlu2 %v491_v8, %s4348_s21  ;;  %497 = vrot.lane.b32.xlu1 %v490_v9, %s4348_s21  ;;  %v763_v8 = vsel %vm685_vm1, %v761_v1, %v762_v2  ;;  %v760_v9 = vsel %vm685_vm1, %v758_v5, %v759_v63 }
  0xb4   : > { %495 = vrot.lane.b32.xlu0 %v489_v10, %s4348_s21  ;;  %v751_v10 = vmul.f32 %v745_v50, %v4559_v39 }
  0xbb   : > { %521 = vrot.lane.b32.xlu2 %v513_v12, %s4348_s21  ;;  %519 = vrot.lane.b32.xlu1 %v512_v13, %s4348_s21  ;;  %v766_v13 = vrot.slane %v751_v10, 1 }
  0xbc   : > { %517 = vrot.lane.b32.xlu0 %v511_v14, %s4348_s21  ;;  %v795_v14 = vstv %s3888_s26  ;;  %s3903_s26 = sld [smem:[#allocation5 + $0x10]] }
  0xbd   : > { %v799_v19 = vmul.f32 %v795_v14, %v4585_v53 }
  0xc3   : > { %545 = vrot.lane.b32.xlu2 %v537_v16, %s4349_s20  ;;  %543 = vrot.lane.b32.xlu1 %v536_v17, %s4349_s20  ;;  %v798_v16 = vmul.f32 %v795_v14, %v4569_v45  ;;  %v800_v17 = vmul.f32 %v795_v14, %v4583_v52 }
  0xc4   : > { %541 = vrot.lane.b32.xlu0 %v535_v18, %s4349_s20  ;;  %v797_v18 = vmul.f32 %v795_v14, %v4571_v46 }
  0xc5   : > { %v814_v23 = vrot.slane %v800_v17, 1 }
  0xcb   : > { %567 = vrot.lane.b32.xlu2 %v559_v20, %s4349_s20  ;;  %565 = vrot.lane.b32.xlu1 %v558_v21, %s4349_s20  ;;  %v767_v20 = vsel %vm685_vm1, %v762_v2, %v766_v13  ;;  %v796_v21 = vmul.f32 %v795_v14, %v4573_v47 }
  0xcc   : > { %563 = vrot.lane.b32.xlu0 %v557_v22, %s4349_s20  ;;  %v809_v22 = vrot.slane %v798_v16, 1 }
  0xcd   : > { %v4641_v24 = vpop.permute.xlu2 %343 }
  0xd3   : > { %591 = vrot.lane.b32.xlu2 %v583_v25, %s4350_s0  ;;  %589 = vrot.lane.b32.xlu1 %v582_v26, %s4350_s0  ;;  %v811_v25 = vrot.slane %v797_v18, 1  ;;  %v812_v26 = vrot.slane %v799_v19, 1 }
  0xd4   : > { %587 = vrot.lane.b32.xlu0 %v581_v27, %s4350_s0 }
  0xd5   : > { %v4649_v30 = vpop.permute.xlu2 %345  ;;  %v813_v36 = vsel %vm685_vm1, %v811_v25, %v812_v26 }
  0xdb   : > { %613 = vrot.lane.b32.xlu2 %v605_v33, %s4350_s0  ;;  %611 = vrot.lane.b32.xlu1 %v604_v34, %s4350_s0  ;;  %v808_v33 = vrot.slane %v796_v21, 1 }
  0xdc   : > { %609 = vrot.lane.b32.xlu0 %v603_v35, %s4350_s0  ;;  %v815_v35 = vsel %vm685_vm1, %v809_v22, %v814_v23 }
  0xdd   : > { %v4657_v37 = vpop.permute.xlu2 %380 }
  0xe3   : > { %637 = vrot.lane.b32.xlu2 %v629_v41, %s4351_s23  ;;  %635 = vrot.lane.b32.xlu1 %v628_v42, %s4351_s23  ;;  %v810_v41 = vsel %vm685_vm1, %v808_v33, %v809_v22  ;;  %v801_v42 = vmul.f32 %v795_v14, %v4581_v51 }
  0xe4   : > { %633 = vrot.lane.b32.xlu0 %v627_v43, %s4351_s23 }
  0xe5   : > { %v4665_v48 = vpop.permute.xlu1 %339  ;;  %v4667_v49 = vpop.permute.xlu2 %386  ;;  %v816_v50 = vrot.slane %v801_v42, 1 }
  0xe6   : > { %v4669_v54 = vpop.permute.xlu0 %335 }
  0xe7   : > { %v817_v61 = vsel %vm685_vm1, %v812_v26, %v816_v50 }
  0xeb   : > { %659 = vrot.lane.b32.xlu2 %v651_v55, %s4351_s23  ;;  %657 = vrot.lane.b32.xlu1 %v650_v57, %s4351_s23  ;;  %v847_v55 = vstv %s3889_s27  ;;  %s3904_s27 = sld [smem:[#allocation5 + $0x41]] }
  0xec   : > { %655 = vrot.lane.b32.xlu0 %v649_v56, %s4351_s23  ;;  %v850_v57 = vmul.f32 %v847_v55, %v4543_v31  ;;  %v852_v58 = vmul.f32 %v847_v55, %v4541_v29  ;;  %v849_v59 = vmul.f32 %v847_v55, %v4557_v38  ;;  %v851_v60 = vmul.f32 %v847_v55, %v4561_v40 }
  0xed   : > { %v4682_v3 = vpop.permute.xlu2 %422  ;;  %v4684_v4 = vpop.permute.xlu1 %341  ;;  %v848_v62 = vmul.f32 %v847_v55, %v4545_v32  ;;  %v853_v16 = vmul.f32 %v847_v55, %v4559_v39 }
  0xee   : > { %v4686_v6 = vpop.permute.xlu0 %337  ;;  %v861_v63 = vrot.slane %v850_v57, 1  ;;  %v863_v1 = vrot.slane %v849_v59, 1  ;;  %v864_v2 = vrot.slane %v851_v60, 1 }
  0xef   : > { %v868_v19 = vrot.slane %v853_v16, 1 }
  0xf1   : > { %v869_v33 = vsel %vm685_vm1, %v864_v2, %v868_v19 }
  0xf3   : > { %772 = vrot.lane.b32.xlu2 %v765_v7, %s4346_s15  ;;  %770 = vrot.lane.b32.xlu1 %v763_v8, %s4346_s15  ;;  %v860_v8 = vrot.slane %v848_v62, 1 }
  0xf4   : > { %768 = vrot.lane.b32.xlu0 %v760_v9, %s4346_s15 }
  0xf5   : > { %v4695_v11 = vpop.permute.xlu2 %428  ;;  %v4697_v12 = vpop.permute.xlu1 %378  ;;  %v862_v14 = vsel %vm685_vm1, %v860_v8, %v861_v63  ;;  %v949_v8 = vstv %s3891_s5  ;;  %s3906_s5 = sld [smem:[#allocation5 + $0x42]] }
  0xf6   : > { %v4699_v15 = vpop.permute.xlu0 %376 }
  0xfb   : > { %778 = vrot.lane.b32.xlu2 %v766_v13, %s4346_s15  ;;  %776 = vrot.lane.b32.xlu1 %v764_v0, %s4346_s15  ;;  %v866_v0 = vrot.slane %v852_v58, 1  ;;  %v865_v13 = vsel %vm685_vm1, %v863_v1, %v864_v2 }
  0xfc   : > { %774 = vrot.lane.b32.xlu0 %v767_v20, %s4346_s15  ;;  %v897_v20 = vstv %s3890_s28  ;;  %s3905_s28 = sld [smem:[#allocation5 + $0x11]] }
  0xfd   : > { %v4710_v27 = vpop.permute.xlu2 %463  ;;  %v4712_v28 = vpop.permute.xlu1 %384  ;;  %v867_v10 = vsel %vm685_vm1, %v861_v63, %v866_v0  ;;  %v900_v22 = vmul.f32 %v897_v20, %v4569_v45  ;;  %v899_v25 = vmul.f32 %v897_v20, %v4571_v46  ;;  %v901_v26 = vmul.f32 %v897_v20, %v4585_v53 }
  0xfe   : > { %v4714_v34 = vpop.permute.xlu0 %382  ;;  %v903_v63 = vmul.f32 %v897_v20, %v4581_v51 }
  0xff   : > { %v913_v42 = vrot.slane %v899_v25, 1 }
 0x100   : > { %v918_v2 = vrot.slane %v903_v63, 1 }
 0x103   : > { %822 = vrot.lane.b32.xlu2 %v815_v35, %s4346_s15  ;;  %820 = vrot.lane.b32.xlu1 %v813_v36, %s4346_s15  ;;  %v898_v35 = vmul.f32 %v897_v20, %v4573_v47  ;;  %v911_v36 = vrot.slane %v900_v22, 1 }
 0x104   : > { %818 = vrot.lane.b32.xlu0 %v810_v41, %s4346_s15 }
 0x105   : > { %v4723_v43 = vpop.permute.xlu2 %469  ;;  %v4725_v44 = vpop.permute.xlu1 %420  ;;  %v910_v58 = vrot.slane %v898_v35, 1 }
 0x106   : > { %v4727_v56 = vpop.permute.xlu0 %418 }
 0x107   : > { %v912_v62 = vsel %vm685_vm1, %v910_v58, %v911_v36 }
 0x10b   : > { %828 = vrot.lane.b32.xlu2 %v816_v50, %s4346_s15  ;;  %826 = vrot.lane.b32.xlu1 %v814_v23, %s4346_s15  ;;  %v902_v23 = vmul.f32 %v897_v20, %v4583_v52  ;;  %v914_v50 = vrot.slane %v901_v26, 1 }
 0x10c   : > { %824 = vrot.lane.b32.xlu0 %v817_v61, %s4346_s15 }
 0x10d   : > { %v4738_v5 = vpop.permute.xlu2 %499  ;;  %v4740_v7 = vpop.permute.xlu1 %426  ;;  %v916_v41 = vrot.slane %v902_v23, 1  ;;  %v915_v61 = vsel %vm685_vm1, %v913_v42, %v914_v50  ;;  %v919_v16 = vsel %vm685_vm1, %v914_v50, %v918_v2 }
 0x10e   : > { %v4742_v9 = vpop.permute.xlu0 %424 }
 0x10f   : > { %v917_v60 = vsel %vm685_vm1, %v911_v36, %v916_v41 }
 0x113   : > { %874 = vrot.lane.b32.xlu2 %v867_v10, %s4347_s4  ;;  %872 = vrot.lane.b32.xlu1 %v865_v13, %s4347_s4  ;;  %v952_v13 = vmul.f32 %v949_v8, %v4559_v39 }
 0x114   : > { %870 = vrot.lane.b32.xlu0 %v862_v14, %s4347_s4  ;;  %v951_v14 = vmul.f32 %v949_v8, %v4561_v40 }
 0x115   : > { %v4751_v17 = vpop.permute.xlu2 %521  ;;  %v4753_v18 = vpop.permute.xlu1 %461  ;;  %v959_v20 = vrot.slane %v952_v13, 1 }
 0x116   : > { %v4755_v21 = vpop.permute.xlu0 %459  ;;  %v957_v22 = vrot.slane %v951_v14, 1 }
 0x118   : > { %v960_v36 = vsel %vm685_vm1, %v957_v22, %v959_v20 }
 0x11b   : > { %880 = vrot.lane.b32.xlu2 %v868_v19, %s4347_s4  ;;  %878 = vrot.lane.b32.xlu1 %v866_v0, %s4347_s4  ;;  %v950_v19 = vmul.f32 %v949_v8, %v4557_v38  ;;  %v1005_v8 = vstv %s3893_s12  ;;  %s3908_s12 = sld [smem:[#allocation5 + $0x43]] }
 0x11c   : > { %876 = vrot.lane.b32.xlu0 %v869_v33, %s4347_s4  ;;  %v976_v33 = vstv %s3892_s7  ;;  %s3907_s7 = sld [smem:[#allocation5 + $0x12]] }
 0x11d   : > { %v4766_v55 = vpop.permute.xlu2 %545  ;;  %v4768_v57 = vpop.permute.xlu1 %467  ;;  %v956_v26 = vrot.slane %v950_v19, 1  ;;  %v979_v42 = vmul.f32 %v976_v33, %v4581_v51  ;;  %v978_v50 = vmul.f32 %v976_v33, %v4585_v53  ;;  %v977_v58 = vmul.f32 %v976_v33, %v4571_v46 }
 0x11e   : > { %v4770_v59 = vpop.permute.xlu0 %465  ;;  %v1007_v19 = vmul.f32 %v1005_v8, %v4561_v40 }
 0x120   : > { %v1013_v33 = vrot.slane %v1007_v19, 1 }
 0x123   : > { %924 = vrot.lane.b32.xlu2 %v917_v60, %s4347_s4  ;;  %922 = vrot.lane.b32.xlu1 %v915_v61, %s4347_s4  ;;  %v986_v60 = vrot.slane %v979_v42, 1  ;;  %v984_v61 = vrot.slane %v978_v50, 1 }
 0x124   : > { %920 = vrot.lane.b32.xlu0 %v912_v62, %s4347_s4 }
 0x125   : > { %v4779_v0 = vpop.permute.xlu2 %567  ;;  %v4781_v1 = vpop.permute.xlu1 %497  ;;  %v987_v14 = vsel %vm685_vm1, %v984_v61, %v986_v60 }
 0x126   : > { %v4783_v10 = vpop.permute.xlu0 %495 }
 0x12b   : > { %930 = vrot.lane.b32.xlu2 %v918_v2, %s4347_s4  ;;  %928 = vrot.lane.b32.xlu1 %v916_v41, %s4347_s4  ;;  %v958_v41 = vsel %vm685_vm1, %v956_v26, %v957_v22  ;;  %v983_v2 = vrot.slane %v977_v58, 1  ;;  %v1006_v22 = vmul.f32 %v1005_v8, %v4557_v38 }
 0x12c   : > { %926 = vrot.lane.b32.xlu0 %v919_v16, %s4347_s4  ;;  %v1008_v16 = vmul.f32 %v1005_v8, %v4559_v39 }
 0x12d   : > { %v4792_v23 = vpop.permute.xlu2 %591  ;;  %v4794_v25 = vpop.permute.xlu1 %519  ;;  %v1012_v50 = vrot.slane %v1006_v22, 1 }
 0x12e   : > { %v4796_v35 = vpop.permute.xlu0 %517  ;;  %v1015_v26 = vrot.slane %v1008_v16, 1 }
 0x12f   : > { %v1014_v8 = vsel %vm685_vm1, %v1012_v50, %v1013_v33 }
 0x133   : > { %965 = vrot.lane.b32.xlu2 %v959_v20, %s4348_s21  ;;  %963 = vrot.lane.b32.xlu1 %v960_v36, %s4348_s21  ;;  %v985_v20 = vsel %vm685_vm1, %v983_v2, %v984_v61  ;;  %v1016_v61 = vsel %vm685_vm1, %v1013_v33, %v1015_v26 }
 0x134   : > { %961 = vrot.lane.b32.xlu0 %v958_v41, %s4348_s21  ;;  %v1032_v41 = vstv %s3894_s3  ;;  %s3909_s3 = sld [smem:[#allocation5 + $0x13]] }
 0x135   : > { %v4806_v62 = vpop.permute.xlu2 %613  ;;  %v4808_v63 = vpop.permute.xlu1 %543  ;;  %v1035_v2 = vmul.f32 %v1032_v41, %v4581_v51 }
 0x136   : > { %7144 = vst [vmem:[#allocation20_spill] sm:$0xff] %v4806_v62  ;;  %v4810_v13 = vpop.permute.xlu0 %541 }
 0x137   : > { %7145 = vst [vmem:[#allocation21_spill] sm:$0xff] %v4808_v63  ;;  %v1042_v16 = vrot.slane %v1035_v2, 1 }
 0x138   : > { %7146 = vst [vmem:[#allocation22_spill] sm:$0xff] %v4810_v13 }
 0x13b   : > { %992 = vrot.lane.b32.xlu2 %v986_v60, %s4348_s21  ;;  %990 = vrot.lane.b32.xlu1 %v987_v14, %s4348_s21  ;;  %v1034_v60 = vmul.f32 %v1032_v41, %v4585_v53  ;;  %v1033_v14 = vmul.f32 %v1032_v41, %v4571_v46 }
 0x13c   : > { %988 = vrot.lane.b32.xlu0 %v985_v20, %s4348_s21 }
 0x13d   : > { %v4820_v36 = vpop.permute.xlu2 %637  ;;  %v4822_v42 = vpop.permute.xlu1 %565  ;;  %v1040_v19 = vrot.slane %v1034_v60, 1 }
 0x13e   : > { %7147 = vst [vmem:[#allocation23_spill] sm:$0xff] %v4820_v36  ;;  %v4824_v58 = vpop.permute.xlu0 %563 }
 0x13f   : > { %7148 = vst [vmem:[#allocation24_spill] sm:$0xff] %v4822_v42  ;;  %v1039_v42 = vrot.slane %v1033_v14, 1  ;;  %v1043_v33 = vsel %vm685_vm1, %v1040_v19, %v1042_v16 }
 0x140   : > { %7149 = vst [vmem:[#allocation25_spill] sm:$0xff] %v4824_v58  ;;  %v1061_v58 = vstv %s3895_s6  ;;  %s3910_s6 = sld [smem:[#allocation5 + $0x44]] }
 0x141   : > { %v1064_v50 = vmul.f32 %v1061_v58, %v4559_v39  ;;  %v1041_v41 = vsel %vm685_vm1, %v1039_v42, %v1040_v19 }
 0x143   : > { %1021 = vrot.lane.b32.xlu2 %v1015_v26, %s4349_s20  ;;  %1019 = vrot.lane.b32.xlu1 %v1016_v61, %s4349_s20  ;;  %v1063_v26 = vmul.f32 %v1061_v58, %v4561_v40  ;;  %v1062_v61 = vmul.f32 %v1061_v58, %v4557_v38  ;;  %v1071_v2 = vrot.slane %v1064_v50, 1 }
 0x144   : > { %1017 = vrot.lane.b32.xlu0 %v1014_v8, %s4349_s20 }
 0x145   : > { %v4834_v20 = vpop.permute.xlu2 %659  ;;  %v4836_v22 = vpop.permute.xlu1 %589  ;;  %v1069_v60 = vrot.slane %v1063_v26, 1 }
 0x146   : > { %7150 = vst [vmem:[#allocation26_spill] sm:$0xff] %v4834_v20  ;;  %v4838_v36 = vpop.permute.xlu0 %587 }
 0x147   : > { %7151 = vst [vmem:[#allocation27_spill] sm:$0xff] %v4836_v22  ;;  %v1068_v22 = vrot.slane %v1062_v61, 1  ;;  %v1072_v42 = vsel %vm685_vm1, %v1069_v60, %v1071_v2 }
 0x148   : > { %7152 = vst [vmem:[#allocation28_spill] sm:$0xff] %v4838_v36  ;;  %v1088_v36 = vstv %s3896_s25  ;;  %s3911_s25 = sld [smem:[#allocation5 + $0x14]] }
 0x149   : > { %v1091_v58 = vmul.f32 %v1088_v36, %v4581_v51  ;;  %v1070_v19 = vsel %vm685_vm1, %v1068_v22, %v1069_v60 }
 0x14b   : > { %1048 = vrot.lane.b32.xlu2 %v1042_v16, %s4349_s20  ;;  %1046 = vrot.lane.b32.xlu1 %v1043_v33, %s4349_s20  ;;  %v1090_v16 = vmul.f32 %v1088_v36, %v4585_v53  ;;  %v1089_v33 = vmul.f32 %v1088_v36, %v4571_v46  ;;  %v1098_v50 = vrot.slane %v1091_v58, 1 }
 0x14c   : > { %1044 = vrot.lane.b32.xlu0 %v1041_v41, %s4349_s20 }
 0x14d   : > { %v4848_v8 = vpop.permute.xlu2 %772  ;;  %v4850_v14 = vpop.permute.xlu1 %611  ;;  %v1096_v26 = vrot.slane %v1090_v16, 1 }
 0x14e   : > { %7153 = vst [vmem:[#allocation29_spill] sm:$0xff] %v4848_v8  ;;  %v4852_v20 = vpop.permute.xlu0 %609  ;;  %v1095_v8 = vrot.slane %v1089_v33, 1 }
 0x14f   : > { %7154 = vst [vmem:[#allocation30_spill] sm:$0xff] %v4850_v14  ;;  %v1117_v14 = vstv %s3897_s29  ;;  %v1099_v22 = vsel %vm685_vm1, %v1096_v26, %v1098_v50  ;;  %s3912_s29 = sld [smem:[#allocation5 + $0x45]] }
 0x150   : > { %7155 = vst [vmem:[#allocation31_spill] sm:$0xff] %v4852_v20  ;;  %v1120_v36 = vmul.f32 %v1117_v14, %v4559_v39  ;;  %v1097_v60 = vsel %vm685_vm1, %v1095_v8, %v1096_v26 }
 0x152   : > { %v1127_v58 = vrot.slane %v1120_v36, 1 }
 0x153   : > { %1077 = vrot.lane.b32.xlu2 %v1071_v2, %s4350_s0  ;;  %1075 = vrot.lane.b32.xlu1 %v1072_v42, %s4350_s0  ;;  %v1119_v2 = vmul.f32 %v1117_v14, %v4561_v40  ;;  %v1118_v42 = vmul.f32 %v1117_v14, %v4557_v38 }
 0x154   : > { %1073 = vrot.lane.b32.xlu0 %v1070_v19, %s4350_s0  ;;  %v1144_v19 = vstv %s3898_s19  ;;  %s3915_s19 = sld [smem:[#allocation5 + $0x16]] }
 0x155   : > { %v4862_v41 = vpop.permute.xlu2 %778  ;;  %v4864_v61 = vpop.permute.xlu1 %635  ;;  %v1125_v16 = vrot.slane %v1119_v2, 1  ;;  %v1147_v8 = vmul.f32 %v1144_v19, %v4581_v51  ;;  %v1146_v14 = vmul.f32 %v1144_v19, %v4585_v53 }
 0x156   : > { %7156 = vst [vmem:[#allocation32_spill] sm:$0xff] %v4862_v41  ;;  %v4866_v20 = vpop.permute.xlu0 %633 }
 0x157   : > { %7157 = vst [vmem:[#allocation33_spill] sm:$0xff] %v4864_v61  ;;  %v1124_v61 = vrot.slane %v1118_v42, 1  ;;  %v1154_v36 = vrot.slane %v1147_v8, 1  ;;  %v1152_v2 = vrot.slane %v1146_v14, 1 }
 0x158   : > { %7158 = vst [vmem:[#allocation34_spill] sm:$0xff] %v4866_v20 }
 0x159   : > { %v1126_v26 = vsel %vm685_vm1, %v1124_v61, %v1125_v16  ;;  %v1155_v61 = vsel %vm685_vm1, %v1152_v2, %v1154_v36 }
 0x15b   : > { %1104 = vrot.lane.b32.xlu2 %v1098_v50, %s4350_s0  ;;  %1102 = vrot.lane.b32.xlu1 %v1099_v22, %s4350_s0  ;;  %v1128_v50 = vsel %vm685_vm1, %v1125_v16, %v1127_v58  ;;  %v1145_v22 = vmul.f32 %v1144_v19, %v4571_v46 }
 0x15c   : > { %1100 = vrot.lane.b32.xlu0 %v1097_v60, %s4350_s0 }
 0x15d   : > { %v4876_v33 = vpop.permute.xlu2 %822  ;;  %v4878_v41 = vpop.permute.xlu1 %657 }
 0x15e   : > { %7159 = vst [vmem:[#allocation35_spill] sm:$0xff] %v4876_v33  ;;  %v4880_v20 = vpop.permute.xlu0 %655  ;;  %v1151_v33 = vrot.slane %v1145_v22, 1 }
 0x15f   : > { %7160 = vst [vmem:[#allocation36_spill] sm:$0xff] %v4878_v41  ;;  %v1246_v41 = vstv %s3901_s9  ;;  %s3916_s9 = sld [smem:[#allocation5 + $0x47]] }
 0x160   : > { %7161 = vst [vmem:[#allocation37_spill] sm:$0xff] %v4880_v20  ;;  %v1249_v16 = vmul.f32 %v1246_v41, %v4543_v31  ;;  %v1248_v19 = vmul.f32 %v1246_v41, %v4557_v38  ;;  %v1250_v8 = vmul.f32 %v1246_v41, %v4561_v40  ;;  %v1153_v14 = vsel %vm685_vm1, %v1151_v33, %v1152_v2 }
 0x163   : > { %1133 = vrot.lane.b32.xlu2 %v1127_v58, %s4351_s23  ;;  %1131 = vrot.lane.b32.xlu1 %v1128_v50, %s4351_s23  ;;  %v1251_v58 = vmul.f32 %v1246_v41, %v4541_v29  ;;  %v1247_v50 = vmul.f32 %v1246_v41, %v4545_v32 }
 0x164   : > { %1129 = vrot.lane.b32.xlu0 %v1126_v26, %s4351_s23  ;;  %v1260_v26 = vrot.slane %v1249_v16, 2  ;;  %v1252_v16 = vmul.f32 %v1246_v41, %v4559_v39 }
 0x165   : > { %v4890_v60 = vpop.permute.xlu2 %828  ;;  %v4892_v42 = vpop.permute.xlu1 %770  ;;  %v1265_v22 = vrot.slane %v1251_v58, 2  ;;  %v1259_v13 = vrot.slane %v1247_v50, 2 }
 0x166   : > { %7162 = vst [vmem:[#allocation38_spill] sm:$0xff] %v4890_v60  ;;  %v4894_v20 = vpop.permute.xlu0 %768 }
 0x167   : > { %7163 = vst [vmem:[#allocation39_spill] sm:$0xff] %v4892_v42  ;;  %v1263_v42 = vrot.slane %v1250_v8, 2  ;;  %v1266_v2 = vsel %vm1186_vm2, %v1260_v26, %v1265_v22  ;;  %v1267_v8 = vrot.slane %v1252_v16, 2 }
 0x168   : > { %7164 = vst [vmem:[#allocation40_spill] sm:$0xff] %v4894_v20  ;;  %v1262_v20 = vrot.slane %v1248_v19, 2 }
 0x16b   : > { %1160 = vrot.lane.b32.xlu2 %v1154_v36, %s4351_s23  ;;  %1158 = vrot.lane.b32.xlu1 %v1155_v61, %s4351_s23  ;;  %v1264_v36 = vsel %vm1186_vm2, %v1262_v20, %v1263_v42  ;;  %v1261_v61 = vsel %vm1186_vm2, %v1259_v13, %v1260_v26 }
 0x16c   : > { %1156 = vrot.lane.b32.xlu0 %v1153_v14, %s4351_s23  ;;  %v1296_v14 = vstv %s3902_s22  ;;  %s3917_s22 = sld [smem:[#allocation5 + $0x17]] }
 0x16d   : > { %v4906_v60 = vpop.permute.xlu2 %874  ;;  %v4908_v63 = vpop.permute.xlu1 %776  ;;  %v1299_v20 = vmul.f32 %v1296_v14, %v4569_v45  ;;  %v1301_v13 = vmul.f32 %v1296_v14, %v4583_v52  ;;  %v1298_v41 = vmul.f32 %v1296_v14, %v4571_v46  ;;  %v1300_v26 = vmul.f32 %v1296_v14, %v4585_v53 }
 0x16e   : > { %7165 = vst [vmem:[#allocation41_spill] sm:$0xff] %v4906_v60  ;;  %v4910_v33 = vpop.permute.xlu0 %774 }
 0x16f   : > { %7166 = vst [vmem:[#allocation42_spill] sm:$0xff] %v4908_v63  ;;  %v1315_v16 = vrot.slane %v1301_v13, 2  ;;  %v1312_v60 = vrot.slane %v1298_v41, 2 }
 0x170   : > { %7167 = vst [vmem:[#allocation43_spill] sm:$0xff] %v4910_v33 }
 0x173   : > { %1273 = vrot.lane.b32.xlu2 %v1266_v2, %s4346_s15  ;;  %1271 = vrot.lane.b32.xlu1 %v1264_v36, %s4346_s15  ;;  %v1268_v2 = vsel %vm1186_vm2, %v1263_v42, %v1267_v8  ;;  %v1297_v36 = vmul.f32 %v1296_v14, %v4573_v47 }
 0x174   : > { %1269 = vrot.lane.b32.xlu0 %v1261_v61, %s4346_s15  ;;  %v1310_v61 = vrot.slane %v1299_v20, 2 }
 0x175   : > { %v4919_v58 = vpop.permute.xlu2 %880  ;;  %v4921_v19 = vpop.permute.xlu1 %820 }
 0x176   : > { %7168 = vst [vmem:[#allocation44_spill] sm:$0xff] %v4919_v58  ;;  %v4923_v50 = vpop.permute.xlu0 %818  ;;  %v1309_v58 = vrot.slane %v1297_v36, 2  ;;  %v1316_v42 = vsel %vm1186_vm2, %v1310_v61, %v1315_v16 }
 0x177   : > { %7169 = vst [vmem:[#allocation45_spill] sm:$0xff] %v4921_v19 }
 0x178   : > { %7170 = vst [vmem:[#allocation46_spill] sm:$0xff] %v4923_v50  ;;  %v1313_v50 = vrot.slane %v1300_v26, 2  ;;  %v1348_v26 = vstv %s3903_s26  ;;  %s3918_s26 = sld [smem:[#allocation5 + $0x48]] }
 0x17b   : > { %1279 = vrot.lane.b32.xlu2 %v1267_v8, %s4346_s15  ;;  %1277 = vrot.lane.b32.xlu1 %v1265_v22, %s4346_s15  ;;  %v1314_v8 = vsel %vm1186_vm2, %v1312_v60, %v1313_v50  ;;  %v1311_v22 = vsel %vm1186_vm2, %v1309_v58, %v1310_v61  ;;  %v1351_v60 = vmul.f32 %v1348_v26, %v4543_v31 }
 0x17c   : > { %1275 = vrot.lane.b32.xlu0 %v1268_v2, %s4346_s15  ;;  %v1302_v2 = vmul.f32 %v1296_v14, %v4581_v51  ;;  %v1353_v58 = vmul.f32 %v1348_v26, %v4541_v29  ;;  %v1350_v14 = vmul.f32 %v1348_v26, %v4557_v38  ;;  %v1352_v61 = vmul.f32 %v1348_v26, %v4561_v40 }
 0x17d   : > { %v4934_v19 = vpop.permute.xlu2 %924  ;;  %v4936_v33 = vpop.permute.xlu1 %826 }
 0x17e   : > { %7171 = vst [vmem:[#allocation47_spill] sm:$0xff] %v4934_v19  ;;  %v4938_v63 = vpop.permute.xlu0 %824  ;;  %v1317_v41 = vrot.slane %v1302_v2, 2  ;;  %v1367_v2 = vrot.slane %v1353_v58, 2  ;;  %v1364_v19 = vrot.slane %v1350_v14, 2  ;;  %v1365_v31 = vrot.slane %v1352_v61, 2 }
 0x17f   : > { %7172 = vst [vmem:[#allocation48_spill] sm:$0xff] %v4936_v33  ;;  %v1398_v61 = vstv %s3904_s27  ;;  %s3919_s27 = sld [smem:[#allocation5 + $0x18]] }
 0x180   : > { %7173 = vst [vmem:[#allocation49_spill] sm:$0xff] %v4938_v63 }
 0x183   : > { %1323 = vrot.lane.b32.xlu2 %v1316_v42, %s4346_s15  ;;  %1321 = vrot.lane.b32.xlu1 %v1314_v8, %s4346_s15  ;;  %v1318_v42 = vsel %vm1186_vm2, %v1313_v50, %v1317_v41  ;;  %v1349_v8 = vmul.f32 %v1348_v26, %v4545_v32  ;;  %v1366_v50 = vsel %vm1186_vm2, %v1364_v19, %v1365_v31 }
 0x184   : > { %1319 = vrot.lane.b32.xlu0 %v1311_v22, %s4346_s15  ;;  %v1362_v22 = vrot.slane %v1351_v60, 2  ;;  %v1401_v19 = vmul.f32 %v1398_v61, %v4569_v45 }
 0x185   : > { %v4947_v20 = vpop.permute.xlu2 %930  ;;  %v4949_v13 = vpop.permute.xlu1 %872 }
 0x186   : > { %7174 = vst [vmem:[#allocation50_spill] sm:$0xff] %v4947_v20  ;;  %v4951_v36 = vpop.permute.xlu0 %870  ;;  %v1368_v32 = vsel %vm1186_vm2, %v1362_v22, %v1367_v2  ;;  %v350_v20 = vsel %vm347_vm4, %v4641_v24, %v4649_v30 }
 0x187   : > { %7175 = vst [vmem:[#allocation51_spill] sm:$0xff] %v4949_v13  ;;  %v1361_v13 = vrot.slane %v1349_v8, 2  ;;  %v1402_v8 = vmul.f32 %v1398_v61, %v4585_v53 }
 0x188   : > { %7176 = vst [vmem:[#allocation52_spill] sm:$0xff] %v4951_v36 }
 0x189   : > { %v1415_v45 = vrot.slane %v1402_v8, 2  ;;  %v1450_v8 = vstv %s3905_s28  ;;  %s3920_s28 = sld [smem:[#allocation5 + $0x49]] }
 0x18b   : > { %1329 = vrot.lane.b32.xlu2 %v1317_v41, %s4346_s15  ;;  %1327 = vrot.lane.b32.xlu1 %v1315_v16, %s4346_s15  ;;  %v1363_v16 = vsel %vm1186_vm2, %v1361_v13, %v1362_v22  ;;  %v1354_v41 = vmul.f32 %v1348_v26, %v4559_v39  ;;  %v1403_v13 = vmul.f32 %v1398_v61, %v4583_v52 }
 0x18c   : > { %1325 = vrot.lane.b32.xlu0 %v1318_v42, %s4346_s15  ;;  %v1400_v26 = vmul.f32 %v1398_v61, %v4571_v46 }
 0x18d   : > { %v4962_v36 = vpop.permute.xlu2 %965  ;;  %v4964_v29 = vpop.permute.xlu1 %878  ;;  %v1369_v14 = vrot.slane %v1354_v41, 2 }
 0x18e   : > { %7177 = vst [vmem:[#allocation53_spill] sm:$0xff] %v4962_v36  ;;  %v4966_v63 = vpop.permute.xlu0 %876  ;;  %v1414_v41 = vrot.slane %v1400_v26, 2 }
 0x18f   : > { %7178 = vst [vmem:[#allocation54_spill] sm:$0xff] %v4964_v29  ;;  %v1370_v22 = vsel %vm1186_vm2, %v1365_v31, %v1369_v14 }
 0x190   : > { %7179 = vst [vmem:[#allocation55_spill] sm:$0xff] %v4966_v63  ;;  %v1416_v31 = vsel %vm1186_vm2, %v1414_v41, %v1415_v45 }
 0x193   : > { %1375 = vrot.lane.b32.xlu2 %v1368_v32, %s4347_s4  ;;  %1373 = vrot.lane.b32.xlu1 %v1366_v50, %s4347_s4  ;;  %v1399_v32 = vmul.f32 %v1398_v61, %v4573_v47  ;;  %v1412_v50 = vrot.slane %v1401_v19, 2 }
 0x194   : > { %1371 = vrot.lane.b32.xlu0 %v1363_v16, %s4347_s4  ;;  %v1417_v16 = vrot.slane %v1403_v13, 2 }
 0x195   : > { %v4975_v60 = vpop.permute.xlu2 %992  ;;  %v4977_v58 = vpop.permute.xlu1 %922 }
 0x196   : > { %7180 = vst [vmem:[#allocation56_spill] sm:$0xff] %v4975_v60  ;;  %v4979_v42 = vpop.permute.xlu0 %920  ;;  %v1418_v47 = vsel %vm1186_vm2, %v1412_v50, %v1417_v16 }
 0x197   : > { %7181 = vst [vmem:[#allocation57_spill] sm:$0xff] %v4977_v58  ;;  %v1411_v58 = vrot.slane %v1399_v32, 2  ;;  %v1453_v32 = vmul.f32 %v1450_v8, %v4559_v39  ;;  %v1477_v39 = vstv %s3906_s5  ;;  %s292_s5 = sld [smem:[#allocation5]] }
 0x198   : > { %7182 = vst [vmem:[#allocation58_spill] sm:$0xff] %v4979_v42 }
 0x199   : > { %v1460_v41 = vrot.slane %v1453_v32, 2 }
 0x19b   : > { %1381 = vrot.lane.b32.xlu2 %v1369_v14, %s4347_s4  ;;  %1379 = vrot.lane.b32.xlu1 %v1367_v2, %s4347_s4  ;;  %v1413_v2 = vsel %vm1186_vm2, %v1411_v58, %v1412_v50  ;;  %v1404_v14 = vmul.f32 %v1398_v61, %v4581_v51  ;;  %v1452_v58 = vmul.f32 %v1450_v8, %v4561_v40 }
 0x19c   : > { %1377 = vrot.lane.b32.xlu0 %v1370_v22, %s4347_s4  ;;  %v1451_v50 = vmul.f32 %v1450_v8, %v4557_v38  ;;  %v1480_v38 = vmul.f32 %v1477_v39, %v4581_v51  ;;  %v1478_v8 = vmul.f32 %v1477_v39, %v4571_v46  ;;  %v1506_v51 = vstv %s3907_s7  ;;  %v5037_v46 = vld [vmem:[#allocation4 + $0x38] sm:$0xff]  ;;  %s3921_s7 = sld [smem:[#allocation5 + $0x19]] }
 0x19d   : > { %v4990_v42 = vpop.permute.xlu2 %1021  ;;  %v4992_v52 = vpop.permute.xlu1 %928  ;;  %v1419_v26 = vrot.slane %v1404_v14, 2 }
 0x19e   : > { %7183 = vst [vmem:[#allocation59_spill] sm:$0xff] %v4990_v42  ;;  %v4994_v60 = vpop.permute.xlu0 %926  ;;  %v1457_v14 = vrot.slane %v1451_v50, 2  ;;  %v1487_v32 = vrot.slane %v1480_v38, 2  ;;  %v5044_v38 = vld [vmem:[#allocation4 + $0x8] sm:$0xff] }
 0x19f   : > { %7184 = vst [vmem:[#allocation60_spill] sm:$0xff] %v4992_v52  ;;  %v1420_v61 = vsel %vm1186_vm2, %v1415_v45, %v1419_v26 }
 0x1a0   : > { %7185 = vst [vmem:[#allocation61_spill] sm:$0xff] %v4994_v60 }
 0x1a1   : > { %7195 = vst [vmem:[#allocation71_spill] sm:$0xff] %v5044_v38 }
 0x1a3   : > { %1425 = vrot.lane.b32.xlu2 %v1418_v47, %s4347_s4  ;;  %1423 = vrot.lane.b32.xlu1 %v1416_v31, %s4347_s4  ;;  %v1458_v47 = vrot.slane %v1452_v58, 2 }
 0x1a4   : > { %1421 = vrot.lane.b32.xlu0 %v1413_v2, %s4347_s4 }
 0x1a5   : > { %v5003_v19 = vpop.permute.xlu2 %1048  ;;  %v5005_v13 = vpop.permute.xlu1 %963  ;;  %v1461_v45 = vsel %vm1186_vm2, %v1458_v47, %v1460_v41 }
 0x1a6   : > { %7186 = vst [vmem:[#allocation62_spill] sm:$0xff] %v5003_v19  ;;  %v5007_v22 = vpop.permute.xlu0 %961 }
 0x1a7   : > { %7187 = vst [vmem:[#allocation63_spill] sm:$0xff] %v5005_v13  ;;  %v1562_v13 = vstv %s3909_s3  ;;  %s3922_s3 = sld [smem:[#allocation5 + $0x4a]] }
 0x1a8   : > { %7188 = vst [vmem:[#allocation64_spill] sm:$0xff] %v5007_v22 }
 0x1ab   : > { %1431 = vrot.lane.b32.xlu2 %v1419_v26, %s4347_s4  ;;  %1429 = vrot.lane.b32.xlu1 %v1417_v16, %s4347_s4  ;;  %v1479_v26 = vmul.f32 %v1477_v39, %v4585_v53  ;;  %v1459_v16 = vsel %vm1186_vm2, %v1457_v14, %v1458_v47  ;;  %v5040_v14 = vld [vmem:[#allocation4 + $0x20] sm:$0xff] }
 0x1ac   : > { %1427 = vrot.lane.b32.xlu0 %v1420_v61, %s4347_s4  ;;  %v1508_v39 = vmul.f32 %v5040_v14, %v1506_v51 }
 0x1ad   : > { %v5016_v31 = vpop.permute.xlu2 %1077  ;;  %v5018_v2 = vpop.permute.xlu1 %990  ;;  %v1485_v58 = vrot.slane %v1479_v26, 2  ;;  %v1507_v26 = vmul.f32 %v5044_v38, %v1506_v51  ;;  %v1974_v52 = vstv %s3922_s3  ;;  %s5855_s3 = sld [smem:[#allocation5 + $0x1f]] }
 0x1ae   : > { %7189 = vst [vmem:[#allocation65_spill] sm:$0xff] %v5016_v31  ;;  %v5020_v40 = vpop.permute.xlu0 %988 }
 0x1af   : > { %7190 = vst [vmem:[#allocation66_spill] sm:$0xff] %v5018_v2  ;;  %v1488_v47 = vsel %vm1186_vm2, %v1485_v58, %v1487_v32  ;;  %v1533_v2 = vstv %s3908_s12  ;;  %s3872_s12 = sld [smem:[#allocation5 + $0x31]] }
 0x1b0   : > { %7191 = vst [vmem:[#allocation67_spill] sm:$0xff] %v5020_v40  ;;  %v1484_v40 = vrot.slane %v1478_v8, 2  ;;  %v1514_v8 = vrot.slane %v1508_v39, 2 }
 0x1b3   : > { %1466 = vrot.lane.b32.xlu2 %v1460_v41, %s4348_s21  ;;  %1464 = vrot.lane.b32.xlu1 %v1461_v45, %s4348_s21  ;;  %v1509_v41 = vmul.f32 %v5037_v46, %v1506_v51  ;;  %v1486_v45 = vsel %vm1186_vm2, %v1484_v40, %v1485_v58  ;;  %v5057_v51 = vld [vmem:[#allocation4 + $0x98] sm:$0xff] }
 0x1b4   : > { %1462 = vrot.lane.b32.xlu0 %v1459_v16, %s4348_s21 }
 0x1b5   : > { %v5030_v61 = vpop.permute.xlu2 %1104  ;;  %v5032_v50 = vpop.permute.xlu1 %1019  ;;  %v1516_v16 = vrot.slane %v1509_v41, 2 }
 0x1b6   : > { %7192 = vst [vmem:[#allocation68_spill] sm:$0xff] %v5030_v61  ;;  %v5034_v53 = vpop.permute.xlu0 %1017  ;;  %v1513_v61 = vrot.slane %v1507_v26, 2 }
 0x1b7   : > { %7193 = vst [vmem:[#allocation69_spill] sm:$0xff] %v5032_v50  ;;  %v1517_v58 = vsel %vm1186_vm2, %v1514_v8, %v1516_v16 }
 0x1b8   : > { %7194 = vst [vmem:[#allocation70_spill] sm:$0xff] %v5034_v53  ;;  %v1515_v39 = vsel %vm1186_vm2, %v1513_v61, %v1514_v8 }
 0x1bb   : > { %1493 = vrot.lane.b32.xlu2 %v1487_v32, %s4348_s21  ;;  %1491 = vrot.lane.b32.xlu1 %v1488_v47, %s4348_s21  ;;  %v1536_v32 = vmul.f32 %v5057_v51, %v1533_v2  ;;  %v5060_v47 = vld [vmem:[#allocation4 + $0x80] sm:$0xff] }
 0x1bc   : > { %1489 = vrot.lane.b32.xlu0 %v1486_v45, %s4348_s21  ;;  %v1535_v41 = vmul.f32 %v5060_v47, %v1533_v2  ;;  %v5064_v45 = vld [vmem:[#allocation4 + $0x68] sm:$0xff] }
 0x1bd   : > { %v5050_v53 = vpop.permute.xlu2 %1133  ;;  %v5052_v50 = vpop.permute.xlu1 %1046  ;;  %7199 = vst [vmem:[#allocation75_spill] sm:$0xff] %v5064_v45  ;;  %v1534_v26 = vmul.f32 %v5064_v45, %v1533_v2  ;;  %v1565_v2 = vmul.f32 %v5037_v46, %v1562_v13 }
 0x1be   : > { %7196 = vst [vmem:[#allocation72_spill] sm:$0xff] %v5050_v53  ;;  %v5054_v40 = vpop.permute.xlu0 %1044 }
 0x1bf   : > { %7197 = vst [vmem:[#allocation73_spill] sm:$0xff] %v5052_v50  ;;  %v1541_v50 = vrot.slane %v1535_v41, 2  ;;  %v1540_v22 = vrot.slane %v1534_v26, 2  ;;  %v1572_v41 = vrot.slane %v1565_v2, 2 }
 0x1c0   : > { %7198 = vst [vmem:[#allocation74_spill] sm:$0xff] %v5054_v40  ;;  %v1543_v40 = vrot.slane %v1536_v32, 2  ;;  %v1563_v32 = vmul.f32 %v5044_v38, %v1562_v13 }
 0x1c2   : > { %v1544_v8 = vsel %vm1186_vm2, %v1541_v50, %v1543_v40 }
 0x1c3   : > { %1522 = vrot.lane.b32.xlu2 %v1516_v16, %s4349_s20  ;;  %1520 = vrot.lane.b32.xlu1 %v1517_v58, %s4349_s20  ;;  %v1564_v16 = vmul.f32 %v5040_v14, %v1562_v13  ;;  %v1542_v58 = vsel %vm1186_vm2, %v1540_v22, %v1541_v50 }
 0x1c4   : > { %1518 = vrot.lane.b32.xlu0 %v1515_v39, %s4349_s20 }
 0x1c5   : > { %v5070_v53 = vpop.permute.xlu2 %1160  ;;  %v5072_v31 = vpop.permute.xlu1 %1075  ;;  %v1570_v39 = vrot.slane %v1564_v16, 2 }
 0x1c6   : > { %7200 = vst [vmem:[#allocation76_spill] sm:$0xff] %v5070_v53  ;;  %v5074_v61 = vpop.permute.xlu0 %1073  ;;  %v1589_v53 = vstv %s3910_s6  ;;  %s5275_s6 = sld [smem:[#allocation5 + $0x1a]] }
 0x1c7   : > { %7201 = vst [vmem:[#allocation77_spill] sm:$0xff] %v5072_v31  ;;  %v1569_v31 = vrot.slane %v1563_v32, 2  ;;  %v1573_v22 = vsel %vm1186_vm2, %v1570_v39, %v1572_v41  ;;  %v1592_v13 = vmul.f32 %v5057_v51, %v1589_v53  ;;  %v1591_v50 = vmul.f32 %v5060_v47, %v1589_v53 }
 0x1c8   : > { %7202 = vst [vmem:[#allocation78_spill] sm:$0xff] %v5074_v61 }
 0x1c9   : > { %v1599_v2 = vrot.slane %v1592_v13, 2  ;;  %v1597_v16 = vrot.slane %v1591_v50, 2 }
 0x1cb   : > { %1549 = vrot.lane.b32.xlu2 %v1543_v40, %s4349_s20  ;;  %1547 = vrot.lane.b32.xlu1 %v1544_v8, %s4349_s20  ;;  %v1571_v40 = vsel %vm1186_vm2, %v1569_v31, %v1570_v39  ;;  %v1590_v8 = vmul.f32 %v5064_v45, %v1589_v53  ;;  %v1600_v31 = vsel %vm1186_vm2, %v1597_v16, %v1599_v2 }
 0x1cc   : > { %1545 = vrot.lane.b32.xlu0 %v1542_v58, %s4349_s20 }
 0x1cd   : > { %v5084_v26 = vpop.permute.xlu2 %1273  ;;  %v5086_v61 = vpop.permute.xlu1 %1102 }
 0x1ce   : > { %7203 = vst [vmem:[#allocation79_spill] sm:$0xff] %v5084_v26  ;;  %v5088_v19 = vpop.permute.xlu0 %1100  ;;  %v1596_v26 = vrot.slane %v1590_v8, 2 }
 0x1cf   : > { %7204 = vst [vmem:[#allocation80_spill] sm:$0xff] %v5086_v61  ;;  %v1618_v61 = vstv %s3911_s25  ;;  %s5315_s25 = sld [smem:[#allocation5 + $0x4b]] }
 0x1d0   : > { %7205 = vst [vmem:[#allocation81_spill] sm:$0xff] %v5088_v19  ;;  %v1621_v53 = vmul.f32 %v5037_v46, %v1618_v61  ;;  %v1598_v39 = vsel %vm1186_vm2, %v1596_v26, %v1597_v16 }
 0x1d2   : > { %v1628_v13 = vrot.slane %v1621_v53, 2 }
 0x1d3   : > { %1578 = vrot.lane.b32.xlu2 %v1572_v41, %s4350_s0  ;;  %1576 = vrot.lane.b32.xlu1 %v1573_v22, %s4350_s0  ;;  %v1620_v41 = vmul.f32 %v5040_v14, %v1618_v61  ;;  %v1619_v22 = vmul.f32 %v5044_v38, %v1618_v61 }
 0x1d4   : > { %1574 = vrot.lane.b32.xlu0 %v1571_v40, %s4350_s0 }
 0x1d5   : > { %v5098_v58 = vpop.permute.xlu2 %1279  ;;  %v5100_v32 = vpop.permute.xlu1 %1131  ;;  %v1626_v50 = vrot.slane %v1620_v41, 2 }
 0x1d6   : > { %7206 = vst [vmem:[#allocation82_spill] sm:$0xff] %v5098_v58  ;;  %v5102_v19 = vpop.permute.xlu0 %1129  ;;  %v1625_v58 = vrot.slane %v1619_v22, 2 }
 0x1d7   : > { %7207 = vst [vmem:[#allocation83_spill] sm:$0xff] %v5100_v32  ;;  %v1645_v32 = vstv %s3912_s29  ;;  %v1629_v26 = vsel %vm1186_vm2, %v1626_v50, %v1628_v13  ;;  %s5326_s29 = sld [smem:[#allocation5 + $0x7]] }
 0x1d8   : > { %7208 = vst [vmem:[#allocation84_spill] sm:$0xff] %v5102_v19  ;;  %v1648_v61 = vmul.f32 %v5057_v51, %v1645_v32  ;;  %v1627_v16 = vsel %vm1186_vm2, %v1625_v58, %v1626_v50  ;;  %v5133_v50 = vld [vmem:[#allocation4 + $0x18] sm:$0xff] }
 0x1da   : > { %v1655_v53 = vrot.slane %v1648_v61, 2 }
 0x1db   : > { %1605 = vrot.lane.b32.xlu2 %v1599_v2, %s4350_s0  ;;  %1603 = vrot.lane.b32.xlu1 %v1600_v31, %s4350_s0  ;;  %v1647_v2 = vmul.f32 %v5060_v47, %v1645_v32  ;;  %v1646_v31 = vmul.f32 %v5064_v45, %v1645_v32 }
 0x1dc   : > { %1601 = vrot.lane.b32.xlu0 %v1598_v39, %s4350_s0 }
 0x1dd   : > { %v5112_v40 = vpop.permute.xlu2 %1323  ;;  %v5114_v8 = vpop.permute.xlu1 %1158  ;;  %v1653_v41 = vrot.slane %v1647_v2, 2 }
 0x1de   : > { %7209 = vst [vmem:[#allocation85_spill] sm:$0xff] %v5112_v40  ;;  %v5116_v19 = vpop.permute.xlu0 %1156  ;;  %v1652_v40 = vrot.slane %v1646_v31, 2 }
 0x1df   : > { %7210 = vst [vmem:[#allocation86_spill] sm:$0xff] %v5114_v8  ;;  %v1656_v58 = vsel %vm1186_vm2, %v1653_v41, %v1655_v53 }
 0x1e0   : > { %7211 = vst [vmem:[#allocation87_spill] sm:$0xff] %v5116_v19  ;;  %v1731_v19 = vstv %s3915_s19  ;;  %v1654_v61 = vsel %vm1186_vm2, %v1652_v40, %v1653_v41  ;;  %s5333_s19 = sld [smem:[#allocation5 + $0x38]] }
 0x1e1   : > { %v1732_v32 = vmul.f32 %v5133_v50, %v1731_v19  ;;  %v1733_v2 = vmul.f32 %v5040_v14, %v1731_v19 }
 0x1e3   : > { %1634 = vrot.lane.b32.xlu2 %v1628_v13, %s4351_s23  ;;  %1632 = vrot.lane.b32.xlu1 %v1629_v26, %s4351_s23  ;;  %v5136_v13 = vld [vmem:[#allocation4 + $0x30] sm:$0xff]  ;;  %v1741_v42 = vrot.slane %v1733_v2, 3 }
 0x1e4   : > { %1630 = vrot.lane.b32.xlu0 %v1627_v16, %s4351_s23  ;;  %v1734_v26 = vmul.f32 %v5136_v13, %v1731_v19  ;;  %v1740_v16 = vrot.slane %v1732_v32, 3 }
 0x1e5   : > { %v5126_v39 = vpop.permute.xlu2 %1329  ;;  %v5128_v22 = vpop.permute.xlu1 %1271 }
 0x1e6   : > { %7212 = vst [vmem:[#allocation88_spill] sm:$0xff] %v5126_v39  ;;  %v5130_v8 = vpop.permute.xlu0 %1269  ;;  %v1742_v31 = vrot.slane %v1734_v26, 3  ;;  %v1773_v26 = vstv %s3916_s9  ;;  %s5352_s9 = sld [smem:[#allocation5 + $0x1b]] }
 0x1e7   : > { %7213 = vst [vmem:[#allocation89_spill] sm:$0xff] %v5128_v22 }
 0x1e8   : > { %7214 = vst [vmem:[#allocation90_spill] sm:$0xff] %v5130_v8  ;;  %v1743_v40 = vsel %vm1683_vm3, %v1740_v16, %v1742_v31 }
 0x1eb   : > { %1661 = vrot.lane.b32.xlu2 %v1655_v53, %s4351_s23  ;;  %1659 = vrot.lane.b32.xlu1 %v1656_v58, %s4351_s23  ;;  %v1735_v53 = vmul.f32 %v5037_v46, %v1731_v19 }
 0x1ec   : > { %1657 = vrot.lane.b32.xlu0 %v1654_v61, %s4351_s23 }
 0x1ed   : > { %v5144_v8 = vpop.permute.xlu2 %1375  ;;  %v5146_v22 = vpop.permute.xlu1 %1277  ;;  %v1744_v32 = vrot.slane %v1735_v53, 3 }
 0x1ee   : > { %7215 = vst [vmem:[#allocation91_spill] sm:$0xff] %v5144_v8  ;;  %v5148_v39 = vpop.permute.xlu0 %1275  ;;  %v5161_v8 = vld [vmem:[#allocation4 + $0x78] sm:$0xff] }
 0x1ef   : > { %7216 = vst [vmem:[#allocation92_spill] sm:$0xff] %v5146_v22  ;;  %v1774_v2 = vmul.f32 %v5161_v8, %v1773_v26 }
 0x1f0   : > { %7217 = vst [vmem:[#allocation93_spill] sm:$0xff] %v5148_v39  ;;  %v5164_v39 = vld [vmem:[#allocation4 + $0x90] sm:$0xff] }
 0x1f1   : > { %v1776_v19 = vmul.f32 %v5164_v39, %v1773_v26  ;;  %v1782_v53 = vrot.slane %v1774_v2, 3 }
 0x1f3   : > { %1750 = vrot.lane.b32.xlu2 %v1743_v40, %s4346_s15  ;;  %1748 = vrot.lane.b32.xlu1 %v1741_v42, %s4346_s15  ;;  %v1745_v40 = vsel %vm1683_vm3, %v1741_v42, %v1744_v32 }
 0x1f4   : > { %1746 = vrot.lane.b32.xlu0 %v1740_v16, %s4346_s15  ;;  %v1775_v16 = vmul.f32 %v5060_v47, %v1773_v26 }
 0x1f5   : > { %v5155_v41 = vpop.permute.xlu2 %1381  ;;  %v5157_v58 = vpop.permute.xlu1 %1321 }
 0x1f6   : > { %7218 = vst [vmem:[#allocation94_spill] sm:$0xff] %v5155_v41  ;;  %v5159_v61 = vpop.permute.xlu0 %1319  ;;  %v1783_v60 = vrot.slane %v1775_v16, 3 }
 0x1f7   : > { %7219 = vst [vmem:[#allocation95_spill] sm:$0xff] %v5157_v58 }
 0x1f8   : > { %7220 = vst [vmem:[#allocation96_spill] sm:$0xff] %v5159_v61  ;;  %v1784_v61 = vrot.slane %v1776_v19, 3 }
 0x1fa   : > { %v1785_v42 = vsel %vm1683_vm3, %v1782_v53, %v1784_v61 }
 0x1fb   : > { %1756 = vrot.lane.b32.xlu2 %v1744_v32, %s4346_s15  ;;  %1754 = vrot.lane.b32.xlu1 %v1742_v31, %s4346_s15  ;;  %v1777_v32 = vmul.f32 %v5057_v51, %v1773_v26 }
 0x1fc   : > { %1752 = vrot.lane.b32.xlu0 %v1745_v40, %s4346_s15  ;;  %v1817_v40 = vstv %s3917_s22  ;;  %s5403_s22 = sld [smem:[#allocation5 + $0x4c]] }
 0x1fd   : > { %v5172_v58 = vpop.permute.xlu2 %1425  ;;  %v5174_v41 = vpop.permute.xlu1 %1327  ;;  %v1786_v19 = vrot.slane %v1777_v32, 3  ;;  %v1818_v16 = vmul.f32 %v5133_v50, %v1817_v40 }
 0x1fe   : > { %7221 = vst [vmem:[#allocation97_spill] sm:$0xff] %v5172_v58  ;;  %v5176_v22 = vpop.permute.xlu0 %1325 }
 0x1ff   : > { %7222 = vst [vmem:[#allocation98_spill] sm:$0xff] %v5174_v41  ;;  %v1787_v26 = vsel %vm1683_vm3, %v1783_v60, %v1786_v19 }
 0x200   : > { %7223 = vst [vmem:[#allocation99_spill] sm:$0xff] %v5176_v22  ;;  %v1820_v22 = vmul.f32 %v5136_v13, %v1817_v40 }
 0x203   : > { %1792 = vrot.lane.b32.xlu2 %v1785_v42, %s4346_s15  ;;  %1790 = vrot.lane.b32.xlu1 %v1783_v60, %s4346_s15  ;;  %v1826_v42 = vrot.slane %v1818_v16, 3 }
 0x204   : > { %1788 = vrot.lane.b32.xlu0 %v1782_v53, %s4346_s15  ;;  %v1819_v53 = vmul.f32 %v5040_v14, %v1817_v40 }
 0x205   : > { %v5183_v31 = vpop.permute.xlu2 %1431  ;;  %v5185_v2 = vpop.permute.xlu1 %1373 }
 0x206   : > { %7224 = vst [vmem:[#allocation100_spill] sm:$0xff] %v5183_v31  ;;  %v5187_v58 = vpop.permute.xlu0 %1371  ;;  %v1827_v41 = vrot.slane %v1819_v53, 3 }
 0x207   : > { %7225 = vst [vmem:[#allocation101_spill] sm:$0xff] %v5185_v2  ;;  %v1828_v2 = vrot.slane %v1820_v22, 3 }
 0x208   : > { %7226 = vst [vmem:[#allocation102_spill] sm:$0xff] %v5187_v58 }
 0x209   : > { %v1829_v60 = vsel %vm1683_vm3, %v1826_v42, %v1828_v2 }
 0x20b   : > { %1798 = vrot.lane.b32.xlu2 %v1786_v19, %s4346_s15  ;;  %1796 = vrot.lane.b32.xlu1 %v1784_v61, %s4346_s15  ;;  %v1821_v19 = vmul.f32 %v5037_v46, %v1817_v40 }
 0x20c   : > { %1794 = vrot.lane.b32.xlu0 %v1787_v26, %s4346_s15  ;;  %v1859_v26 = vstv %s3918_s26  ;;  %s5446_s26 = sld [smem:[#allocation5 + $0x1d]] }
 0x20d   : > { %v5196_v32 = vpop.permute.xlu2 %1466  ;;  %v5198_v31 = vpop.permute.xlu1 %1379  ;;  %v1830_v16 = vrot.slane %v1821_v19, 3  ;;  %v1860_v53 = vmul.f32 %v5161_v8, %v1859_v26 }
 0x20e   : > { %7227 = vst [vmem:[#allocation103_spill] sm:$0xff] %v5196_v32  ;;  %v5200_v58 = vpop.permute.xlu0 %1377 }
 0x20f   : > { %7228 = vst [vmem:[#allocation104_spill] sm:$0xff] %v5198_v31  ;;  %v1831_v40 = vsel %vm1683_vm3, %v1827_v41, %v1830_v16 }
 0x210   : > { %7229 = vst [vmem:[#allocation105_spill] sm:$0xff] %v5200_v58  ;;  %v1862_v58 = vmul.f32 %v5164_v39, %v1859_v26 }
 0x213   : > { %1836 = vrot.lane.b32.xlu2 %v1829_v60, %s4347_s4  ;;  %1834 = vrot.lane.b32.xlu1 %v1827_v41, %s4347_s4  ;;  %v1868_v60 = vrot.slane %v1860_v53, 3 }
 0x214   : > { %1832 = vrot.lane.b32.xlu0 %v1826_v42, %s4347_s4  ;;  %v1861_v42 = vmul.f32 %v5060_v47, %v1859_v26 }
 0x215   : > { %v5207_v61 = vpop.permute.xlu2 %1493  ;;  %v5209_v22 = vpop.permute.xlu1 %1423 }
 0x216   : > { %7230 = vst [vmem:[#allocation106_spill] sm:$0xff] %v5207_v61  ;;  %v5211_v32 = vpop.permute.xlu0 %1421  ;;  %v1869_v31 = vrot.slane %v1861_v42, 3 }
 0x217   : > { %7231 = vst [vmem:[#allocation107_spill] sm:$0xff] %v5209_v22  ;;  %v1870_v22 = vrot.slane %v1862_v58, 3 }
 0x218   : > { %7232 = vst [vmem:[#allocation108_spill] sm:$0xff] %v5211_v32 }
 0x219   : > { %v1871_v41 = vsel %vm1683_vm3, %v1868_v60, %v1870_v22 }
 0x21b   : > { %1842 = vrot.lane.b32.xlu2 %v1830_v16, %s4347_s4  ;;  %1840 = vrot.lane.b32.xlu1 %v1828_v2, %s4347_s4  ;;  %v1863_v16 = vmul.f32 %v5057_v51, %v1859_v26 }
 0x21c   : > { %1838 = vrot.lane.b32.xlu0 %v1831_v40, %s4347_s4  ;;  %v1903_v40 = vstv %s3919_s27  ;;  %s5553_s27 = sld [smem:[#allocation5 + $0x4e]] }
 0x21d   : > { %v5220_v19 = vpop.permute.xlu2 %1522  ;;  %v5222_v61 = vpop.permute.xlu1 %1429  ;;  %v1872_v53 = vrot.slane %v1863_v16, 3  ;;  %v1905_v42 = vmul.f32 %v5037_v46, %v1903_v40 }
 0x21e   : > { %7233 = vst [vmem:[#allocation109_spill] sm:$0xff] %v5220_v19  ;;  %v5224_v32 = vpop.permute.xlu0 %1427 }
 0x21f   : > { %7234 = vst [vmem:[#allocation110_spill] sm:$0xff] %v5222_v61  ;;  %v1873_v26 = vsel %vm1683_vm3, %v1869_v31, %v1872_v53 }
 0x220   : > { %7235 = vst [vmem:[#allocation111_spill] sm:$0xff] %v5224_v32  ;;  %v1904_v32 = vmul.f32 %v5040_v14, %v1903_v40 }
 0x223   : > { %1878 = vrot.lane.b32.xlu2 %v1871_v41, %s4347_s4  ;;  %1876 = vrot.lane.b32.xlu1 %v1869_v31, %s4347_s4  ;;  %v1908_v41 = vrot.slane %v1904_v32, 3 }
 0x224   : > { %1874 = vrot.lane.b32.xlu0 %v1868_v60, %s4347_s4  ;;  %v1909_v60 = vrot.slane %v1905_v42, 3 }
 0x225   : > { %v5231_v2 = vpop.permute.xlu2 %1549  ;;  %v5233_v58 = vpop.permute.xlu1 %1464 }
 0x226   : > { %7236 = vst [vmem:[#allocation112_spill] sm:$0xff] %v5231_v2  ;;  %v5235_v19 = vpop.permute.xlu0 %1462  ;;  %v1910_v31 = vsel %vm1683_vm3, %v1908_v41, %v1909_v60 }
 0x227   : > { %7237 = vst [vmem:[#allocation113_spill] sm:$0xff] %v5233_v58 }
 0x228   : > { %7238 = vst [vmem:[#allocation114_spill] sm:$0xff] %v5235_v19  ;;  %v1926_v19 = vstv %s3920_s28  ;;  %s5599_s28 = sld [smem:[#allocation5 + $0xe]] }
 0x22b   : > { %1884 = vrot.lane.b32.xlu2 %v1872_v53, %s4347_s4  ;;  %1882 = vrot.lane.b32.xlu1 %v1870_v22, %s4347_s4  ;;  %v1928_v53 = vmul.f32 %v5057_v51, %v1926_v19  ;;  %v1927_v22 = vmul.f32 %v5060_v47, %v1926_v19 }
 0x22c   : > { %1880 = vrot.lane.b32.xlu0 %v1873_v26, %s4347_s4 }
 0x22d   : > { %v5243_v16 = vpop.permute.xlu2 %1578  ;;  %v5245_v58 = vpop.permute.xlu1 %1491  ;;  %v1932_v32 = vrot.slane %v1928_v53, 3  ;;  %v1931_v40 = vrot.slane %v1927_v22, 3 }
 0x22e   : > { %7239 = vst [vmem:[#allocation115_spill] sm:$0xff] %v5243_v16  ;;  %v5247_v2 = vpop.permute.xlu0 %1489  ;;  %v307_v16 = vstv %s3872_s12  ;;  %s5753_s12 = sld [smem:[#allocation5 + $0x4f]] }
 0x22f   : > { %7240 = vst [vmem:[#allocation116_spill] sm:$0xff] %v5245_v58  ;;  %v1951_v58 = vstv %s3921_s7  ;;  %v1933_v19 = vsel %vm1683_vm3, %v1931_v40, %v1932_v32  ;;  %v312_v53 = vmul.f32 %v5164_v39, %v307_v16  ;;  %v313_v22 = vmul.f32 %v5057_v51, %v307_v16  ;;  %s5648_s7 = sld [smem:[#allocation5 + $0x1e]] }
 0x230   : > { %7241 = vst [vmem:[#allocation117_spill] sm:$0xff] %v5247_v2  ;;  %v294_v2 = vstv %s292_s5  ;;  %v311_v24 = vmul.f32 %v5060_v47, %v307_v16  ;;  %s5609_s5 = sld [smem:[#allocation5 + $0x3f]] }
 0x231   : > { %v297_v33 = vmul.f32 %v5133_v50, %v294_v2 }
 0x233   : > { %1915 = vrot.lane.b32.xlu2 %v1909_v60, %s4348_s21  ;;  %1913 = vrot.lane.b32.xlu1 %v1910_v31, %s4348_s21  ;;  %v1953_v60 = vmul.f32 %v5037_v46, %v1951_v58  ;;  %v1952_v31 = vmul.f32 %v5040_v14, %v1951_v58 }
 0x234   : > { %1911 = vrot.lane.b32.xlu0 %v1908_v41, %s4348_s21  ;;  %v299_v41 = vmul.f32 %v5136_v13, %v294_v2 }
 0x235   : > { %v5255_v42 = vpop.permute.xlu2 %1605  ;;  %v5257_v26 = vpop.permute.xlu1 %1520 }
 0x236   : > { %7242 = vst [vmem:[#allocation118_spill] sm:$0xff] %v5255_v42  ;;  %v5259_v61 = vpop.permute.xlu0 %1518  ;;  %v1956_v42 = vrot.slane %v1952_v31, 3  ;;  %v318_v63 = vadd.f32 %v312_v53, %v299_v41  ;;  %v1975_v31 = vmul.f32 %v5060_v47, %v1974_v52  ;;  %v296_v53 = vmul.f32 %v5044_v38, %v294_v2 }
 0x237   : > { %7243 = vst [vmem:[#allocation119_spill] sm:$0xff] %v5257_v26  ;;  %v300_v26 = vmul.f32 %v5037_v46, %v294_v2 }
 0x238   : > { %7244 = vst [vmem:[#allocation120_spill] sm:$0xff] %v5259_v61  ;;  %v1957_v61 = vrot.slane %v1953_v60, 3  ;;  %v1976_v60 = vmul.f32 %v5057_v51, %v1974_v52  ;;  %v361_v41 = vadd.f32 %v350_v20, %v318_v63  ;;  %v5301_v52 = vld [vmem:[#allocation4] sm:$0xff] }
 0x23b   : > { %1938 = vrot.lane.b32.xlu2 %v1932_v32, %s4348_s21  ;;  %1936 = vrot.lane.b32.xlu1 %v1933_v19, %s4348_s21  ;;  %v319_v32 = vadd.f32 %v313_v22, %v300_v26  ;;  %v1958_v19 = vsel %vm1683_vm3, %v1956_v42, %v1957_v61  ;;  %v298_v26 = vmul.f32 %v5040_v14, %v294_v2 }
 0x23c   : > { %1934 = vrot.lane.b32.xlu0 %v1931_v40, %s4348_s21  ;;  %v390_v40 = vsel %vm347_vm4, %v4712_v28, %v4667_v49  ;;  %v433_v28 = vsel %vm430_vm5, %v4740_v7, %v4695_v11  ;;  %v473_v7 = vsel %vm430_vm5, %v4768_v57, %v4723_v43 }
 0x23d   : > { %v5271_v36 = vpop.permute.xlu2 %1634  ;;  %v5273_v58 = vpop.permute.xlu1 %1547  ;;  %v362_v22 = vadd.f32 %v4649_v30, %v319_v32  ;;  %v401_v20 = vadd.f32 %v390_v40, %v361_v41  ;;  %v1980_v30 = vrot.slane %v1976_v60, 3  ;;  %v1979_v32 = vrot.slane %v1975_v31, 3 }
 0x23e   : > { %7245 = vst [vmem:[#allocation121_spill] sm:$0xff] %v5271_v36  ;;  %v5280_v29 = vpop.permute.xlu0 %1545  ;;  %v295_v36 = vmul.f32 %v5301_v52, %v294_v2  ;;  %v310_v40 = vmul.f32 %v5161_v8, %v307_v16  ;;  %v317_v38 = vadd.f32 %v311_v24, %v298_v26  ;;  %v2022_v24 = vstv %s5315_s25  ;;  %s5907_s25 = sld [smem:[#allocation5 + $0x15]] }
 0x23f   : > { %7246 = vst [vmem:[#allocation122_spill] sm:$0xff] %v5273_v58  ;;  %v309_v58 = vmul.f32 %v5064_v45, %v307_v16  ;;  %v444_v41 = vadd.f32 %v433_v28, %v401_v20  ;;  %v1999_v45 = vstv %s5275_s6  ;;  %v402_v57 = vadd.f32 %v4667_v49, %v362_v22  ;;  %s5900_s6 = sld [smem:[#allocation5 + $0x50]] }
 0x240   : > { %7247 = vst [vmem:[#allocation123_spill] sm:$0xff] %v5280_v29  ;;  %v5296_v29 = vld [vmem:[#allocation4 + $0x60] sm:$0xff]  ;;  %v1981_v2 = vsel %vm1683_vm3, %v1979_v32, %v1980_v30  ;;  %v2000_v31 = vmul.f32 %v5040_v14, %v1999_v45  ;;  %v348_v28 = vsel %vm347_vm4, %v4669_v54, %v4686_v6  ;;  %v316_v20 = vadd.f32 %v310_v40, %v297_v33 }
 0x241   : > { %7248 = vst [vmem:[#allocation124_spill] sm:$0xff] %v5296_v29  ;;  %v308_v63 = vmul.f32 %v5296_v29, %v307_v16  ;;  %v315_v29 = vadd.f32 %v309_v58, %v296_v53  ;;  %v2001_v16 = vmul.f32 %v5037_v46, %v1999_v45  ;;  %v349_v49 = vsel %vm347_vm4, %v4665_v48, %v4684_v4 }
 0x242   : > { %v445_v45 = vadd.f32 %v4695_v11, %v402_v57  ;;  %v388_v54 = vsel %vm347_vm4, %v4699_v15, %v4697_v12  ;;  %v389_v48 = vsel %vm347_vm4, %v4657_v37, %v4714_v34  ;;  %v359_v11 = vadd.f32 %v349_v49, %v316_v20 }
 0x243   : > { %1963 = vrot.lane.b32.xlu2 %v1957_v61, %s4349_s20  ;;  %1961 = vrot.lane.b32.xlu1 %v1958_v19, %s4349_s20  ;;  %v314_v60 = vadd.f32 %v308_v63, %v295_v36  ;;  %v358_v58 = vadd.f32 %v4686_v6, %v315_v29  ;;  %v360_v36 = vadd.f32 %v4684_v4, %v317_v38  ;;  %v2005_v4 = vrot.slane %v2001_v16, 3 }
 0x244   : > { %1959 = vrot.lane.b32.xlu0 %v1956_v42, %s4349_s20  ;;  %v484_v42 = vadd.f32 %v473_v7, %v444_v41  ;;  %v2004_v29 = vrot.slane %v2000_v31, 3  ;;  %v485_v38 = vadd.f32 %v4723_v43, %v445_v45  ;;  %v431_v37 = vsel %vm430_vm5, %v4727_v56, %v4725_v44 }
 0x245   : > { %v5310_v61 = vpop.permute.xlu2 %1661  ;;  %v5312_v19 = vpop.permute.xlu1 %1576  ;;  %v357_v6 = vadd.f32 %v348_v28, %v314_v60  ;;  %v398_v22 = vadd.f32 %v4697_v12, %v358_v58  ;;  %v400_v63 = vadd.f32 %v4714_v34, %v360_v36  ;;  %v399_v43 = vadd.f32 %v389_v48, %v359_v11 }
 0x246   : > { %v5317_v62 = vpop.permute.xlu0 %1574  ;;  %v508_v33 = vadd.f32 %v4738_v5, %v484_v42  ;;  %v471_v12 = vsel %vm430_vm5, %v4755_v21, %v4753_v18  ;;  %v2006_v34 = vsel %vm1683_vm3, %v2004_v29, %v2005_v4  ;;  %v2024_v56 = vmul.f32 %v5057_v51, %v2022_v24 }
 0x247   : > { %v397_v26 = vadd.f32 %v388_v54, %v357_v6  ;;  %v2023_v41 = vmul.f32 %v5060_v47, %v2022_v24  ;;  %v441_v42 = vadd.f32 %v4725_v44, %v398_v22  ;;  %v672_v16 = vstv %s5326_s29  ;;  %s5915_s29 = sld [smem:[#allocation5 + $0x46]] }
 0x248   : > { %v530_v40 = vadd.f32 %v4751_v17, %v508_v33  ;;  %v5380_v21 = vstv %s5333_s19  ;;  %v5389_v58 = vmul.f32 %v5136_v13, %v672_v16  ;;  %v5392_v49 = vmul.f32 %v5037_v46, %v672_v16  ;;  %s5942_s19 = sld [smem:[#allocation5 + $0x20]] }
 0x249   : > { %v440_v57 = vadd.f32 %v431_v37, %v397_v26  ;;  %v2047_v54 = vstv %s5352_s9  ;;  %s6002_s9 = sld [smem:[#allocation5 + $0x51]] }
 0x24a   : > { %v554_v20 = vadd.f32 %v4766_v55, %v530_v40  ;;  %v2049_v26 = vmul.f32 %v5037_v46, %v2047_v54  ;;  %v2048_v22 = vmul.f32 %v5040_v14, %v2047_v54  ;;  %v694_v37 = vrot.slane %v5392_v49, 1  ;;  %v7255_v54 = vld [vmem:[#allocation124_spill] sm:$0xff] }
 0x24b   : > { %1986 = vrot.lane.b32.xlu2 %v1980_v30, %s4349_s20  ;;  %1984 = vrot.lane.b32.xlu1 %v1981_v2, %s4349_s20  ;;  %v509_v30 = vadd.f32 %v4738_v5, %v485_v38  ;;  %v443_v2 = vadd.f32 %v4742_v9, %v400_v63  ;;  %v480_v31 = vadd.f32 %v471_v12, %v440_v57 }
 0x24c   : > { %1982 = vrot.lane.b32.xlu0 %v1979_v32, %s4349_s20  ;;  %v432_v32 = vsel %vm430_vm5, %v4682_v3, %v4742_v9  ;;  %v472_v3 = vsel %vm430_vm5, %v4710_v27, %v4770_v59  ;;  %v2028_v27 = vrot.slane %v2024_v56, 3  ;;  %v2027_v9 = vrot.slane %v2023_v41, 3 }
 0x24d   : > { %v5347_v53 = vpop.permute.xlu2 %1750  ;;  %v5349_v15 = vpop.permute.xlu1 %1603  ;;  %v531_v5 = vadd.f32 %v4751_v17, %v509_v30  ;;  %v442_v60 = vadd.f32 %v432_v32, %v399_v43  ;;  %v483_v17 = vadd.f32 %v4770_v59, %v443_v2  ;;  %v481_v59 = vadd.f32 %v4753_v18, %v441_v42 }
 0x24e   : > { %7249 = vst [vmem:[#allocation125_spill] sm:$0xff] %v5347_v53  ;;  %v5359_v7 = vpop.permute.xlu0 %1601  ;;  %v5415_v38 = vmul.f32 %v5057_v51, %v5380_v21  ;;  %v2029_v18 = vsel %vm1683_vm3, %v2027_v9, %v2028_v27  ;;  %v675_v56 = vmul.f32 %v5133_v50, %v672_v16  ;;  %v2052_v42 = vrot.slane %v2048_v22, 3 }
 0x24f   : > { %v555_v28 = vadd.f32 %v4766_v55, %v531_v5  ;;  %v482_v44 = vadd.f32 %v472_v3, %v442_v60  ;;  %v5396_v55 = vmul.f32 %v5164_v39, %v5380_v21  ;;  %v507_v11 = vadd.f32 %v4781_v1, %v483_v17  ;;  %v7252_v3 = vld [vmem:[#allocation21_spill] sm:$0xff]  ;;  %v7254_v17 = vld [vmem:[#allocation71_spill] sm:$0xff] }
 0x250   : > { %v505_v24 = vadd.f32 %v4783_v10, %v481_v59  ;;  %v729_v12 = vrot.slane %v5415_v38, 1  ;;  %v5453_v59 = vmul.f32 %v7255_v54, %v5380_v21 }
 0x251   : > { %v577_v33 = vadd.f32 %v4779_v0, %v555_v28  ;;  %v506_v6 = vadd.f32 %v4781_v1, %v482_v44  ;;  %v7109_v1 = vrot.slane %v5396_v55, 1  ;;  %v529_v32 = vadd.f32 %v4794_v25, %v507_v11 }
 0x252   : > { %v527_v40 = vadd.f32 %v4796_v35, %v505_v24  ;;  %v687_v11 = vrot.slane %v675_v56, 1  ;;  %v7257_v24 = vld [vmem:[#allocation75_spill] sm:$0xff]  ;;  %v7260_v56 = vld [vmem:[#allocation26_spill] sm:$0xff] }
 0x253   : > { %2011 = vrot.lane.b32.xlu2 %v2005_v4, %s4350_s0  ;;  %2009 = vrot.lane.b32.xlu1 %v2006_v34, %s4350_s0  ;;  %v576_v4 = vadd.f32 %v4779_v0, %v554_v20  ;;  %v692_v0 = vrot.slane %v5389_v58, 1  ;;  %v601_v43 = vadd.f32 %v4792_v23, %v577_v33  ;;  %v673_v34 = vmul.f32 %v5301_v52, %v672_v16 }
 0x254   : > { %2007 = vrot.lane.b32.xlu0 %v2004_v29, %s4350_s0  ;;  %v504_v29 = vadd.f32 %v4783_v10, %v480_v31  ;;  %v528_v10 = vadd.f32 %v4794_v25, %v506_v6  ;;  %v2053_v25 = vrot.slane %v2049_v26, 3  ;;  %v553_v2 = vadd.f32 %v7252_v3, %v529_v32  ;;  %v7256_v6 = vld [vmem:[#allocation23_spill] sm:$0xff]  ;;  %v7259_v32 = vld [vmem:[#allocation24_spill] sm:$0xff] }
 0x255   : > { %v5398_v36 = vpop.permute.xlu2 %1756  ;;  %v5400_v45 = vpop.permute.xlu1 %1632  ;;  %v600_v63 = vadd.f32 %v4792_v23, %v576_v4  ;;  %v7250_v23 = vld [vmem:[#allocation20_spill] sm:$0xff]  ;;  %v2070_v20 = vstv %s5403_s22  ;;  %s6044_s22 = sld [smem:[#allocation5 + $0x21]] }
 0x256   : > { %v5408_v48 = vpop.permute.xlu0 %1630  ;;  %v526_v30 = vadd.f32 %v4796_v35, %v504_v29  ;;  %v623_v57 = vadd.f32 %v7250_v23, %v601_v43  ;;  %v7251_v35 = vld [vmem:[#allocation22_spill] sm:$0xff]  ;;  %v552_v60 = vadd.f32 %v7252_v3, %v528_v10  ;;  %v686_v29 = vrot.slane %v673_v34, 1  ;;  %v7258_v43 = vld [vmem:[#allocation25_spill] sm:$0xff] }
 0x257   : > { %v622_v41 = vadd.f32 %v7250_v23, %v600_v63  ;;  %v551_v44 = vadd.f32 %v7251_v35, %v527_v40  ;;  %v2054_v22 = vsel %vm1683_vm3, %v2052_v42, %v2053_v25  ;;  %v2071_v63 = vmul.f32 %v5060_v47, %v2070_v20 }
 0x258   : > { %v550_v5 = vadd.f32 %v7251_v35, %v526_v30  ;;  %v647_v26 = vadd.f32 %v7256_v6, %v623_v57  ;;  %v574_v40 = vadd.f32 %v7259_v32, %v552_v60  ;;  %v575_v34 = vadd.f32 %v7259_v32, %v553_v2  ;;  %v7261_v2 = vld [vmem:[#allocation28_spill] sm:$0xff]  ;;  %v7267_v32 = vld [vmem:[#allocation34_spill] sm:$0xff] }
 0x259   : > { %v646_v4 = vadd.f32 %v7256_v6, %v622_v41  ;;  %v573_v10 = vadd.f32 %v7258_v43, %v551_v44  ;;  %v5473_v57 = vmul.f32 %v5161_v8, %v5380_v21  ;;  %v721_v3 = vrot.slane %v5453_v59, 1  ;;  %v7262_v59 = vld [vmem:[#allocation27_spill] sm:$0xff] }
 0x25a   : > { %v572_v30 = vadd.f32 %v7258_v43, %v550_v5  ;;  %v5478_v5 = vmul.f32 %v5060_v47, %v5380_v21  ;;  %v5488_v44 = vsel %vm685_vm1, %v687_v11, %v692_v0  ;;  %v598_v6 = vadd.f32 %v7262_v59, %v574_v40  ;;  %v7266_v43 = vld [vmem:[#allocation30_spill] sm:$0xff] }
 0x25b   : > { %2034 = vrot.lane.b32.xlu2 %v2028_v27, %s4350_s0  ;;  %2032 = vrot.lane.b32.xlu1 %v2029_v18, %s4350_s0  ;;  %v674_v27 = vmul.f32 %v7254_v17, %v672_v16  ;;  %v5460_v18 = vmul.f32 %v7257_v24, %v5380_v21  ;;  %v668_v23 = vadd.f32 %v7260_v56, %v646_v4  ;;  %v2075_v21 = vrot.slane %v2071_v63, 3 }
 0x25c   : > { %2030 = vrot.lane.b32.xlu0 %v2027_v9, %s4350_s0  ;;  %v676_v9 = vmul.f32 %v5040_v14, %v672_v16  ;;  %v2072_v16 = vmul.f32 %v5057_v51, %v2070_v20  ;;  %v688_v51 = vsel %vm685_vm1, %v686_v29, %v687_v11  ;;  %v596_v20 = vadd.f32 %v7261_v2, %v572_v30  ;;  %v7264_v11 = vld [vmem:[#allocation31_spill] sm:$0xff] }
 0x25d   : > { %v5441_v31 = vpop.permute.xlu2 %1792  ;;  %v5443_v28 = vpop.permute.xlu1 %1659  ;;  %v689_v41 = vrot.slane %v674_v27, 1  ;;  %v724_v60 = vrot.slane %v5460_v18, 1  ;;  %v669_v27 = vadd.f32 %v7260_v56, %v647_v26  ;;  %v2168_v29 = vstv %s5446_s26  ;;  %s6103_s26 = sld [smem:[#allocation5 + $0x52]] }
 0x25e   : > { %7253 = vst [vmem:[#allocation20_spill] sm:$0xff] %v5441_v31  ;;  %v5455_v33 = vpop.permute.xlu0 %1657  ;;  %v690_v35 = vrot.slane %v676_v9, 1  ;;  %v2076_v17 = vrot.slane %v2072_v16, 3  ;;  %v597_v9 = vadd.f32 %v7261_v2, %v573_v10  ;;  %v706_v24 = vadd.f32 %v692_v0, %v668_v23  ;;  %v7268_v2 = vld [vmem:[#allocation33_spill] sm:$0xff]  ;;  %v7282_v31 = vld [vmem:[#allocation39_spill] sm:$0xff] }
 0x25f   : > { %v618_v18 = vadd.f32 %v7264_v11, %v596_v20  ;;  %v599_v26 = vadd.f32 %v7262_v59, %v575_v34  ;;  %v620_v30 = vadd.f32 %v7266_v43, %v598_v6  ;;  %v725_v10 = vrot.slane %v5478_v5, 1  ;;  %v7270_v6 = vld [vmem:[#allocation32_spill] sm:$0xff] }
 0x260   : > { %v619_v63 = vadd.f32 %v7264_v11, %v597_v9  ;;  %v2077_v58 = vsel %vm1683_vm3, %v2075_v21, %v2076_v17  ;;  %v2169_v0 = vmul.f32 %v5133_v50, %v2168_v29  ;;  %v5514_v56 = vmul.f32 %v5136_v13, %v2168_v29  ;;  %v7269_v9 = vld [vmem:[#allocation37_spill] sm:$0xff]  ;;  %v7271_v11 = vld [vmem:[#allocation42_spill] sm:$0xff] }
 0x261   : > { %v642_v40 = vadd.f32 %v7267_v32, %v618_v18  ;;  %v707_v23 = vadd.f32 %v694_v37, %v669_v27  ;;  %v621_v34 = vadd.f32 %v7266_v43, %v599_v26  ;;  %v741_v5 = vadd.f32 %v7109_v1, %v706_v24  ;;  %v7273_v24 = vld [vmem:[#allocation48_spill] sm:$0xff] }
 0x262   : > { %v644_v20 = vadd.f32 %v7268_v2, %v620_v30  ;;  %v782_v18 = vsel %vm347_vm4, %v7271_v11, %v7270_v6  ;;  %v5535_v49 = vmul.f32 %v5040_v14, %v2168_v29  ;;  %v2181_v43 = vrot.slane %v2169_v0, 4 }
 0x263   : > { %2059 = vrot.lane.b32.xlu2 %v2053_v25, %s4351_s23  ;;  %2057 = vrot.lane.b32.xlu1 %v2054_v22, %s4351_s23  ;;  %v722_v22 = vrot.slane %v5473_v57, 1  ;;  %v695_v57 = vsel %vm685_vm1, %v690_v35, %v694_v37  ;;  %v664_v59 = vadd.f32 %v7269_v9, %v642_v40  ;;  %v645_v27 = vadd.f32 %v7268_v2, %v621_v34  ;;  %v7276_v2 = vld [vmem:[#allocation44_spill] sm:$0xff] }
 0x264   : > { %2055 = vrot.lane.b32.xlu0 %v2052_v42, %s4351_s23  ;;  %v691_v42 = vsel %vm685_vm1, %v689_v41, %v690_v35  ;;  %v643_v41 = vadd.f32 %v7267_v32, %v619_v63  ;;  %v7272_v35 = vld [vmem:[#allocation38_spill] sm:$0xff]  ;;  %v2183_v30 = vrot.slane %v5514_v56, 4  ;;  %v7274_v32 = vld [vmem:[#allocation36_spill] sm:$0xff]  ;;  %v793_v34 = vadd.f32 %v782_v18, %v741_v5 }
 0x265   : > { %v5494_v25 = vpop.permute.xlu2 %1798  ;;  %v5496_v4 = vpop.permute.xlu1 %1748  ;;  %v723_v37 = vsel %vm685_vm1, %v721_v3, %v722_v22  ;;  %v832_v63 = vsel %vm347_vm4, %v7273_v24, %v7272_v35  ;;  %v666_v40 = vadd.f32 %v7274_v32, %v644_v20  ;;  %v5549_v3 = vld [vmem:[#allocation4 + $0x50] sm:$0xff]  ;;  %v726_v0 = vsel %vm685_vm1, %v724_v60, %v725_v10  ;;  %v7280_v24 = vld [vmem:[#allocation60_spill] sm:$0xff] }
 0x266   : > { %7263 = vst [vmem:[#allocation22_spill] sm:$0xff] %v5496_v4  ;;  %v5504_v16 = vpop.permute.xlu0 %1746  ;;  %v665_v26 = vadd.f32 %v7269_v9, %v643_v41  ;;  %v5551_v41 = vld [vmem:[#allocation4 + $0x48] sm:$0xff]  ;;  %v702_v56 = vadd.f32 %v688_v51, %v664_v59  ;;  %v7277_v20 = vld [vmem:[#allocation54_spill] sm:$0xff]  ;;  %v843_v18 = vadd.f32 %v832_v63, %v793_v34  ;;  %v2182_v1 = vrot.slane %v5535_v49, 4 }
 0x267   : > { %7265 = vst [vmem:[#allocation21_spill] sm:$0xff] %v5504_v16  ;;  %v884_v5 = vsel %vm430_vm5, %v7277_v20, %v7276_v2  ;;  %v2174_v51 = vmul.f32 %v2168_v29, %v5549_v3  ;;  %v2173_v60 = vmul.f32 %v2168_v29, %v5551_v41  ;;  %v704_v20 = vadd.f32 %v5488_v44, %v666_v40  ;;  %v7329_v16 = vld [vmem:[#allocation80_spill] sm:$0xff] }
 0x268   : > { %v703_v11 = vadd.f32 %v691_v42, %v665_v26  ;;  %v895_v26 = vadd.f32 %v884_v5, %v843_v18  ;;  %v737_v63 = vadd.f32 %v723_v37, %v702_v56  ;;  %v7281_v34 = vrot.slane %v5396_v55, 1  ;;  %v7285_v56 = vld [vmem:[#allocation43_spill] sm:$0xff]  ;;  %v7286_v5 = vld [vmem:[#allocation29_spill] sm:$0xff] }
 0x269   : > { %v730_v49 = vsel %vm685_vm1, %v725_v10, %v729_v12  ;;  %v2187_v38 = vrot.slane %v2173_v60, 4  ;;  %v2218_v40 = vstv %s5553_s27  ;;  %s6119_s27 = sld [smem:[#allocation5 + $0x1c]] }
 0x26a   : > { %v738_v44 = vadd.f32 %v726_v0, %v703_v11  ;;  %v781_v0 = vsel %vm347_vm4, %v7286_v5, %v7285_v56  ;;  %v7288_v11 = vld [vmem:[#allocation46_spill] sm:$0xff] }
 0x26b   : > { %2082 = vrot.lane.b32.xlu2 %v2076_v17, %s4351_s23  ;;  %2080 = vrot.lane.b32.xlu1 %v2077_v58, %s4351_s23  ;;  %v667_v17 = vadd.f32 %v7274_v32, %v645_v27  ;;  %v7279_v27 = vld [vmem:[#allocation50_spill] sm:$0xff] }
 0x26c   : > { %2078 = vrot.lane.b32.xlu0 %v2075_v21, %s4351_s23  ;;  %v742_v21 = vadd.f32 %v729_v12, %v707_v23  ;;  %v934_v32 = vsel %vm430_vm5, %v7280_v24, %v7279_v27  ;;  %v2172_v23 = vmul.f32 %v5037_v46, %v2168_v29  ;;  %v728_v24 = vsel %vm685_vm1, %v722_v22, %v7281_v34  ;;  %v7283_v29 = vld [vmem:[#allocation40_spill] sm:$0xff] }
 0x26d   : > { %v5545_v58 = vpop.permute.xlu2 %1836  ;;  %v5547_v14 = vpop.permute.xlu1 %1754  ;;  %v705_v42 = vadd.f32 %v695_v57, %v667_v17  ;;  %v2189_v22 = vrot.slane %v2174_v51, 4  ;;  %v739_v57 = vadd.f32 %v728_v24, %v704_v20  ;;  %v7291_v51 = vld [vmem:[#allocation35_spill] sm:$0xff]  ;;  %v5615_v34 = vmul.f32 %v5164_v39, %v2218_v40 }
 0x26e   : > { %7275 = vst [vmem:[#allocation71_spill] sm:$0xff] %v5545_v58  ;;  %v5561_v9 = vpop.permute.xlu0 %1752  ;;  %v2184_v58 = vsel %vm2108_vm6, %v2181_v43, %v2183_v30  ;;  %v794_v59 = vadd.f32 %v7270_v6, %v742_v21  ;;  %v780_v6 = vsel %vm347_vm4, %v7283_v29, %v7282_v31  ;;  %v945_v21 = vadd.f32 %v934_v32, %v895_v26 }
 0x26f   : > { %7278 = vst [vmem:[#allocation124_spill] sm:$0xff] %v5561_v9  ;;  %v2185_v55 = vrot.slane %v2172_v23, 4  ;;  %v740_v12 = vadd.f32 %v730_v49, %v705_v42  ;;  %v789_v17 = vadd.f32 %v780_v6, %v737_v63  ;;  %v7290_v23 = vld [vmem:[#allocation49_spill] sm:$0xff]  ;;  %v2188_v26 = vsel %vm2108_vm6, %v2183_v30, %v2187_v38  ;;  %v7293_v6 = vld [vmem:[#allocation51_spill] sm:$0xff] }
 0x270   : > { %v844_v46 = vadd.f32 %v7272_v35, %v794_v59  ;;  %v831_v60 = vsel %vm347_vm4, %v7291_v51, %v7290_v23  ;;  %v7292_v59 = vld [vmem:[#allocation53_spill] sm:$0xff]  ;;  %v2219_v63 = vmul.f32 %v5161_v8, %v2218_v40  ;;  %v791_v24 = vadd.f32 %v781_v0, %v739_v57  ;;  %v7295_v30 = vld [vmem:[#allocation55_spill] sm:$0xff]  ;;  %v5644_v51 = vld [vmem:[#allocation4 + $0xb0] sm:$0xff] }
 0x271   : > { %v974_v20 = vadd.f32 %v7292_v59, %v945_v21  ;;  %v2190_v42 = vsel %vm2108_vm6, %v2185_v55, %v2189_v22  ;;  %v2186_v29 = vsel %vm2108_vm6, %v2182_v1, %v2185_v55  ;;  %v7294_v21 = vld [vmem:[#allocation52_spill] sm:$0xff]  ;;  %v7296_v38 = vld [vmem:[#allocation41_spill] sm:$0xff] }
 0x272   : > { %v896_v10 = vadd.f32 %v7276_v2, %v844_v46  ;;  %v792_v2 = vadd.f32 %v7285_v56, %v740_v12  ;;  %v883_v12 = vsel %vm430_vm5, %v7296_v38, %v7295_v30  ;;  %v7297_v56 = vld [vmem:[#allocation56_spill] sm:$0xff]  ;;  %v2231_v0 = vrot.slane %v2219_v63, 4 }
 0x273   : > { %2195 = vrot.lane.b32.xlu2 %v2184_v58, %s4346_s15  ;;  %2193 = vrot.lane.b32.xlu1 %v2182_v1, %s4346_s15  ;;  %v790_v58 = vadd.f32 %v7282_v31, %v738_v44  ;;  %v882_v44 = vsel %vm430_vm5, %v7294_v21, %v7293_v6  ;;  %v1001_v57 = vadd.f32 %v7297_v56, %v974_v20  ;;  %v7302_v20 = vld [vmem:[#allocation58_spill] sm:$0xff] }
 0x274   : > { %2191 = vrot.lane.b32.xlu0 %v2181_v43, %s4346_s15  ;;  %v7287_v43 = vld [vmem:[#allocation45_spill] sm:$0xff]  ;;  %v946_v31 = vadd.f32 %v7279_v27, %v896_v10  ;;  %v842_v27 = vadd.f32 %v7290_v23, %v792_v2  ;;  %v841_v10 = vadd.f32 %v831_v60, %v791_v24  ;;  %v5631_v1 = vmul.f32 %v5060_v47, %v2218_v40 }
 0x275   : > { %v5587_v37 = vpop.permute.xlu2 %1842  ;;  %v5589_v35 = vpop.permute.xlu1 %1790  ;;  %v830_v18 = vsel %vm347_vm4, %v7288_v11, %v7287_v43  ;;  %v840_v46 = vadd.f32 %v7287_v43, %v790_v58  ;;  %v7299_v58 = vld [vmem:[#allocation47_spill] sm:$0xff]  ;;  %v2233_v43 = vrot.slane %v5615_v34, 4  ;;  %v5646_v60 = vld [vmem:[#allocation4 + $0xa8] sm:$0xff]  ;;  %v1173_v34 = vstv %s5599_s28  ;;  %s6140_s28 = sld [smem:[#allocation5 + $0x4d]] }
 0x276   : > { %7284 = vst [vmem:[#allocation23_spill] sm:$0xff] %v5589_v35  ;;  %v5601_v32 = vpop.permute.xlu0 %1788  ;;  %v839_v49 = vadd.f32 %v830_v18, %v789_v17  ;;  %v975_v22 = vadd.f32 %v7292_v59, %v946_v31  ;;  %v7298_v17 = vld [vmem:[#allocation61_spill] sm:$0xff]  ;;  %v893_v2 = vadd.f32 %v883_v12, %v841_v10  ;;  %v894_v31 = vadd.f32 %v7295_v30, %v842_v27 }
 0x277   : > { %7289 = vst [vmem:[#allocation75_spill] sm:$0xff] %v5601_v32  ;;  %v933_v5 = vsel %vm430_vm5, %v7299_v58, %v7298_v17  ;;  %v892_v18 = vadd.f32 %v7293_v6, %v840_v46  ;;  %v7301_v59 = vld [vmem:[#allocation57_spill] sm:$0xff]  ;;  %v2232_v6 = vrot.slane %v5631_v1, 4  ;;  %v2234_v21 = vsel %vm2108_vm6, %v2231_v0, %v2233_v43 }
 0x278   : > { %v1002_v55 = vadd.f32 %v7297_v56, %v975_v22  ;;  %v891_v11 = vadd.f32 %v882_v44, %v839_v49  ;;  %v943_v49 = vadd.f32 %v933_v5, %v893_v2  ;;  %v5664_v44 = vld [vmem:[#allocation4 + $0x98] sm:$0xff]  ;;  %v2224_v22 = vmul.f32 %v2218_v40, %v5644_v51 }
 0x279   : > { %v2222_v27 = vmul.f32 %v5664_v44, %v2218_v40  ;;  %v2223_v30 = vmul.f32 %v2218_v40, %v5646_v60  ;;  %v944_v12 = vadd.f32 %v7298_v17, %v894_v31  ;;  %v5671_v10 = vmul.f32 %v5136_v13, %v1173_v34  ;;  %v5673_v56 = vld [vmem:[#allocation4 + $0x38] sm:$0xff] }
 0x27a   : > { %v942_v1 = vadd.f32 %v7301_v59, %v892_v18  ;;  %v7306_v5 = vld [vmem:[#allocation63_spill] sm:$0xff] }
 0x27b   : > { %2201 = vrot.lane.b32.xlu2 %v2190_v42, %s4346_s15  ;;  %2199 = vrot.lane.b32.xlu1 %v2188_v26, %s4346_s15  ;;  %v932_v42 = vsel %vm430_vm5, %v7302_v20, %v7301_v59  ;;  %v7303_v26 = vld [vmem:[#allocation59_spill] sm:$0xff]  ;;  %v972_v2 = vadd.f32 %v7306_v5, %v943_v49  ;;  %v973_v20 = vadd.f32 %v7306_v5, %v944_v12  ;;  %v2235_v59 = vrot.slane %v2222_v27, 4  ;;  %v7311_v5 = vld [vmem:[#allocation66_spill] sm:$0xff] }
 0x27c   : > { %2197 = vrot.lane.b32.xlu0 %v2186_v29, %s4346_s15  ;;  %v1031_v63 = vadd.f32 %v7303_v26, %v1002_v55  ;;  %v1030_v46 = vadd.f32 %v7303_v26, %v1001_v57  ;;  %v5660_v29 = vstv %s5609_s5  ;;  %v941_v38 = vadd.f32 %v932_v42, %v891_v11  ;;  %v7305_v55 = vld [vmem:[#allocation62_spill] sm:$0xff]  ;;  %v7307_v11 = vld [vmem:[#allocation64_spill] sm:$0xff]  ;;  %s6145_s5 = sld [smem:[#allocation5 + $0x22]] }
 0x27d   : > { %v5640_v23 = vpop.permute.xlu2 %1878  ;;  %v5642_v47 = vpop.permute.xlu1 %1796  ;;  %v5676_v57 = vmul.f32 %v5673_v56, %v1173_v34  ;;  %v5683_v40 = vmul.f32 %v5664_v44, %v5660_v29  ;;  %v971_v18 = vadd.f32 %v7307_v11, %v942_v1  ;;  %v2239_v42 = vrot.slane %v2224_v22, 4 }
 0x27e   : > { %7300 = vst [vmem:[#allocation25_spill] sm:$0xff] %v5640_v23  ;;  %v5656_v24 = vpop.permute.xlu0 %1794  ;;  %v1058_v58 = vadd.f32 %v7305_v55, %v1031_v63  ;;  %v1057_v17 = vadd.f32 %v7305_v55, %v1030_v46  ;;  %v970_v31 = vadd.f32 %v7307_v11, %v941_v38  ;;  %v2237_v26 = vrot.slane %v2223_v30, 4  ;;  %v7308_v63 = vld [vmem:[#allocation65_spill] sm:$0xff]  ;;  %v7313_v30 = vld [vmem:[#allocation67_spill] sm:$0xff]  ;;  %v7314_v23 = vld [vmem:[#allocation68_spill] sm:$0xff] }
 0x27f   : > { %7304 = vst [vmem:[#allocation24_spill] sm:$0xff] %v5656_v24  ;;  %v999_v1 = vadd.f32 %v7311_v5, %v972_v2  ;;  %v5705_v27 = vmul.f32 %v5164_v39, %v5660_v29  ;;  %v998_v11 = vadd.f32 %v7313_v30, %v971_v18  ;;  %v1000_v46 = vadd.f32 %v7311_v5, %v973_v20  ;;  %v7315_v20 = vld [vmem:[#allocation69_spill] sm:$0xff] }
 0x280   : > { %v1086_v49 = vadd.f32 %v7308_v63, %v1057_v17  ;;  %v1087_v55 = vadd.f32 %v7308_v63, %v1058_v58  ;;  %v997_v17 = vadd.f32 %v7313_v30, %v970_v31  ;;  %v2240_v58 = vsel %vm2108_vm6, %v2235_v59, %v2239_v42  ;;  %v4139_v42 = vld [vmem:[#allocation4 + $0x8] sm:$0xff] }
 0x281   : > { %v2238_v2 = vsel %vm2108_vm6, %v2233_v43, %v2237_v26  ;;  %v1176_v31 = vmul.f32 %v5133_v50, %v1173_v34  ;;  %v2236_v18 = vsel %vm2108_vm6, %v2232_v6, %v2235_v59  ;;  %v1028_v5 = vadd.f32 %v7315_v20, %v999_v1  ;;  %v5725_v43 = vld [vmem:[#allocation4 + $0x20] sm:$0xff]  ;;  %v4141_v59 = vld [vmem:[#allocation4 + $0x68] sm:$0xff] }
 0x282   : > { %v1114_v39 = vadd.f32 %v7314_v23, %v1087_v55  ;;  %v1175_v30 = vmul.f32 %v4139_v42, %v1173_v34  ;;  %v5728_v26 = vmul.f32 %v5725_v43, %v1173_v34  ;;  %v7317_v1 = vld [vmem:[#allocation72_spill] sm:$0xff] }
 0x283   : > { %2245 = vrot.lane.b32.xlu2 %v2234_v21, %s4346_s15  ;;  %2243 = vrot.lane.b32.xlu1 %v2232_v6, %s4346_s15  ;;  %v2270_v21 = vstv %s5648_s7  ;;  %v5740_v6 = vmul.f32 %v7255_v54, %v5660_v29  ;;  %v7320_v54 = vld [vmem:[#allocation73_spill] sm:$0xff]  ;;  %s6205_s7 = sld [smem:[#allocation5 + $0x53]] }
 0x284   : > { %2241 = vrot.lane.b32.xlu0 %v2231_v0, %s4346_s15  ;;  %v2271_v63 = vmul.f32 %v5133_v50, %v2270_v21  ;;  %v5717_v0 = vmul.f32 %v5136_v13, %v2270_v21  ;;  %v7316_v13 = vld [vmem:[#allocation70_spill] sm:$0xff]  ;;  %v5736_v50 = vmul.f32 %v5725_v43, %v2270_v21 }
 0x285   : > { %v5695_v38 = vpop.permute.xlu2 %1884  ;;  %v5697_v12 = vpop.permute.xlu1 %1834  ;;  %v1026_v24 = vadd.f32 %v7316_v13, %v997_v17 }
 0x286   : > { %7309 = vst [vmem:[#allocation26_spill] sm:$0xff] %v5695_v38  ;;  %v5707_v22 = vpop.permute.xlu0 %1832  ;;  %v2285_v55 = vrot.slane %v5717_v0, 4 }
 0x287   : > { %7310 = vst [vmem:[#allocation28_spill] sm:$0xff] %v5697_v12  ;;  %v1113_v12 = vadd.f32 %v7314_v23, %v1086_v49  ;;  %v1029_v49 = vadd.f32 %v7315_v20, %v1000_v46  ;;  %v1027_v23 = vadd.f32 %v7316_v13, %v998_v11  ;;  %v2283_v46 = vrot.slane %v2271_v63, 4 }
 0x288   : > { %7312 = vst [vmem:[#allocation27_spill] sm:$0xff] %v5707_v22  ;;  %v1174_v22 = vmul.f32 %v5301_v52, %v1173_v34  ;;  %v5743_v34 = vmul.f32 %v4141_v59, %v5660_v29  ;;  %v1143_v11 = vadd.f32 %v7317_v1, %v1114_v39  ;;  %v1055_v13 = vadd.f32 %v7320_v54, %v1028_v5  ;;  %v7323_v39 = vld [vmem:[#allocation76_spill] sm:$0xff] }
 0x289   : > { %v1142_v17 = vadd.f32 %v7317_v1, %v1113_v12  ;;  %v1056_v59 = vadd.f32 %v7320_v54, %v1029_v49  ;;  %v1191_v63 = vrot.slane %v5728_v26, 2  ;;  %v7322_v12 = vld [vmem:[#allocation74_spill] sm:$0xff]  ;;  %v2284_v1 = vrot.slane %v5736_v50, 4  ;;  %v7324_v54 = vld [vmem:[#allocation77_spill] sm:$0xff] }
 0x28a   : > { %v1053_v52 = vadd.f32 %v7322_v12, %v1026_v24  ;;  %v2286_v32 = vsel %vm2108_vm6, %v2283_v46, %v2285_v55  ;;  %v2274_v5 = vmul.f32 %v5673_v56, %v2270_v21  ;;  %v2276_v49 = vmul.f32 %v2270_v21, %v5549_v3 }
 0x28b   : > { %2251 = vrot.lane.b32.xlu2 %v2240_v58, %s4346_s15  ;;  %2249 = vrot.lane.b32.xlu1 %v2238_v2, %s4346_s15  ;;  %v1187_v58 = vrot.slane %v1174_v22, 2  ;;  %v1188_v2 = vrot.slane %v1176_v31, 2  ;;  %v1169_v22 = vadd.f32 %v7323_v39, %v1142_v17  ;;  %v5764_v31 = vmul.f32 %v5161_v8, %v5660_v29  ;;  %v5775_v17 = vld [vmem:[#allocation4 + $0x80] sm:$0xff] }
 0x28c   : > { %2247 = vrot.lane.b32.xlu0 %v2236_v18, %s4346_s15  ;;  %v1190_v18 = vrot.slane %v1175_v30, 2  ;;  %v2275_v30 = vmul.f32 %v2270_v21, %v5551_v41  ;;  %v1054_v26 = vadd.f32 %v7322_v12, %v1027_v23  ;;  %v5779_v8 = vmul.f32 %v5775_v17, %v5660_v29 }
 0x28d   : > { %v5749_v20 = vpop.permute.xlu2 %1915  ;;  %v5751_v42 = vpop.permute.xlu1 %1840  ;;  %v5773_v24 = vsel %vm1186_vm2, %v1187_v58, %v1188_v2  ;;  %v1222_v50 = vrot.slane %v5740_v6, 2  ;;  %v1225_v41 = vrot.slane %v5743_v34, 2  ;;  %v7325_v21 = vrot.slane %v5671_v10, 2  ;;  %v7326_v58 = vld [vmem:[#allocation78_spill] sm:$0xff] }
 0x28e   : > { %7318 = vst [vmem:[#allocation31_spill] sm:$0xff] %v5749_v20  ;;  %v5758_v0 = vpop.permute.xlu0 %1838  ;;  %v5784_v35 = vsel %vm1186_vm2, %v1190_v18, %v1191_v63  ;;  %v1082_v12 = vadd.f32 %v7326_v58, %v1053_v52  ;;  %v1083_v53 = vadd.f32 %v7326_v58, %v1054_v26  ;;  %v1085_v29 = vadd.f32 %v7324_v54, %v1056_v59  ;;  %v7328_v52 = vld [vmem:[#allocation81_spill] sm:$0xff]  ;;  %v7343_v20 = vld [vmem:[#allocation98_spill] sm:$0xff] }
 0x28f   : > { %7319 = vst [vmem:[#allocation30_spill] sm:$0xff] %v5751_v42  ;;  %v1194_v23 = vsel %vm1186_vm2, %v1188_v2, %v7325_v21  ;;  %v1223_v6 = vrot.slane %v5764_v31, 2  ;;  %v2287_v18 = vrot.slane %v2274_v5, 4  ;;  %v2291_v2 = vrot.slane %v2276_v49, 4  ;;  %v7342_v42 = vld [vmem:[#allocation88_spill] sm:$0xff] }
 0x290   : > { %7321 = vst [vmem:[#allocation34_spill] sm:$0xff] %v5758_v0  ;;  %v1084_v0 = vadd.f32 %v7324_v54, %v1055_v13  ;;  %v7327_v13 = vmov %v7325_v21  ;;  %v2289_v21 = vrot.slane %v2275_v30, 4  ;;  %v1109_v9 = vadd.f32 %v7328_v52, %v1082_v12 }
 0x291   : > { %v1207_v34 = vadd.f32 %v7327_v13, %v1169_v22  ;;  %v1112_v59 = vadd.f32 %v7329_v16, %v1085_v29  ;;  %v1170_v58 = vadd.f32 %v7323_v39, %v1143_v11  ;;  %v1110_v10 = vadd.f32 %v7328_v52, %v1083_v53  ;;  %v7336_v13 = vld [vmem:[#allocation82_spill] sm:$0xff] }
 0x292   : > { %v1111_v26 = vadd.f32 %v7329_v16, %v1084_v0  ;;  %v7332_v22 = vrot.slane %v5676_v57, 2  ;;  %v7334_v0 = vld [vmem:[#allocation84_spill] sm:$0xff]  ;;  %v7335_v16 = vld [vmem:[#allocation83_spill] sm:$0xff]  ;;  %v2292_v53 = vsel %vm2108_vm6, %v2287_v18, %v2291_v2  ;;  %v2290_v39 = vsel %vm2108_vm6, %v2285_v55, %v2289_v21  ;;  %v5826_v52 = vld [vmem:[#allocation4 + $0x90] sm:$0xff] }
 0x293   : > { %2297 = vrot.lane.b32.xlu2 %v2286_v32, %s4347_s4  ;;  %2295 = vrot.lane.b32.xlu1 %v2284_v1, %s4347_s4  ;;  %v2320_v32 = vstv %s5753_s12  ;;  %v1138_v30 = vadd.f32 %v7334_v0, %v1109_v9  ;;  %v1141_v29 = vadd.f32 %v7335_v16, %v1112_v59  ;;  %v7338_v59 = vld [vmem:[#allocation86_spill] sm:$0xff]  ;;  %v2288_v2 = vsel %vm2108_vm6, %v2284_v1, %v2287_v18  ;;  %v7345_v18 = vld [vmem:[#allocation104_spill] sm:$0xff]  ;;  %s6253_s12 = sld [smem:[#allocation5 + $0x24]] }
 0x294   : > { %2293 = vrot.lane.b32.xlu0 %v2283_v46, %s4347_s4  ;;  %v1226_v46 = vrot.slane %v5779_v8, 2  ;;  %v1196_v5 = vsel %vm1186_vm2, %v1191_v63, %v7332_v22  ;;  %v1140_v12 = vadd.f32 %v7335_v16, %v1111_v26  ;;  %v5823_v8 = vld [vmem:[#allocation4 + $0x78] sm:$0xff]  ;;  %v5829_v9 = vmul.f32 %v5826_v52, %v2320_v32 }
 0x295   : > { %v5802_v54 = vpop.permute.xlu2 %1938  ;;  %v5804_v31 = vpop.permute.xlu1 %1876  ;;  %v2321_v63 = vmul.f32 %v5823_v8, %v2320_v32  ;;  %v1139_v26 = vadd.f32 %v7334_v0, %v1110_v10  ;;  %v7339_v16 = vrot.slane %v5705_v27, 2  ;;  %v7340_v55 = vrot.slane %v5676_v57, 2 }
 0x296   : > { %7330 = vst [vmem:[#allocation33_spill] sm:$0xff] %v5802_v54  ;;  %v5813_v49 = vpop.permute.xlu0 %1874  ;;  %v1167_v22 = vadd.f32 %v7338_v59, %v1140_v12  ;;  %v1168_v54 = vadd.f32 %v7338_v59, %v1141_v29  ;;  %v1333_v38 = vsel %vm347_vm4, %v7343_v20, %v7342_v42  ;;  %v5847_v1 = vmul.f32 %v5775_v17, %v2320_v32 }
 0x297   : > { %7331 = vst [vmem:[#allocation37_spill] sm:$0xff] %v5804_v31  ;;  %v7337_v31 = vld [vmem:[#allocation92_spill] sm:$0xff]  ;;  %v1208_v21 = vadd.f32 %v7340_v55, %v1170_v58  ;;  %v1224_v57 = vsel %vm1186_vm2, %v1222_v50, %v1223_v6  ;;  %v2335_v20 = vrot.slane %v5829_v9, 4  ;;  %v7346_v12 = vmov %v7339_v16 }
 0x298   : > { %7333 = vst [vmem:[#allocation32_spill] sm:$0xff] %v5813_v49  ;;  %v1283_v11 = vsel %vm347_vm4, %v7337_v31, %v7336_v13  ;;  %v1242_v31 = vadd.f32 %v7339_v16, %v1207_v34  ;;  %v7341_v49 = vld [vmem:[#allocation87_spill] sm:$0xff]  ;;  %v7344_v34 = vld [vmem:[#allocation94_spill] sm:$0xff]  ;;  %v1229_v29 = vsel %vm1186_vm2, %v1223_v6, %v7346_v12  ;;  %v7353_v12 = vld [vmem:[#allocation93_spill] sm:$0xff] }
 0x299   : > { %v1165_v4 = vadd.f32 %v7341_v49, %v1138_v30  ;;  %v1166_v10 = vadd.f32 %v7341_v49, %v1139_v26  ;;  %v1385_v58 = vsel %vm430_vm5, %v7345_v18, %v7344_v34  ;;  %v2333_v30 = vrot.slane %v2321_v63, 4  ;;  %v7350_v6 = vld [vmem:[#allocation110_spill] sm:$0xff] }
 0x29a   : > { %v1294_v0 = vadd.f32 %v1283_v11, %v1242_v31  ;;  %v1227_v49 = vsel %vm1186_vm2, %v1225_v41, %v1226_v46  ;;  %v1205_v11 = vadd.f32 %v1194_v23, %v1167_v22  ;;  %v7347_v26 = vrot.slane %v5683_v40, 2 }
 0x29b   : > { %2303 = vrot.lane.b32.xlu2 %v2292_v53, %s4347_s4  ;;  %2301 = vrot.lane.b32.xlu1 %v2290_v39, %s4347_s4  ;;  %v1203_v63 = vadd.f32 %v5773_v24, %v1165_v4  ;;  %v1206_v41 = vadd.f32 %v1196_v5, %v1168_v54  ;;  %v1204_v27 = vadd.f32 %v5784_v35, %v1166_v10  ;;  %v7352_v10 = vld [vmem:[#allocation90_spill] sm:$0xff] }
 0x29c   : > { %2299 = vrot.lane.b32.xlu0 %v2288_v2, %s4347_s4  ;;  %v1344_v53 = vadd.f32 %v1333_v38, %v1294_v0  ;;  %v1243_v59 = vadd.f32 %v7347_v26, %v1208_v21  ;;  %v7348_v9 = vmov %v7347_v26  ;;  %v7349_v38 = vld [vmem:[#allocation100_spill] sm:$0xff]  ;;  %v2334_v2 = vrot.slane %v5847_v1, 4  ;;  %v7351_v21 = vld [vmem:[#allocation89_spill] sm:$0xff] }
 0x29d   : > { %v5861_v50 = vpop.permute.xlu2 %1963  ;;  %v5863_v39 = vpop.permute.xlu1 %1882  ;;  %v1231_v16 = vsel %vm1186_vm2, %v1226_v46, %v7348_v9  ;;  %v1435_v22 = vsel %vm430_vm5, %v7350_v6, %v7349_v38  ;;  %v2336_v55 = vsel %vm2108_vm6, %v2333_v30, %v2335_v20  ;;  %v2324_v4 = vmul.f32 %v5664_v44, %v2320_v32 }
 0x29e   : > { %v5871_v31 = vpop.permute.xlu0 %1880  ;;  %v1396_v23 = vadd.f32 %v1385_v58, %v1344_v53  ;;  %v2326_v40 = vmul.f32 %v2320_v32, %v5644_v51  ;;  %v2325_v24 = vmul.f32 %v2320_v32, %v5646_v60  ;;  %v1295_v54 = vadd.f32 %v7336_v13, %v1243_v59  ;;  %v7354_v53 = vld [vmem:[#allocation79_spill] sm:$0xff] }
 0x29f   : > { %v1240_v46 = vadd.f32 %v1229_v29, %v1205_v11  ;;  %v1238_v35 = vadd.f32 %v1224_v57, %v1203_v63  ;;  %v1241_v5 = vadd.f32 %v1231_v16, %v1206_v41  ;;  %v1281_v0 = vsel %vm347_vm4, %v7352_v10, %v7351_v21  ;;  %v7356_v41 = vld [vmem:[#allocation95_spill] sm:$0xff] }
 0x2a0   : > { %v1446_v18 = vadd.f32 %v1435_v22, %v1396_v23  ;;  %v1239_v1 = vadd.f32 %v1227_v49, %v1204_v27  ;;  %v1345_v58 = vadd.f32 %v7342_v42, %v1295_v54  ;;  %v1282_v26 = vsel %vm347_vm4, %v7354_v53, %v7353_v12  ;;  %v7358_v23 = vld [vmem:[#allocation103_spill] sm:$0xff] }
 0x2a1   : > { %v2337_v32 = vrot.slane %v2324_v4, 4  ;;  %v2341_v13 = vrot.slane %v2326_v40, 4  ;;  %v2339_v57 = vrot.slane %v2325_v24, 4  ;;  %v2372_v29 = vstv %s5855_s3  ;;  %s6354_s3 = sld [smem:[#allocation5 + $0x55]] }
 0x2a2   : > { %v1290_v11 = vadd.f32 %v1281_v0, %v1238_v35  ;;  %v1291_v59 = vadd.f32 %v7351_v21, %v1239_v1  ;;  %v1397_v49 = vadd.f32 %v7344_v34, %v1345_v58  ;;  %v1292_v9 = vadd.f32 %v1282_v26, %v1240_v46  ;;  %v7360_v34 = vld [vmem:[#allocation99_spill] sm:$0xff]  ;;  %v7362_v0 = vld [vmem:[#allocation101_spill] sm:$0xff] }
 0x2a3   : > { %2347 = vrot.lane.b32.xlu2 %v2336_v55, %s4347_s4  ;;  %2345 = vrot.lane.b32.xlu1 %v2334_v2, %s4347_s4  ;;  %v1293_v16 = vadd.f32 %v7353_v12, %v1241_v5  ;;  %v1475_v6 = vadd.f32 %v7358_v23, %v1446_v18  ;;  %v7361_v55 = vld [vmem:[#allocation85_spill] sm:$0xff]  ;;  %v2374_v24 = vmul.f32 %v5673_v56, %v2372_v29  ;;  %v7363_v18 = vld [vmem:[#allocation102_spill] sm:$0xff] }
 0x2a4   : > { %2343 = vrot.lane.b32.xlu0 %v2333_v30, %s4347_s4  ;;  %v7357_v30 = vld [vmem:[#allocation96_spill] sm:$0xff]  ;;  %v1332_v4 = vsel %vm347_vm4, %v7361_v55, %v7360_v34  ;;  %v1447_v40 = vadd.f32 %v7349_v38, %v1397_v49  ;;  %v2375_v54 = vmul.f32 %v2372_v29, %v5549_v3  ;;  %v1341_v46 = vadd.f32 %v7356_v41, %v1291_v59  ;;  %v7364_v26 = vld [vmem:[#allocation105_spill] sm:$0xff]  ;;  %v7365_v59 = vld [vmem:[#allocation91_spill] sm:$0xff] }
 0x2a5   : > { %v5896_v42 = vpop.permute.xlu2 %1986  ;;  %v5898_v63 = vpop.permute.xlu1 %1913  ;;  %v1331_v27 = vsel %vm347_vm4, %v7357_v30, %v7356_v41  ;;  %v2342_v35 = vsel %vm2108_vm6, %v2337_v32, %v2341_v13  ;;  %v2340_v5 = vsel %vm2108_vm6, %v2335_v20, %v2339_v57  ;;  %v2373_v21 = vmul.f32 %v5725_v43, %v2372_v29  ;;  %v7366_v49 = vld [vmem:[#allocation106_spill] sm:$0xff]  ;;  %v7368_v41 = vld [vmem:[#allocation97_spill] sm:$0xff] }
 0x2a6   : > { %7355 = vst [vmem:[#allocation42_spill] sm:$0xff] %v5898_v63  ;;  %v5909_v22 = vpop.permute.xlu0 %1911  ;;  %v1340_v10 = vadd.f32 %v1331_v27, %v1290_v11  ;;  %v1383_v1 = vsel %vm430_vm5, %v7363_v18, %v7362_v0  ;;  %v1476_v38 = vadd.f32 %v7358_v23, %v1447_v40  ;;  %v2338_v58 = vsel %vm2108_vm6, %v2334_v2, %v2337_v32  ;;  %v7370_v55 = vld [vmem:[#allocation109_spill] sm:$0xff]  ;;  %v6024_v63 = vld [vmem:[#allocation4 + $0x18] sm:$0xff] }
 0x2a7   : > { %7359 = vst [vmem:[#allocation38_spill] sm:$0xff] %v5909_v22  ;;  %v1342_v12 = vadd.f32 %v1332_v4, %v1292_v9  ;;  %v1343_v53 = vadd.f32 %v7360_v34, %v1293_v16  ;;  %v1384_v13 = vsel %vm430_vm5, %v7365_v59, %v7364_v26  ;;  %v1502_v20 = vadd.f32 %v7366_v49, %v1475_v6  ;;  %v7367_v16 = vld [vmem:[#allocation111_spill] sm:$0xff] }
 0x2a8   : > { %v1393_v57 = vadd.f32 %v7362_v0, %v1341_v46  ;;  %v1503_v29 = vadd.f32 %v7366_v49, %v1476_v38  ;;  %v2380_v11 = vrot.slane %v2374_v24, 4  ;;  %v2382_v2 = vrot.slane %v2375_v54, 4  ;;  %v7369_v6 = vld [vmem:[#allocation107_spill] sm:$0xff]  ;;  %v7372_v46 = vld [vmem:[#allocation108_spill] sm:$0xff] }
 0x2a9   : > { %v1392_v32 = vadd.f32 %v1383_v1, %v1340_v10  ;;  %v1395_v9 = vadd.f32 %v7364_v26, %v1343_v53  ;;  %v1434_v30 = vsel %vm430_vm5, %v7368_v41, %v7367_v16  ;;  %v2379_v27 = vrot.slane %v2373_v21, 4  ;;  %v7374_v1 = vld [vmem:[#allocation112_spill] sm:$0xff] }
 0x2aa   : > { %v1394_v23 = vadd.f32 %v1384_v13, %v1342_v12  ;;  %v1443_v34 = vadd.f32 %v7369_v6, %v1393_v57  ;;  %v1532_v4 = vadd.f32 %v7370_v55, %v1503_v29  ;;  %v2399_v54 = vstv %s5900_s6  ;;  %v5969_v29 = vld [vmem:[#allocation4 + $0x30] sm:$0xff]  ;;  %s3945_s6 = sld [smem:[#allocation5 + $0x25]] }
 0x2ab   : > { %2353 = vrot.lane.b32.xlu2 %v2342_v35, %s4347_s4  ;;  %2351 = vrot.lane.b32.xlu1 %v2340_v5, %s4347_s4  ;;  %v1433_v35 = vsel %vm430_vm5, %v7372_v46, %v7369_v6  ;;  %v1445_v5 = vadd.f32 %v7367_v16, %v1395_v9  ;;  %v1531_v21 = vadd.f32 %v7370_v55, %v1502_v20  ;;  %v1674_v10 = vstv %s5907_s25  ;;  %v7375_v20 = vld [vmem:[#allocation115_spill] sm:$0xff]  ;;  %s3946_s25 = sld [smem:[#allocation5 + $0x56]] }
 0x2ac   : > { %2349 = vrot.lane.b32.xlu0 %v2338_v58, %s4347_s4  ;;  %v1444_v18 = vadd.f32 %v1434_v30, %v1394_v23  ;;  %v1559_v38 = vadd.f32 %v7374_v1, %v1532_v4  ;;  %v5961_v58 = vstv %s5915_s29  ;;  %v2383_v12 = vsel %vm2108_vm6, %v2380_v11, %v2382_v2  ;;  %v7376_v2 = vld [vmem:[#allocation113_spill] sm:$0xff]  ;;  %v7377_v23 = vld [vmem:[#allocation114_spill] sm:$0xff]  ;;  %s3947_s29 = sld [smem:[#allocation5 + $0x26]] }
 0x2ad   : > { %v5946_v40 = vpop.permute.xlu2 %2011  ;;  %v5948_v24 = vpop.permute.xlu1 %1936  ;;  %v2381_v53 = vsel %vm2108_vm6, %v2379_v27, %v2380_v11  ;;  %v2401_v26 = vmul.f32 %v5664_v44, %v2399_v54  ;;  %v2402_v59 = vmul.f32 %v2399_v54, %v5644_v51  ;;  %v2400_v13 = vmul.f32 %v5775_v17, %v2399_v54  ;;  %v7378_v4 = vld [vmem:[#allocation118_spill] sm:$0xff] }
 0x2ae   : > { %7371 = vst [vmem:[#allocation48_spill] sm:$0xff] %v5948_v24  ;;  %v5957_v0 = vpop.permute.xlu0 %1934  ;;  %v1442_v49 = vadd.f32 %v1433_v35, %v1392_v32  ;;  %v1588_v57 = vadd.f32 %v7375_v20, %v1559_v38  ;;  %v5972_v9 = vmul.f32 %v5969_v29, %v1674_v10  ;;  %v5975_v16 = vmul.f32 %v5673_v56, %v1674_v10 }
 0x2af   : > { %7373 = vst [vmem:[#allocation36_spill] sm:$0xff] %v5957_v0  ;;  %v1558_v11 = vadd.f32 %v7374_v1, %v1531_v21  ;;  %v1473_v41 = vadd.f32 %v7376_v2, %v1444_v18  ;;  %v1474_v30 = vadd.f32 %v7376_v2, %v1445_v5  ;;  %v5982_v32 = vmul.f32 %v5664_v44, %v5961_v58  ;;  %v7379_v18 = vld [vmem:[#allocation121_spill] sm:$0xff] }
 0x2b0   : > { %v1471_v6 = vadd.f32 %v7377_v23, %v1442_v49  ;;  %v1472_v55 = vadd.f32 %v7377_v23, %v1443_v34  ;;  %v1615_v54 = vadd.f32 %v7378_v4, %v1588_v57  ;;  %v2407_v46 = vrot.slane %v2401_v26, 4  ;;  %v7383_v23 = vld [vmem:[#allocation117_spill] sm:$0xff] }
 0x2b1   : > { %v2409_v35 = vrot.slane %v2402_v59, 4  ;;  %v2406_v21 = vrot.slane %v2400_v13, 4  ;;  %v2428_v5 = vstv %s5942_s19  ;;  %v5996_v34 = vmul.f32 %v5826_v52, %v5961_v58  ;;  %s3948_s19 = sld [smem:[#allocation5 + $0x57]] }
 0x2b2   : > { %v1644_v1 = vadd.f32 %v7379_v18, %v1615_v54  ;;  %v1498_v54 = vadd.f32 %v7383_v23, %v1471_v6  ;;  %v2430_v49 = vmul.f32 %v5673_v56, %v2428_v5  ;;  %v1499_v0 = vadd.f32 %v7383_v23, %v1472_v55  ;;  %v7388_v23 = vld [vmem:[#allocation123_spill] sm:$0xff] }
 0x2b3   : > { %2388 = vrot.lane.b32.xlu2 %v2383_v12, %s4348_s21  ;;  %2386 = vrot.lane.b32.xlu1 %v2381_v53, %s4348_s21  ;;  %v7381_v53 = vld [vmem:[#allocation116_spill] sm:$0xff]  ;;  %v6027_v55 = vmul.f32 %v6024_v63, %v1674_v10 }
 0x2b4   : > { %2384 = vrot.lane.b32.xlu0 %v2379_v27, %s4348_s21  ;;  %v1587_v27 = vadd.f32 %v7375_v20, %v1558_v11  ;;  %v1500_v26 = vadd.f32 %v7381_v53, %v1473_v41  ;;  %v1501_v59 = vadd.f32 %v7381_v53, %v1474_v30  ;;  %v1671_v38 = vadd.f32 %v5310_v61, %v1644_v1  ;;  %v7384_v53 = vld [vmem:[#allocation119_spill] sm:$0xff] }
 0x2b5   : > { %v5998_v57 = vpop.permute.xlu2 %2034  ;;  %v6000_v12 = vpop.permute.xlu1 %1961  ;;  %v2410_v20 = vsel %vm2108_vm6, %v2407_v46, %v2409_v35  ;;  %v2408_v11 = vsel %vm2108_vm6, %v2406_v21, %v2407_v46  ;;  %v2429_v41 = vmul.f32 %v5725_v43, %v2428_v5  ;;  %v1713_v1 = vrot.slane %v5996_v34, 3 }
 0x2b6   : > { %7380 = vst [vmem:[#allocation44_spill] sm:$0xff] %v6000_v12  ;;  %v6008_v2 = vpop.permute.xlu0 %1959  ;;  %v2431_v12 = vmul.f32 %v2428_v5, %v5549_v3  ;;  %v1614_v30 = vadd.f32 %v7378_v4, %v1587_v27  ;;  %v1529_v13 = vadd.f32 %v7384_v53, %v1500_v26  ;;  %v1530_v6 = vadd.f32 %v7384_v53, %v1501_v59  ;;  %v7387_v59 = vld [vmem:[#allocation122_spill] sm:$0xff] }
 0x2b7   : > { %7382 = vst [vmem:[#allocation54_spill] sm:$0xff] %v6008_v2  ;;  %v7385_v2 = vld [vmem:[#allocation120_spill] sm:$0xff]  ;;  %v6030_v46 = vmul.f32 %v5725_v43, %v1674_v10  ;;  %v7386_v4 = vrot.slane %v5975_v16, 3  ;;  %v6036_v5 = vmul.f32 %v5823_v8, %v5961_v58 }
 0x2b8   : > { %v1527_v24 = vadd.f32 %v7385_v2, %v1498_v54  ;;  %v1528_v22 = vadd.f32 %v7385_v2, %v1499_v0  ;;  %v2436_v0 = vrot.slane %v2430_v49, 4  ;;  %v2438_v27 = vrot.slane %v2431_v12, 4 }
 0x2b9   : > { %v1701_v35 = vadd.f32 %v7386_v4, %v1671_v38  ;;  %v1643_v26 = vadd.f32 %v7379_v18, %v1614_v30  ;;  %v1556_v2 = vadd.f32 %v7387_v59, %v1529_v13  ;;  %v1557_v10 = vadd.f32 %v7387_v59, %v1530_v6 }
 0x2ba   : > { %v2435_v38 = vrot.slane %v2429_v41, 4  ;;  %v1554_v54 = vadd.f32 %v7388_v23, %v1527_v24  ;;  %v1555_v53 = vadd.f32 %v7388_v23, %v1528_v22  ;;  %v2455_v12 = vstv %s6002_s9  ;;  %s3949_s9 = sld [smem:[#allocation5 + $0x27]] }
 0x2bb   : > { %2415 = vrot.lane.b32.xlu2 %v2410_v20, %s4348_s21  ;;  %2413 = vrot.lane.b32.xlu1 %v2408_v11, %s4348_s21  ;;  %v6050_v20 = vmul.f32 %v5775_v17, %v5961_v58  ;;  %v1670_v13 = vadd.f32 %v5310_v61, %v1643_v26  ;;  %v1586_v11 = vadd.f32 %v5312_v19, %v1557_v10  ;;  %v1684_v41 = vrot.slane %v6027_v55, 3 }
 0x2bc   : > { %2411 = vrot.lane.b32.xlu0 %v2406_v21, %s4348_s21  ;;  %v1585_v21 = vadd.f32 %v5312_v19, %v1556_v2  ;;  %v7389_v22 = vrot.slane %v5982_v32, 3  ;;  %v1583_v58 = vadd.f32 %v5317_v62, %v1554_v54  ;;  %v1584_v6 = vadd.f32 %v5317_v62, %v1555_v53 }
 0x2bd   : > { %v6052_v49 = vpop.permute.xlu2 %2059  ;;  %v6054_v18 = vpop.permute.xlu1 %1984  ;;  %v2439_v4 = vsel %vm2108_vm6, %v2436_v0, %v2438_v27  ;;  %v2437_v59 = vsel %vm2108_vm6, %v2435_v38, %v2436_v0  ;;  %v2457_v61 = vmul.f32 %v5664_v44, %v2455_v12  ;;  %v2458_v26 = vmul.f32 %v2455_v12, %v5644_v51 }
 0x2be   : > { %v6061_v24 = vpop.permute.xlu0 %1982  ;;  %v1728_v30 = vadd.f32 %v7389_v22, %v1701_v35  ;;  %v2456_v19 = vmul.f32 %v5775_v17, %v2455_v12  ;;  %v1611_v2 = vadd.f32 %v5359_v7, %v1584_v6  ;;  %v1612_v10 = vadd.f32 %v5349_v15, %v1585_v21 }
 0x2bf   : > { %v1613_v35 = vadd.f32 %v5349_v15, %v1586_v11  ;;  %v1685_v23 = vrot.slane %v6030_v46, 3  ;;  %v7390_v62 = vrot.slane %v5972_v9, 3  ;;  %v1610_v0 = vadd.f32 %v5359_v7, %v1583_v58 }
 0x2c0   : > { %v1772_v54 = vadd.f32 %v5398_v36, %v1728_v30  ;;  %v1711_v53 = vrot.slane %v6036_v5, 3  ;;  %v1640_v12 = vadd.f32 %v5408_v48, %v1611_v2  ;;  %v1641_v22 = vadd.f32 %v5400_v45, %v1612_v10 }
 0x2c1   : > { %v1700_v27 = vadd.f32 %v7390_v62, %v1670_v13  ;;  %v1642_v21 = vadd.f32 %v5400_v45, %v1613_v35  ;;  %v1712_v15 = vrot.slane %v6050_v20, 3  ;;  %v2463_v46 = vrot.slane %v2457_v61, 4 }
 0x2c2   : > { %v2465_v7 = vrot.slane %v2458_v26, 4  ;;  %v2462_v13 = vrot.slane %v2456_v19, 4  ;;  %v2484_v11 = vstv %s6044_s22  ;;  %v7391_v30 = vmov %v7390_v62  ;;  %s3950_s22 = sld [smem:[#allocation5 + $0x58]] }
 0x2c3   : > { %2444 = vrot.lane.b32.xlu2 %v2439_v4, %s4349_s20  ;;  %2442 = vrot.lane.b32.xlu1 %v2437_v59, %s4349_s20  ;;  %v1687_v58 = vsel %vm1683_vm3, %v1684_v41, %v7391_v30  ;;  %v7392_v45 = vrot.slane %v5975_v16, 3  ;;  %v1668_v6 = vadd.f32 %v5443_v28, %v1641_v22  ;;  %v1814_v4 = vadd.f32 %v5494_v25, %v1772_v54  ;;  %v7393_v22 = vld [vmem:[#allocation26_spill] sm:$0xff] }
 0x2c4   : > { %2440 = vrot.lane.b32.xlu0 %v2435_v38, %s4349_s20  ;;  %v1639_v9 = vadd.f32 %v5408_v48, %v1610_v0  ;;  %v1667_v61 = vadd.f32 %v5455_v33, %v1640_v12  ;;  %v1714_v16 = vsel %vm1683_vm3, %v1711_v53, %v1713_v1  ;;  %v1669_v26 = vadd.f32 %v5443_v28, %v1642_v21 }
 0x2c5   : > { %v1689_v20 = vsel %vm1683_vm3, %v1685_v23, %v7392_v45  ;;  %v6099_v59 = vpop.permute.xlu2 %2082  ;;  %v6101_v38 = vpop.permute.xlu1 %2009  ;;  %v1760_v2 = vsel %vm347_vm4, %v5547_v14, %v5398_v36  ;;  %v1858_v10 = vadd.f32 %v5587_v37, %v1814_v4  ;;  %v2486_v48 = vmul.f32 %v5673_v56, %v2484_v11 }
 0x2c6   : > { %v6113_v19 = vpop.permute.xlu0 %2007  ;;  %v2487_v35 = vmul.f32 %v2484_v11, %v5549_v3  ;;  %v1727_v62 = vadd.f32 %v1713_v1, %v1700_v27  ;;  %v2466_v0 = vsel %vm2108_vm6, %v2463_v46, %v2465_v7  ;;  %v2464_v28 = vsel %vm2108_vm6, %v2462_v13, %v2463_v46  ;;  %v7395_v7 = vld [vmem:[#allocation31_spill] sm:$0xff] }
 0x2c7   : > { %v2485_v54 = vmul.f32 %v5725_v43, %v2484_v11  ;;  %v1666_v12 = vadd.f32 %v5455_v33, %v1639_v9  ;;  %v1698_v36 = vadd.f32 %v1687_v58, %v1668_v6  ;;  %v1802_v14 = vsel %vm347_vm4, %v5642_v47, %v5494_v25  ;;  %v7396_v11 = vld [vmem:[#allocation30_spill] sm:$0xff] }
 0x2c8   : > { %v1900_v21 = vadd.f32 %v7393_v22, %v1858_v10  ;;  %v1697_v30 = vadd.f32 %v1685_v23, %v1667_v61  ;;  %v7394_v45 = vrot.slane %v5982_v32, 3  ;;  %v1699_v1 = vadd.f32 %v1689_v20, %v1669_v26  ;;  %v7398_v10 = vld [vmem:[#allocation22_spill] sm:$0xff] }
 0x2c9   : > { %v1771_v27 = vadd.f32 %v1760_v2, %v1727_v62  ;;  %v1846_v33 = vsel %vm430_vm5, %v7396_v11, %v5587_v37  ;;  %v2492_v25 = vrot.slane %v2486_v48, 4  ;;  %v2494_v47 = vrot.slane %v2487_v35, 4  ;;  %v7397_v37 = vld [vmem:[#allocation33_spill] sm:$0xff] }
 0x2ca   : > { %v1716_v34 = vsel %vm1683_vm3, %v1712_v15, %v7394_v45  ;;  %v1925_v46 = vadd.f32 %v7395_v7, %v1900_v21  ;;  %v2491_v23 = vrot.slane %v2485_v54, 4  ;;  %v1696_v58 = vadd.f32 %v1684_v41, %v1666_v12  ;;  %v7399_v48 = vld [vmem:[#allocation21_spill] sm:$0xff]  ;;  %v7400_v21 = vld [vmem:[#allocation124_spill] sm:$0xff]  ;;  %v7402_v45 = vld [vmem:[#allocation23_spill] sm:$0xff] }
 0x2cb   : > { %2471 = vrot.lane.b32.xlu2 %v2466_v0, %s4349_s20  ;;  %2469 = vrot.lane.b32.xlu1 %v2464_v28, %s4349_s20  ;;  %v1813_v32 = vadd.f32 %v1802_v14, %v1771_v27  ;;  %v1725_v20 = vadd.f32 %v1714_v16, %v1698_v36  ;;  %v2511_v61 = vstv %s6103_s26  ;;  %v1724_v26 = vadd.f32 %v1712_v15, %v1697_v30  ;;  %s3941_s26 = sld [smem:[#allocation5 + $0x23]] }
 0x2cc   : > { %2467 = vrot.lane.b32.xlu0 %v2462_v13, %s4349_s20  ;;  %v1948_v6 = vadd.f32 %v7397_v37, %v1925_v46  ;;  %v1726_v2 = vadd.f32 %v1716_v34, %v1699_v1  ;;  %v1758_v13 = vsel %vm347_vm4, %v7399_v48, %v7398_v10  ;;  %v1888_v41 = vsel %vm430_vm5, %v5863_v39, %v7393_v22  ;;  %v7401_v39 = vld [vmem:[#allocation125_spill] sm:$0xff]  ;;  %v7403_v34 = vld [vmem:[#allocation75_spill] sm:$0xff]  ;;  %v7404_v48 = vld [vmem:[#allocation24_spill] sm:$0xff] }
 0x2cd   : > { %v6150_v4 = vpop.permute.xlu2 %2195  ;;  %v6152_v9 = vpop.permute.xlu1 %2032  ;;  %v1857_v35 = vadd.f32 %v1846_v33, %v1813_v32  ;;  %v6165_v16 = vstv %s6119_s27  ;;  %v2495_v0 = vsel %vm2108_vm6, %v2492_v25, %v2494_v47  ;;  %v2493_v15 = vsel %vm2108_vm6, %v2491_v23, %v2492_v25  ;;  %s3942_s27 = sld [smem:[#allocation5 + $0x54]] }
 0x2ce   : > { %v6158_v62 = vpop.permute.xlu0 %2030  ;;  %v1973_v55 = vadd.f32 %v5861_v50, %v1948_v6  ;;  %v2513_v28 = vmul.f32 %v5664_v44, %v2511_v61  ;;  %v2514_v54 = vmul.f32 %v2511_v61, %v5644_v51  ;;  %v2512_v12 = vmul.f32 %v5775_v17, %v2511_v61 }
 0x2cf   : > { %v1723_v36 = vadd.f32 %v1711_v53, %v1696_v58  ;;  %v1768_v14 = vadd.f32 %v7398_v10, %v1724_v26  ;;  %v1759_v22 = vsel %vm347_vm4, %v7401_v39, %v7400_v21  ;;  %v1800_v1 = vsel %vm347_vm4, %v7403_v34, %v7402_v45  ;;  %v7407_v34 = vld [vmem:[#allocation27_spill] sm:$0xff] }
 0x2d0   : > { %v1996_v30 = vadd.f32 %v5896_v42, %v1973_v55  ;;  %v1899_v27 = vadd.f32 %v1888_v41, %v1857_v35  ;;  %v6184_v46 = vmul.f32 %v5673_v56, %v6165_v16  ;;  %v2101_v5 = vmul.f32 %v6165_v16, %v5549_v3 }
 0x2d1   : > { %v1767_v53 = vadd.f32 %v1758_v13, %v1723_v36  ;;  %v1770_v11 = vadd.f32 %v7400_v21, %v1726_v2  ;;  %v6191_v25 = vstv %s6140_s28  ;;  %v2519_v47 = vrot.slane %v2513_v28, 4  ;;  %v7405_v2 = vld [vmem:[#allocation20_spill] sm:$0xff]  ;;  %s3951_s28 = sld [smem:[#allocation5 + $0x28]] }
 0x2d2   : > { %v2021_v33 = vadd.f32 %v5946_v40, %v1996_v30  ;;  %v2521_v32 = vrot.slane %v2514_v54, 4  ;;  %v2518_v58 = vrot.slane %v2512_v12, 4  ;;  %v2540_v6 = vstv %s6145_s5  ;;  %s3952_s5 = sld [smem:[#allocation5 + $0x59]] }
 0x2d3   : > { %2500 = vrot.lane.b32.xlu2 %v2495_v0, %s4350_s0  ;;  %2498 = vrot.lane.b32.xlu1 %v2493_v15, %s4350_s0  ;;  %v1769_v61 = vadd.f32 %v1759_v22, %v1725_v20  ;;  %v1809_v26 = vadd.f32 %v1800_v1, %v1767_v53  ;;  %v1810_v10 = vadd.f32 %v7402_v45, %v1768_v14  ;;  %v2113_v0 = vrot.slane %v6184_v46, 4  ;;  %v7406_v45 = vld [vmem:[#allocation28_spill] sm:$0xff] }
 0x2d4   : > { %2496 = vrot.lane.b32.xlu0 %v2491_v23, %s4350_s0  ;;  %v1801_v13 = vsel %vm347_vm4, %v7405_v2, %v7404_v48  ;;  %v1924_v23 = vadd.f32 %v7395_v7, %v1899_v27  ;;  %v2044_v41 = vadd.f32 %v5998_v57, %v2021_v33  ;;  %v2117_v20 = vrot.slane %v2101_v5, 4  ;;  %v7408_v27 = vld [vmem:[#allocation34_spill] sm:$0xff]  ;;  %v7409_v5 = vld [vmem:[#allocation71_spill] sm:$0xff] }
 0x2d5   : > { %v6201_v35 = vpop.permute.xlu2 %2201  ;;  %v6203_v55 = vpop.permute.xlu1 %2057  ;;  %v6214_v28 = vmul.f32 %v5664_v44, %v6191_v25  ;;  %v2137_v54 = vmul.f32 %v6191_v25, %v5644_v51  ;;  %v2542_v12 = vmul.f32 %v5673_v56, %v2540_v6  ;;  %v2543_v36 = vmul.f32 %v2540_v6, %v5549_v3  ;;  %v7410_v3 = vld [vmem:[#allocation25_spill] sm:$0xff] }
 0x2d6   : > { %v6210_v15 = vpop.permute.xlu0 %2055  ;;  %v2069_v7 = vadd.f32 %v6052_v49, %v2044_v41  ;;  %v2522_v14 = vsel %vm2108_vm6, %v2519_v47, %v2521_v32  ;;  %v2520_v21 = vsel %vm2108_vm6, %v2518_v58, %v2519_v47  ;;  %v2541_v39 = vmul.f32 %v5725_v43, %v2540_v6 }
 0x2d7   : > { %v1811_v22 = vadd.f32 %v1801_v13, %v1769_v61  ;;  %v1812_v30 = vadd.f32 %v7404_v48, %v1770_v11  ;;  %v1844_v1 = vsel %vm430_vm5, %v7407_v34, %v7406_v45  ;;  %v1845_v56 = vsel %vm430_vm5, %v7409_v5, %v7408_v27 }
 0x2d8   : > { %v1887_v53 = vsel %vm430_vm5, %v7410_v3, %v5871_v31  ;;  %v1947_v33 = vadd.f32 %v7397_v37, %v1924_v23  ;;  %v2118_v47 = vsel %vm2108_vm6, %v2113_v0, %v2117_v20  ;;  %v2092_v11 = vadd.f32 %v6099_v59, %v2069_v7  ;;  %v7411_v20 = vld [vmem:[#allocation37_spill] sm:$0xff]  ;;  %v7412_v7 = vld [vmem:[#allocation32_spill] sm:$0xff] }
 0x2d9   : > { %v2148_v32 = vrot.slane %v6214_v28, 4  ;;  %v2152_v6 = vrot.slane %v2137_v54, 4  ;;  %v2548_v61 = vrot.slane %v2542_v12, 4  ;;  %v2550_v48 = vrot.slane %v2543_v36, 4 }
 0x2da   : > { %v1855_v2 = vadd.f32 %v1845_v56, %v1811_v22  ;;  %v1856_v13 = vadd.f32 %v7408_v27, %v1812_v30  ;;  %v2547_v37 = vrot.slane %v2541_v39, 4  ;;  %v1853_v23 = vadd.f32 %v1844_v1, %v1809_v26  ;;  %v6263_v22 = vld [vmem:[#allocation4 + $0x48] sm:$0xff] }
 0x2db   : > { %2527 = vrot.lane.b32.xlu2 %v2522_v14, %s4350_s0  ;;  %2525 = vrot.lane.b32.xlu1 %v2520_v21, %s4350_s0  ;;  %v1854_v41 = vadd.f32 %v7406_v45, %v1810_v10  ;;  %v1886_v34 = vsel %vm430_vm5, %v7412_v7, %v7411_v20  ;;  %v2567_v21 = vstv %s6205_s7  ;;  %v2130_v26 = vadd.f32 %v2118_v47, %v2092_v11  ;;  %v7413_v47 = vld [vmem:[#allocation42_spill] sm:$0xff]  ;;  %v7415_v7 = vld [vmem:[#allocation48_spill] sm:$0xff]  ;;  %s3953_s7 = sld [smem:[#allocation5 + $0x29]] }
 0x2dc   : > { %2523 = vrot.lane.b32.xlu0 %v2518_v58, %s4350_s0  ;;  %v1897_v12 = vadd.f32 %v1887_v53, %v1855_v2  ;;  %v1898_v36 = vadd.f32 %v5871_v31, %v1856_v13  ;;  %v6258_v58 = vmul.f32 %v5969_v29, %v6165_v16  ;;  %v1972_v39 = vadd.f32 %v5861_v50, %v1947_v33 }
 0x2dd   : > { %v6248_v54 = vpop.permute.xlu2 %2245  ;;  %v6250_v14 = vpop.permute.xlu1 %2080  ;;  %v2100_v30 = vmul.f32 %v6263_v22, %v6165_v16  ;;  %v2153_v45 = vsel %vm2108_vm6, %v2148_v32, %v2152_v6  ;;  %v2551_v31 = vsel %vm2108_vm6, %v2548_v61, %v2550_v48  ;;  %v2549_v1 = vsel %vm2108_vm6, %v2547_v37, %v2548_v61 }
 0x2de   : > { %v6260_v10 = vpop.permute.xlu0 %2078  ;;  %v2569_v27 = vmul.f32 %v5664_v44, %v2567_v21  ;;  %v2570_v5 = vmul.f32 %v2567_v21, %v5644_v51  ;;  %v2568_v56 = vmul.f32 %v5775_v17, %v2567_v21  ;;  %v1895_v50 = vadd.f32 %v1886_v34, %v1853_v23  ;;  %v7414_v51 = vld [vmem:[#allocation38_spill] sm:$0xff] }
 0x2df   : > { %v6277_v3 = vmul.f32 %v5826_v52, %v6191_v25  ;;  %v2136_v53 = vmul.f32 %v6191_v25, %v5646_v60  ;;  %v1896_v33 = vadd.f32 %v7411_v20, %v1854_v41  ;;  %v1922_v11 = vadd.f32 %v7413_v47, %v1897_v12 }
 0x2e0   : > { %v1923_v6 = vadd.f32 %v7413_v47, %v1898_v36  ;;  %v2165_v61 = vadd.f32 %v2153_v45, %v2130_v26  ;;  %v1995_v44 = vadd.f32 %v5896_v42, %v1972_v39  ;;  %v1920_v48 = vadd.f32 %v7414_v51, %v1895_v50 }
 0x2e1   : > { %v2111_v2 = vrot.slane %v6258_v58, 4  ;;  %v2115_v13 = vrot.slane %v2100_v30, 4  ;;  %v2575_v23 = vrot.slane %v2569_v27, 4  ;;  %v2577_v41 = vrot.slane %v2570_v5, 4  ;;  %v7417_v5 = vld [vmem:[#allocation44_spill] sm:$0xff] }
 0x2e2   : > { %v2217_v60 = vadd.f32 %v6201_v35, %v2165_v61  ;;  %v2574_v20 = vrot.slane %v2568_v56, 4  ;;  %v1946_v34 = vadd.f32 %v7415_v7, %v1923_v6  ;;  %v2146_v12 = vrot.slane %v6277_v3, 4 }
 0x2e3   : > { %2556 = vrot.lane.b32.xlu2 %v2551_v31, %s4351_s23  ;;  %2554 = vrot.lane.b32.xlu1 %v2549_v1, %s4351_s23  ;;  %v2150_v36 = vrot.slane %v2136_v53, 4  ;;  %v2669_v26 = vstv %s6253_s12  ;;  %v1921_v39 = vadd.f32 %v7414_v51, %v1896_v33  ;;  %v7416_v31 = vld [vmem:[#allocation36_spill] sm:$0xff]  ;;  %v1945_v27 = vadd.f32 %v7415_v7, %v1922_v11  ;;  %s3954_s12 = sld [smem:[#allocation5 + $0x5a]] }
 0x2e4   : > { %2552 = vrot.lane.b32.xlu0 %v2547_v37, %s4351_s23  ;;  %v2020_v37 = vadd.f32 %v5946_v40, %v1995_v44  ;;  %v1943_v1 = vadd.f32 %v7416_v31, %v1920_v48  ;;  %v1971_v56 = vadd.f32 %v7417_v5, %v1946_v34  ;;  %v2578_v50 = vsel %vm2108_vm6, %v2575_v23, %v2577_v41  ;;  %v7418_v44 = vld [vmem:[#allocation54_spill] sm:$0xff] }
 0x2e5   : > { %v6292_v42 = vpop.permute.xlu2 %2251  ;;  %v6294_v21 = vpop.permute.xlu1 %2193  ;;  %v2576_v53 = vsel %vm2108_vm6, %v2574_v20, %v2575_v23  ;;  %v2670_v47 = vmul.f32 %v6024_v63, %v2669_v26  ;;  %v6312_v33 = vmul.f32 %v5969_v29, %v2669_v26  ;;  %v1944_v6 = vadd.f32 %v7416_v31, %v1921_v39 }
 0x2e6   : > { %v6300_v30 = vadd.f32 %v6292_v42, %v2217_v60  ;;  %v6302_v45 = vpop.permute.xlu0 %2191  ;;  %v6318_v40 = vsel %vm2108_vm6, %v2111_v2, %v2115_v13  ;;  %v6323_v11 = vsel %vm2108_vm6, %v2146_v12, %v2150_v36  ;;  %v2043_v61 = vadd.f32 %v5998_v57, %v2020_v37 }
 0x2e7   : > { %v1968_v51 = vadd.f32 %v7418_v44, %v1943_v1  ;;  %v1970_v48 = vadd.f32 %v7417_v5, %v1945_v27  ;;  %v1994_v60 = vadd.f32 %v6054_v18, %v1971_v56  ;;  %v1969_v23 = vadd.f32 %v7418_v44, %v1944_v6  ;;  %v6366_v56 = vld [vmem:[#allocation4 + $0x38] sm:$0xff] }
 0x2e8   : > { %v6332_v41 = vmul.f32 %v5725_v43, %v6165_v16  ;;  %v6337_v13 = vmul.f32 %v5725_v43, %v2669_v26  ;;  %v2682_v34 = vrot.slane %v2670_v47, 5  ;;  %v2684_v36 = vrot.slane %v6312_v33, 5 }
 0x2e9   : > { %v1993_v57 = vadd.f32 %v6054_v18, %v1970_v48  ;;  %v2019_v7 = vadd.f32 %v6101_v38, %v1994_v60  ;;  %v2068_v39 = vadd.f32 %v6052_v49, %v2043_v61  ;;  %v6346_v37 = vmul.f32 %v6024_v63, %v6165_v16 }
 0x2ea   : > { %v6350_v31 = vmul.f32 %v5775_v17, %v6191_v25  ;;  %v2683_v5 = vrot.slane %v6337_v13, 5  ;;  %v1992_v33 = vadd.f32 %v6061_v24, %v1969_v23  ;;  %v2110_v61 = vrot.slane %v6332_v41, 4 }
 0x2eb   : > { %2583 = vrot.lane.b32.xlu2 %v2578_v50, %s4351_s23  ;;  %2581 = vrot.lane.b32.xlu1 %v2576_v53, %s4351_s23  ;;  %v2018_v1 = vadd.f32 %v6101_v38, %v1993_v57  ;;  %v2042_v49 = vadd.f32 %v6152_v9, %v2019_v7  ;;  %v2673_v50 = vmul.f32 %v6366_v56, %v2669_v26  ;;  %v6369_v53 = vld [vmem:[#allocation4 + $0x50] sm:$0xff] }
 0x2ec   : > { %2579 = vrot.lane.b32.xlu0 %v2574_v20, %s4351_s23  ;;  %v1991_v20 = vadd.f32 %v6061_v24, %v1968_v51  ;;  %v2675_v47 = vmul.f32 %v6369_v53, %v2669_v26  ;;  %v2674_v38 = vmul.f32 %v6263_v22, %v2669_v26  ;;  %v2109_v51 = vrot.slane %v6346_v37, 4 }
 0x2ed   : > { %v6352_v43 = vpop.permute.xlu2 %2297  ;;  %v2200_v18 = vpop.permute.xlu1 %2199  ;;  %v2041_v6 = vadd.f32 %v6152_v9, %v2018_v1  ;;  %v2067_v44 = vadd.f32 %v6203_v55, %v2042_v49  ;;  %v2145_v48 = vrot.slane %v6350_v31, 4  ;;  %v6382_v60 = vmul.f32 %v5823_v8, %v6191_v25 }
 0x2ee   : > { %v6359_v27 = vpop.permute.xlu0 %2197  ;;  %v6363_v16 = vsel %vm347_vm4, %v2200_v18, %v6201_v35  ;;  %v2685_v35 = vsel %vm2609_vm7, %v2682_v34, %v2684_v36  ;;  %v2091_v26 = vadd.f32 %v6099_v59, %v2068_v39  ;;  %v2016_v24 = vadd.f32 %v6113_v19, %v1991_v20 }
 0x2ef   : > { %v2017_v9 = vadd.f32 %v6113_v19, %v1992_v33  ;;  %v2066_v23 = vadd.f32 %v6203_v55, %v2041_v6  ;;  %v2090_v41 = vadd.f32 %v6250_v14, %v2067_v44  ;;  %v2686_v13 = vrot.slane %v2673_v50, 5 }
 0x2f0   : > { %v2690_v57 = vrot.slane %v2675_v47, 5  ;;  %v2688_v7 = vrot.slane %v2674_v38, 5  ;;  %v2039_v25 = vadd.f32 %v6158_v62, %v2016_v24  ;;  %v2114_v19 = vsel %vm2108_vm6, %v2110_v61, %v2113_v0 }
 0x2f1   : > { %v2040_v59 = vadd.f32 %v6158_v62, %v2017_v9  ;;  %v2089_v55 = vadd.f32 %v6250_v14, %v2066_v23  ;;  %v2112_v39 = vsel %vm2108_vm6, %v2109_v51, %v2111_v2  ;;  %v2149_v37 = vsel %vm2108_vm6, %v2145_v48, %v2148_v32  ;;  %v6440_v9 = vld [vmem:[#allocation4 + $0x98] sm:$0xff] }
 0x2f2   : > { %v2144_v62 = vrot.slane %v6382_v60, 4  ;;  %v2719_v0 = vstv %s6354_s3  ;;  %v2129_v14 = vadd.f32 %v6318_v40, %v2091_v26  ;;  %v2128_v20 = vadd.f32 %v2114_v19, %v2090_v41  ;;  %s6616_s3 = sld [smem:[#allocation5 + $0x2b]] }
 0x2f3   : > { %2696 = vrot.lane.b32.xlu2 %v2685_v35, %s4346_s15  ;;  %2694 = vrot.lane.b32.xlu1 %v2683_v5, %s4346_s15  ;;  %v2065_v58 = vadd.f32 %v6210_v15, %v2040_v59  ;;  %v2691_v32 = vsel %vm2609_vm7, %v2686_v13, %v2690_v57  ;;  %v2689_v49 = vsel %vm2609_vm7, %v2684_v36, %v2688_v7 }
 0x2f4   : > { %2692 = vrot.lane.b32.xlu0 %v2682_v34, %s4346_s15  ;;  %v2064_v34 = vadd.f32 %v6210_v15, %v2039_v25  ;;  %v2127_v47 = vadd.f32 %v2112_v39, %v2089_v55  ;;  %v2720_v40 = vmul.f32 %v5823_v8, %v2719_v0  ;;  %v2722_v38 = vmul.f32 %v5826_v52, %v2719_v0  ;;  %v6451_v25 = vld [vmem:[#allocation4 + $0xa8] sm:$0xff] }
 0x2f5   : > { %v6407_v18 = vpop.permute.xlu2 %2303  ;;  %v2244_v46 = vpop.permute.xlu1 %2243  ;;  %v2088_v50 = vadd.f32 %v6260_v10, %v2065_v58  ;;  %v2687_v33 = vsel %vm2609_vm7, %v2683_v5, %v2686_v13  ;;  %v2721_v6 = vmul.f32 %v5775_v17, %v2719_v0  ;;  %v2163_v35 = vadd.f32 %v2149_v37, %v2128_v20 }
 0x2f6   : > { %v2319_v2 = vadd.f32 %v6407_v18, %v6300_v30  ;;  %v2242_v28 = vpop.permute.xlu0 %2241  ;;  %v2087_v15 = vadd.f32 %v6260_v10, %v2064_v34  ;;  %v2147_v30 = vsel %vm2108_vm6, %v2144_v62, %v2146_v12  ;;  %v2204_v36 = vsel %vm347_vm4, %v6150_v4, %v6359_v27 }
 0x2f7   : > { %v2253_v1 = vsel %vm347_vm4, %v2242_v28, %v2244_v46  ;;  %v2164_v44 = vadd.f32 %v6323_v11, %v2129_v14  ;;  %v2126_v8 = vadd.f32 %v2110_v61, %v2088_v50  ;;  %v2162_v52 = vadd.f32 %v2147_v30, %v2127_v47 }
 0x2f8   : > { %v2732_v10 = vrot.slane %v2720_v40, 5  ;;  %v2734_v3 = vrot.slane %v2722_v38, 5  ;;  %v2125_v12 = vadd.f32 %v2109_v51, %v2087_v15  ;;  %v2215_v17 = vadd.f32 %v6359_v27, %v2163_v35  ;;  %v6470_v38 = vld [vmem:[#allocation4 + $0x20] sm:$0xff] }
 0x2f9   : > { %v2216_v5 = vadd.f32 %v6363_v16, %v2164_v44  ;;  %v2214_v11 = vadd.f32 %v2204_v36, %v2162_v52  ;;  %v2733_v61 = vrot.slane %v2721_v6, 5  ;;  %v2723_v23 = vmul.f32 %v6440_v9, %v2719_v0  ;;  %v6445_v16 = vld [vmem:[#allocation4 + $0xb0] sm:$0xff] }
 0x2fa   : > { %v2725_v13 = vmul.f32 %v6445_v16, %v2719_v0  ;;  %v2161_v57 = vadd.f32 %v2145_v48, %v2126_v8  ;;  %v2724_v59 = vmul.f32 %v6451_v25, %v2719_v0  ;;  %v2160_v19 = vadd.f32 %v2144_v62, %v2125_v12 }
 0x2fb   : > { %2702 = vrot.lane.b32.xlu2 %v2691_v32, %s4346_s15  ;;  %2700 = vrot.lane.b32.xlu1 %v2689_v49, %s4346_s15  ;;  %v2736_v31 = vrot.slane %v2723_v23, 5  ;;  %v2771_v58 = vstv %s3945_s6  ;;  %s3958_s6 = sld [smem:[#allocation5 + $0x5c]] }
 0x2fc   : > { %2698 = vrot.lane.b32.xlu0 %v2687_v33, %s4346_s15  ;;  %v2213_v55 = vadd.f32 %v6294_v21, %v2161_v57  ;;  %v2740_v48 = vrot.slane %v2725_v13, 5  ;;  %v2738_v14 = vrot.slane %v2724_v59, 5  ;;  %v2774_v47 = vmul.f32 %v5969_v29, %v2771_v58  ;;  %v6490_v57 = vld [vmem:[#allocation4 + $0x78] sm:$0xff] }
 0x2fd   : > { %v6436_v60 = vpop.permute.xlu2 %2347  ;;  %v2250_v4 = vpop.permute.xlu1 %2249  ;;  %v2737_v40 = vsel %vm2609_vm7, %v2733_v61, %v2736_v31  ;;  %v2775_v36 = vmul.f32 %v6366_v56, %v2771_v58 }
 0x2fe   : > { %v2248_v26 = vpop.permute.xlu0 %2247  ;;  %v2255_v24 = vsel %vm347_vm4, %v2250_v4, %v6292_v42  ;;  %v2735_v42 = vsel %vm2609_vm7, %v2732_v10, %v2734_v3  ;;  %v2263_v37 = vadd.f32 %v2244_v46, %v2213_v55  ;;  %v2741_v32 = vsel %vm2609_vm7, %v2736_v31, %v2740_v48 }
 0x2ff   : > { %v2254_v51 = vsel %vm347_vm4, %v6248_v54, %v2248_v26  ;;  %v2265_v27 = vadd.f32 %v2248_v26, %v2215_v17  ;;  %v2266_v41 = vadd.f32 %v2255_v24, %v2216_v5  ;;  %v2203_v54 = vsel %vm347_vm4, %v6302_v45, %v6294_v21 }
 0x300   : > { %v2264_v7 = vadd.f32 %v2254_v51, %v2214_v11  ;;  %v2212_v39 = vadd.f32 %v2203_v54, %v2160_v19  ;;  %v2739_v50 = vsel %vm2609_vm7, %v2734_v3, %v2738_v14  ;;  %v2772_v46 = vmul.f32 %v6024_v63, %v2771_v58  ;;  %v6497_v19 = vld [vmem:[#allocation4 + $0x80] sm:$0xff] }
 0x301   : > { %v2786_v15 = vrot.slane %v2774_v47, 5  ;;  %v2776_v17 = vmul.f32 %v6263_v22, %v2771_v58  ;;  %v2821_v26 = vstv %s3946_s25  ;;  %s3959_s25 = sld [smem:[#allocation5 + $0x2c]] }
 0x302   : > { %v2262_v28 = vadd.f32 %v2253_v1, %v2212_v39  ;;  %v2773_v1 = vmul.f32 %v6470_v38, %v2771_v58  ;;  %v2823_v55 = vmul.f32 %v6497_v19, %v2821_v26 }
 0x303   : > { %2746 = vrot.lane.b32.xlu2 %v2735_v42, %s4346_s15  ;;  %2744 = vrot.lane.b32.xlu1 %v2733_v61, %s4346_s15  ;;  %v2790_v4 = vrot.slane %v2776_v17, 5  ;;  %v6493_v42 = vld [vmem:[#allocation4 + $0x90] sm:$0xff] }
 0x304   : > { %2742 = vrot.lane.b32.xlu0 %v2732_v10, %s4346_s15  ;;  %v2785_v35 = vrot.slane %v2773_v1, 5  ;;  %v2777_v10 = vmul.f32 %v6369_v53, %v2771_v58  ;;  %v2824_v59 = vmul.f32 %v6493_v42, %v2821_v26 }
 0x305   : > { %v6461_v34 = vpop.permute.xlu2 %2353  ;;  %v2296_v0 = vpop.permute.xlu1 %2295  ;;  %v2791_v13 = vsel %vm2609_vm7, %v2786_v15, %v2790_v4 }
 0x306   : > { %v2369_v45 = vadd.f32 %v6461_v34, %v2319_v2  ;;  %v2294_v62 = vpop.permute.xlu0 %2293  ;;  %v2315_v21 = vadd.f32 %v2296_v0, %v2263_v37  ;;  %v2784_v2 = vrot.slane %v2772_v46, 5  ;;  %v2792_v5 = vrot.slane %v2777_v10, 5 }
 0x307   : > { %v2305_v20 = vsel %vm430_vm5, %v2294_v62, %v2296_v0  ;;  %v2836_v48 = vrot.slane %v2824_v59, 5  ;;  %v2826_v46 = vmul.f32 %v6451_v25, %v2821_v26 }
 0x308   : > { %v2314_v49 = vadd.f32 %v2305_v20, %v2262_v28  ;;  %v2787_v12 = vsel %vm2609_vm7, %v2784_v2, %v2786_v15  ;;  %v2835_v28 = vrot.slane %v2823_v55, 5 }
 0x30b   : > { %2752 = vrot.lane.b32.xlu2 %v2741_v32, %s4346_s15  ;;  %2750 = vrot.lane.b32.xlu1 %v2739_v50, %s4346_s15  ;;  %v2827_v32 = vmul.f32 %v6445_v16, %v2821_v26 }
 0x30c   : > { %2748 = vrot.lane.b32.xlu0 %v2737_v40, %s4346_s15 }
 0x30d   : > { %v2389_v30 = vpop.permute.xlu2 %2388  ;;  %v2302_v33 = vpop.permute.xlu1 %2301  ;;  %v2842_v1 = vrot.slane %v2827_v32, 5 }
 0x30e   : > { %v2398_v63 = vadd.f32 %v2389_v30, %v2369_v45  ;;  %v2300_v6 = vpop.permute.xlu0 %2299  ;;  %v2307_v29 = vsel %vm430_vm5, %v2302_v33, %v6407_v18  ;;  %v2788_v18 = vrot.slane %v2775_v36, 5  ;;  %v2825_v45 = vmul.f32 %v6440_v9, %v2821_v26 }
 0x30f   : > { %v2306_v44 = vsel %vm430_vm5, %v6352_v43, %v2300_v6  ;;  %v2317_v8 = vadd.f32 %v2300_v6, %v2265_v27  ;;  %v2318_v52 = vadd.f32 %v2307_v29, %v2266_v41 }
 0x310   : > { %v2316_v3 = vadd.f32 %v2306_v44, %v2264_v7  ;;  %v2793_v27 = vsel %vm2609_vm7, %v2788_v18, %v2792_v5  ;;  %v2822_v7 = vmul.f32 %v6490_v57, %v2821_v26  ;;  %v2789_v54 = vsel %vm2609_vm7, %v2785_v35, %v2788_v18 }
 0x311   : > { %v2838_v40 = vrot.slane %v2825_v45, 5 }
 0x312   : > { %v2834_v31 = vrot.slane %v2822_v7, 5 }
 0x313   : > { %2798 = vrot.lane.b32.xlu2 %v2787_v12, %s4347_s4  ;;  %2796 = vrot.lane.b32.xlu1 %v2785_v35, %s4347_s4  ;;  %v2839_v18 = vsel %vm2609_vm7, %v2835_v28, %v2838_v40 }
 0x314   : > { %2794 = vrot.lane.b32.xlu0 %v2784_v2, %s4347_s4  ;;  %v2837_v50 = vsel %vm2609_vm7, %v2834_v31, %v2836_v48 }
 0x315   : > { %v2416_v11 = vpop.permute.xlu2 %2415  ;;  %v2346_v43 = vpop.permute.xlu1 %2345 }
 0x316   : > { %v2425_v24 = vadd.f32 %v2416_v11, %v2398_v63  ;;  %v2344_v61 = vpop.permute.xlu0 %2343  ;;  %v2365_v23 = vadd.f32 %v2346_v43, %v2315_v21  ;;  %v2873_v63 = vstv %s3947_s29  ;;  %s3960_s29 = sld [smem:[#allocation5 + $0x5d]] }
 0x317   : > { %v2355_v51 = vsel %vm430_vm5, %v2344_v61, %v2346_v43  ;;  %v2876_v12 = vmul.f32 %v6369_v53, %v2873_v63  ;;  %v2874_v17 = vmul.f32 %v6470_v38, %v2873_v63  ;;  %v2900_v43 = vstv %s3948_s19  ;;  %s3962_s19 = sld [smem:[#allocation5 + $0x5e]] }
 0x318   : > { %v2364_v41 = vadd.f32 %v2355_v51, %v2314_v49  ;;  %v2902_v59 = vmul.f32 %v6440_v9, %v2900_v43 }
 0x319   : > { %v2883_v4 = vrot.slane %v2876_v12, 5 }
 0x31b   : > { %2804 = vrot.lane.b32.xlu2 %v2793_v27, %s4347_s4  ;;  %2802 = vrot.lane.b32.xlu1 %v2791_v13, %s4347_s4 }
 0x31c   : > { %2800 = vrot.lane.b32.xlu0 %v2789_v54, %s4347_s4  ;;  %v2903_v54 = vmul.f32 %v6445_v16, %v2900_v43 }
 0x31d   : > { %v2445_v39 = vpop.permute.xlu2 %2444  ;;  %v2352_v37 = vpop.permute.xlu1 %2351 }
 0x31e   : > { %v2454_v14 = vadd.f32 %v2445_v39, %v2425_v24  ;;  %v2350_v0 = vpop.permute.xlu0 %2349  ;;  %v2357_v58 = vsel %vm430_vm5, %v2352_v37, %v6461_v34  ;;  %v2910_v37 = vrot.slane %v2903_v54, 5 }
 0x31f   : > { %v2356_v62 = vsel %vm430_vm5, %v6436_v60, %v2350_v0  ;;  %v2367_v21 = vadd.f32 %v2350_v0, %v2317_v8  ;;  %v2368_v20 = vadd.f32 %v2357_v58, %v2318_v52  ;;  %v2840_v60 = vrot.slane %v2826_v46, 5 }
 0x320   : > { %v2366_v49 = vadd.f32 %v2356_v62, %v2316_v3  ;;  %v2843_v52 = vsel %vm2609_vm7, %v2838_v40, %v2842_v1  ;;  %v2875_v3 = vmul.f32 %v6366_v56, %v2873_v63 }
 0x321   : > { %v2397_v47 = vadd.f32 %v2389_v30, %v2368_v20  ;;  %v2841_v10 = vsel %vm2609_vm7, %v2836_v48, %v2840_v60  ;;  %v2901_v48 = vmul.f32 %v6497_v19, %v2900_v43 }
 0x322   : > { %v2881_v5 = vrot.slane %v2875_v3, 5 }
 0x323   : > { %2848 = vrot.lane.b32.xlu2 %v2837_v50, %s4347_s4  ;;  %2846 = vrot.lane.b32.xlu1 %v2835_v28, %s4347_s4  ;;  %v2424_v34 = vadd.f32 %v2416_v11, %v2397_v47  ;;  %v2880_v11 = vrot.slane %v2874_v17, 5  ;;  %v2929_v28 = vstv %s3949_s9  ;;  %s3963_s9 = sld [smem:[#allocation5 + $0x2e]] }
 0x324   : > { %2844 = vrot.lane.b32.xlu0 %v2834_v31, %s4347_s4  ;;  %v2884_v55 = vsel %vm2609_vm7, %v2881_v5, %v2883_v4  ;;  %v2932_v40 = vmul.f32 %v6369_v53, %v2929_v28  ;;  %v2930_v1 = vmul.f32 %v6470_v38, %v2929_v28 }
 0x325   : > { %v2472_v2 = vpop.permute.xlu2 %2471  ;;  %v2453_v15 = vadd.f32 %v2445_v39, %v2424_v34  ;;  %v2387_v33 = vpop.permute.xlu1 %2386  ;;  %v2882_v31 = vsel %vm2609_vm7, %v2880_v11, %v2881_v5  ;;  %v2908_v39 = vrot.slane %v2902_v59, 5  ;;  %v2931_v34 = vmul.f32 %v6366_v56, %v2929_v28 }
 0x326   : > { %v2481_v6 = vadd.f32 %v2472_v2, %v2454_v14  ;;  %v2385_v29 = vpop.permute.xlu0 %2384  ;;  %v2395_v35 = vadd.f32 %v2387_v33, %v2366_v49  ;;  %v2396_v36 = vadd.f32 %v2387_v33, %v2367_v21  ;;  %v2907_v14 = vrot.slane %v2901_v48, 5 }
 0x327   : > { %v2480_v30 = vadd.f32 %v2472_v2, %v2453_v15  ;;  %v2393_v44 = vadd.f32 %v2385_v29, %v2364_v41  ;;  %v2394_v8 = vadd.f32 %v2385_v29, %v2365_v23  ;;  %v2911_v46 = vsel %vm2609_vm7, %v2908_v39, %v2910_v37 }
 0x328   : > { %v2909_v47 = vsel %vm2609_vm7, %v2907_v14, %v2908_v39  ;;  %v2937_v60 = vrot.slane %v2931_v34, 5  ;;  %v2939_v2 = vrot.slane %v2932_v40, 5  ;;  %v2936_v15 = vrot.slane %v2930_v1, 5 }
 0x329   : > { %v2956_v33 = vstv %s3950_s22  ;;  %v6544_v5 = vstv %s3941_s26  ;;  %s3955_s22 = sld [smem:[#allocation5 + $0x2a]] }
 0x32a   : > { %v2959_v3 = vmul.f32 %v6445_v16, %v2956_v33  ;;  %v2940_v12 = vsel %vm2609_vm7, %v2937_v60, %v2939_v2  ;;  %v2938_v17 = vsel %vm2609_vm7, %v2936_v15, %v2937_v60  ;;  %s3965_s26 = sld [smem:[#allocation5 + $0x2f]] }
 0x32b   : > { %2854 = vrot.lane.b32.xlu2 %v2843_v52, %s4347_s4  ;;  %2852 = vrot.lane.b32.xlu1 %v2841_v10, %s4347_s4  ;;  %v2958_v10 = vmul.f32 %v6440_v9, %v2956_v33 }
 0x32c   : > { %2850 = vrot.lane.b32.xlu0 %v2839_v18, %s4347_s4  ;;  %v2957_v18 = vmul.f32 %v6497_v19, %v2956_v33 }
 0x32d   : > { %v2501_v26 = vpop.permute.xlu2 %2500  ;;  %v2414_v24 = vpop.permute.xlu1 %2413  ;;  %v2964_v4 = vrot.slane %v2958_v10, 5 }
 0x32e   : > { %v2509_v61 = vadd.f32 %v2501_v26, %v2480_v30  ;;  %v2510_v23 = vadd.f32 %v2501_v26, %v2481_v6  ;;  %v2412_v51 = vpop.permute.xlu0 %2411  ;;  %v2422_v27 = vadd.f32 %v2414_v24, %v2395_v35  ;;  %v2423_v41 = vadd.f32 %v2414_v24, %v2396_v36 }
 0x32f   : > { %v2420_v13 = vadd.f32 %v2412_v51, %v2393_v44  ;;  %v2421_v7 = vadd.f32 %v2412_v51, %v2394_v8  ;;  %v2963_v43 = vrot.slane %v2957_v18, 5  ;;  %v6551_v26 = vmul.f32 %v6366_v56, %v6544_v5 }
 0x330   : > { %v2602_v24 = vmul.f32 %v6369_v53, %v6544_v5  ;;  %v2985_v51 = vstv %s3951_s28  ;;  %v3041_v18 = vstv %s3953_s7  ;;  %s3967_s28 = sld [smem:[#allocation5 + $0x30]] }
 0x331   : > { %v2965_v39 = vsel %vm2609_vm7, %v2963_v43, %v2964_v4  ;;  %v2987_v37 = vmul.f32 %v6366_v56, %v2985_v51 }
 0x332   : > { %v2618_v28 = vrot.slane %v2602_v24, 5 }
 0x333   : > { %2889 = vrot.lane.b32.xlu2 %v2884_v55, %s4348_s21  ;;  %2887 = vrot.lane.b32.xlu1 %v2882_v31, %s4348_s21 }
 0x334   : > { %2885 = vrot.lane.b32.xlu0 %v2880_v11, %s4348_s21  ;;  %v2966_v11 = vrot.slane %v2959_v3, 5 }
 0x335   : > { %v2528_v0 = vpop.permute.xlu2 %2527  ;;  %v2443_v58 = vpop.permute.xlu1 %2442 }
 0x336   : > { %v2536_v45 = vadd.f32 %v2528_v0, %v2509_v61  ;;  %v2537_v62 = vadd.f32 %v2528_v0, %v2510_v23  ;;  %v2441_v21 = vpop.permute.xlu0 %2440  ;;  %v2451_v20 = vadd.f32 %v2443_v58, %v2422_v27  ;;  %v2452_v32 = vadd.f32 %v2443_v58, %v2423_v41 }
 0x337   : > { %v2449_v49 = vadd.f32 %v2441_v21, %v2420_v13  ;;  %v2450_v50 = vadd.f32 %v2441_v21, %v2421_v7  ;;  %v6555_v27 = vstv %s3942_s27  ;;  %v2967_v48 = vsel %vm2609_vm7, %v2964_v4, %v2966_v11  ;;  %s3956_s27 = sld [smem:[#allocation5 + $0x5b]] }
 0x338   : > { %v2986_v0 = vmul.f32 %v6470_v38, %v2985_v51  ;;  %v2614_v58 = vrot.slane %v6551_v26, 5  ;;  %v2993_v21 = vrot.slane %v2987_v37, 5 }
 0x33b   : > { %2916 = vrot.lane.b32.xlu2 %v2911_v46, %s4348_s21  ;;  %2914 = vrot.lane.b32.xlu1 %v2909_v47, %s4348_s21 }
 0x33c   : > { %2912 = vrot.lane.b32.xlu0 %v2907_v14, %s4348_s21  ;;  %v2988_v14 = vmul.f32 %v6369_v53, %v2985_v51 }
 0x33d   : > { %v2557_v63 = vpop.permute.xlu2 %2556  ;;  %v2470_v6 = vpop.permute.xlu1 %2469 }
 0x33e   : > { %v2565_v29 = vadd.f32 %v2557_v63, %v2536_v45  ;;  %v2566_v35 = vadd.f32 %v2557_v63, %v2537_v62  ;;  %v2468_v36 = vpop.permute.xlu0 %2467  ;;  %v2478_v30 = vadd.f32 %v2470_v6, %v2451_v20  ;;  %v2479_v44 = vadd.f32 %v2470_v6, %v2452_v32 }
 0x33f   : > { %v2476_v8 = vadd.f32 %v2468_v36, %v2449_v49  ;;  %v2477_v52 = vadd.f32 %v2468_v36, %v2450_v50  ;;  %v6567_v45 = vmul.f32 %v6440_v9, %v6555_v27  ;;  %v2638_v62 = vmul.f32 %v6445_v16, %v6555_v27 }
 0x340   : > { %v2995_v20 = vrot.slane %v2988_v14, 5  ;;  %v2992_v32 = vrot.slane %v2986_v0, 5  ;;  %v3012_v49 = vstv %s3952_s5  ;;  %v2619_v50 = vsel %vm2609_vm7, %v2614_v58, %v2618_v28 }
 0x341   : > { %v2649_v34 = vrot.slane %v6567_v45, 5  ;;  %v2653_v40 = vrot.slane %v2638_v62, 5  ;;  %v3014_v63 = vmul.f32 %v6440_v9, %v3012_v49  ;;  %v3015_v6 = vmul.f32 %v6445_v16, %v3012_v49 }
 0x342   : > { %v2994_v36 = vsel %vm2609_vm7, %v2992_v32, %v2993_v21  ;;  %v2634_v14 = vmul.f32 %v6497_v19, %v6555_v27 }
 0x343   : > { %2945 = vrot.lane.b32.xlu2 %v2940_v12, %s4349_s20  ;;  %2943 = vrot.lane.b32.xlu1 %v2938_v17, %s4349_s20 }
 0x344   : > { %2941 = vrot.lane.b32.xlu0 %v2936_v15, %s4349_s20 }
 0x345   : > { %v2584_v61 = vpop.permute.xlu2 %2583  ;;  %v2499_v23 = vpop.permute.xlu1 %2498 }
 0x346   : > { %v6557_v41 = vadd.f32 %v2584_v61, %v2565_v29  ;;  %v2593_v13 = vadd.f32 %v2584_v61, %v2566_v35  ;;  %v2497_v7 = vpop.permute.xlu0 %2496  ;;  %v2507_v59 = vadd.f32 %v2499_v23, %v2478_v30  ;;  %v2508_v54 = vadd.f32 %v2499_v23, %v2479_v44 }
 0x347   : > { %v2505_v55 = vadd.f32 %v2497_v7, %v2476_v8  ;;  %v2506_v31 = vadd.f32 %v2497_v7, %v2477_v52  ;;  %v2996_v35 = vsel %vm2609_vm7, %v2993_v21, %v2995_v20  ;;  %v3013_v30 = vmul.f32 %v6497_v19, %v3012_v49 }
 0x348   : > { %v2631_v29 = vadd.f32 %v2619_v50, %v2593_v13  ;;  %v2654_v44 = vsel %vm2609_vm7, %v2649_v34, %v2653_v40  ;;  %v3020_v8 = vrot.slane %v3014_v63, 5  ;;  %v3022_v52 = vrot.slane %v3015_v6, 5 }
 0x349   : > { %v3019_v3 = vrot.slane %v3013_v30, 5  ;;  %v3043_v7 = vmul.f32 %v6366_v56, %v3041_v18  ;;  %v3068_v21 = vstv %s3954_s12  ;;  %v2601_v20 = vmul.f32 %v6263_v22, %v6544_v5 }
 0x34a   : > { %v2666_v10 = vadd.f32 %v2654_v44, %v2631_v29  ;;  %v3023_v51 = vsel %vm2609_vm7, %v3020_v8, %v3022_v52  ;;  %v2646_v6 = vrot.slane %v2634_v14, 5  ;;  %v3070_v29 = vmul.f32 %v6440_v9, %v3068_v21 }
 0x34b   : > { %2972 = vrot.lane.b32.xlu2 %v2967_v48, %s4349_s20  ;;  %2970 = vrot.lane.b32.xlu1 %v2965_v39, %s4349_s20  ;;  %v3021_v13 = vsel %vm2609_vm7, %v3019_v3, %v3020_v8  ;;  %v2598_v48 = vmul.f32 %v6470_v38, %v6544_v5  ;;  %v6607_v39 = vld [vmem:[#allocation4 + $0x18] sm:$0xff]  ;;  %v3049_v0 = vrot.slane %v3043_v7, 5  ;;  %v3069_v30 = vmul.f32 %v6497_v19, %v3068_v21 }
 0x34c   : > { %2968 = vrot.lane.b32.xlu0 %v2963_v43, %s4349_s20  ;;  %v2597_v37 = vmul.f32 %v6607_v39, %v6544_v5  ;;  %v2616_v44 = vrot.slane %v2601_v20, 5  ;;  %v2635_v52 = vmul.f32 %v6493_v42, %v6555_v27 }
 0x34d   : > { %v6577_v46 = vpop.permute.xlu2 %2696  ;;  %v2526_v47 = vpop.permute.xlu1 %2525  ;;  %v2611_v50 = vrot.slane %v2598_v48, 5 }
 0x34e   : > { %v2524_v1 = vpop.permute.xlu0 %2523  ;;  %v2534_v60 = vadd.f32 %v2526_v47, %v2507_v59  ;;  %v2535_v2 = vadd.f32 %v2526_v47, %v2508_v54  ;;  %v3044_v59 = vmul.f32 %v6369_v53, %v3041_v18  ;;  %v3042_v54 = vmul.f32 %v6470_v38, %v3041_v18 }
 0x34f   : > { %v2532_v15 = vadd.f32 %v2524_v1, %v2505_v55  ;;  %v2533_v33 = vadd.f32 %v2524_v1, %v2506_v31  ;;  %v6601_v55 = vld [vmem:[#allocation4 + $0x30] sm:$0xff]  ;;  %v2610_v40 = vrot.slane %v2597_v37, 5  ;;  %v3076_v18 = vrot.slane %v3070_v29, 5 }
 0x350   : > { %v2599_v31 = vmul.f32 %v6601_v55, %v6544_v5  ;;  %v3051_v28 = vrot.slane %v3044_v59, 5  ;;  %v3048_v62 = vrot.slane %v3042_v54, 5  ;;  %v2647_v7 = vrot.slane %v2635_v52, 5 }
 0x351   : > { %v2615_v59 = vsel %vm2609_vm7, %v2611_v50, %v2614_v58 }
 0x352   : > { %v3050_v5 = vsel %vm2609_vm7, %v3048_v62, %v3049_v0 }
 0x353   : > { %3001 = vrot.lane.b32.xlu2 %v2996_v35, %s4350_s0  ;;  %2999 = vrot.lane.b32.xlu1 %v2994_v36, %s4350_s0  ;;  %v3052_v35 = vsel %vm2609_vm7, %v3049_v0, %v3051_v28  ;;  %v3071_v36 = vmul.f32 %v6445_v16, %v3068_v21 }
 0x354   : > { %2997 = vrot.lane.b32.xlu0 %v2992_v32, %s4350_s0  ;;  %v2612_v32 = vrot.slane %v2599_v31, 5 }
 0x355   : > { %v6591_v12 = vpop.permute.xlu2 %2702  ;;  %v2555_v17 = vpop.permute.xlu1 %2554 }
 0x356   : > { %v6594_v4 = vadd.f32 %v6591_v12, %v2666_v10  ;;  %v2553_v11 = vpop.permute.xlu0 %2552  ;;  %v2563_v43 = vadd.f32 %v2555_v17, %v2534_v60  ;;  %v2564_v24 = vadd.f32 %v2555_v17, %v2535_v2  ;;  %v2637_v10 = vmul.f32 %v6451_v25, %v6555_v27 }
 0x357   : > { %v2561_v61 = vadd.f32 %v2553_v11, %v2532_v15  ;;  %v2562_v23 = vadd.f32 %v2553_v11, %v2533_v33  ;;  %v2633_v15 = vmul.f32 %v6490_v57, %v6555_v27  ;;  %v2613_v14 = vsel %vm2609_vm7, %v2610_v40, %v2612_v32 }
 0x358   : > { %v2651_v27 = vrot.slane %v2637_v10, 5 }
 0x359   : > { %v2645_v17 = vrot.slane %v2633_v15, 5 }
 0x35b   : > { %3028 = vrot.lane.b32.xlu2 %v3023_v51, %s4350_s0  ;;  %3026 = vrot.lane.b32.xlu1 %v3021_v13, %s4350_s0 }
 0x35c   : > { %3024 = vrot.lane.b32.xlu0 %v3019_v3, %s4350_s0 }
 0x35d   : > { %v6620_v49 = vpop.permute.xlu2 %2746  ;;  %v2582_v47 = vpop.permute.xlu1 %2581 }
 0x35e   : > { %v2580_v1 = vpop.permute.xlu0 %2579  ;;  %v2590_v60 = vadd.f32 %v2582_v47, %v2563_v43  ;;  %v2591_v2 = vadd.f32 %v2582_v47, %v2564_v24  ;;  %v3078_v43 = vrot.slane %v3071_v36, 5  ;;  %v3075_v24 = vrot.slane %v3069_v30, 5 }
 0x35f   : > { %v2588_v33 = vadd.f32 %v2580_v1, %v2561_v61  ;;  %v2589_v63 = vadd.f32 %v2580_v1, %v2562_v23  ;;  %v3170_v61 = vstv %s6616_s3  ;;  %v2617_v23 = vsel %vm2609_vm7, %v2612_v32, %v2616_v44 }
 0x360   : > { %v3171_v28 = vmul.f32 %v6607_v39, %v3170_v61  ;;  %v3079_v20 = vsel %vm2609_vm7, %v3076_v18, %v3078_v43  ;;  %v3077_v26 = vsel %vm2609_vm7, %v3075_v24, %v3076_v18  ;;  %v2630_v58 = vadd.f32 %v2617_v23, %v6557_v41 }
 0x361   : > { %v2627_v8 = vadd.f32 %v2611_v50, %v2589_v63  ;;  %v2626_v3 = vadd.f32 %v2610_v40, %v2588_v33  ;;  %v2629_v50 = vadd.f32 %v2615_v59, %v2591_v2  ;;  %v2650_v47 = vsel %vm2609_vm7, %v2646_v6, %v2649_v34 }
 0x362   : > { %v2652_v32 = vsel %vm2609_vm7, %v2647_v7, %v2651_v27  ;;  %v3172_v40 = vmul.f32 %v6470_v38, %v3170_v61  ;;  %v2648_v1 = vsel %vm2609_vm7, %v2645_v17, %v2647_v7  ;;  %v3183_v15 = vrot.slane %v3171_v28, 6 }
 0x363   : > { %3057 = vrot.lane.b32.xlu2 %v3052_v35, %s4351_s23  ;;  %3055 = vrot.lane.b32.xlu1 %v3050_v5, %s4351_s23  ;;  %v2662_v11 = vadd.f32 %v2646_v6, %v2627_v8  ;;  %v2661_v48 = vadd.f32 %v2645_v17, %v2626_v3  ;;  %v2664_v45 = vadd.f32 %v2650_v47, %v2629_v50  ;;  %v3220_v17 = vstv %s3958_s6 }
 0x364   : > { %3053 = vrot.lane.b32.xlu0 %v3048_v62, %s4351_s23  ;;  %v3173_v62 = vmul.f32 %v6601_v55, %v3170_v61  ;;  %v2665_v34 = vadd.f32 %v2652_v32, %v2630_v58  ;;  %v3184_v29 = vrot.slane %v3172_v40, 6  ;;  %v3174_v8 = vmul.f32 %v6366_v56, %v3170_v61 }
 0x365   : > { %v6638_v51 = vpop.permute.xlu2 %2752  ;;  %v2695_v13 = vpop.permute.xlu1 %2694  ;;  %v3176_v52 = vmul.f32 %v6369_v53, %v3170_v61  ;;  %v3175_v10 = vmul.f32 %v6263_v22, %v3170_v61  ;;  %v3221_v22 = vmul.f32 %v6490_v57, %v3220_v17  ;;  %v3223_v61 = vmul.f32 %v6493_v42, %v3220_v17 }
 0x366   : > { %v2768_v54 = vadd.f32 %v6638_v51, %v6594_v4  ;;  %v2693_v31 = vpop.permute.xlu0 %2692  ;;  %v2714_v37 = vadd.f32 %v2695_v13, %v2662_v11  ;;  %v2628_v4 = vadd.f32 %v2613_v14, %v2590_v60  ;;  %v3185_v33 = vrot.slane %v3173_v62, 6 }
 0x367   : > { %v2704_v0 = vsel %vm347_vm4, %v2693_v31, %v2695_v13  ;;  %v3191_v3 = vrot.slane %v3176_v52, 6  ;;  %v3224_v47 = vmul.f32 %v6440_v9, %v3220_v17  ;;  %v3226_v32 = vmul.f32 %v6445_v16, %v3220_v17 }
 0x368   : > { %v2713_v21 = vadd.f32 %v2704_v0, %v2661_v48  ;;  %v2663_v63 = vadd.f32 %v2648_v1, %v2628_v4  ;;  %v3186_v30 = vsel %vm3110_vm8, %v3183_v15, %v3185_v33  ;;  %v3222_v48 = vmul.f32 %v6497_v19, %v3220_v17 }
 0x369   : > { %v3225_v40 = vmul.f32 %v6451_v25, %v3220_v17  ;;  %v3241_v1 = vrot.slane %v3226_v32, 6 }
 0x36b   : > { %3084 = vrot.lane.b32.xlu2 %v3079_v20, %s4351_s23  ;;  %3082 = vrot.lane.b32.xlu1 %v3077_v26, %s4351_s23 }
 0x36c   : > { %3080 = vrot.lane.b32.xlu0 %v3075_v24, %s4351_s23 }
 0x36d   : > { %v6661_v41 = vpop.permute.xlu2 %2798  ;;  %v2701_v60 = vpop.permute.xlu1 %2700 }
 0x36e   : > { %v2699_v2 = vpop.permute.xlu0 %2698  ;;  %v2706_v6 = vsel %vm347_vm4, %v2701_v60, %v6591_v12  ;;  %v3187_v12 = vrot.slane %v3174_v8, 6 }
 0x36f   : > { %v2705_v35 = vsel %vm347_vm4, %v6577_v46, %v2699_v2  ;;  %v2716_v5 = vadd.f32 %v2699_v2, %v2664_v45  ;;  %v2717_v36 = vadd.f32 %v2706_v6, %v2665_v34  ;;  %v3189_v46 = vrot.slane %v3175_v10, 6 }
 0x370   : > { %v2715_v44 = vadd.f32 %v2705_v35, %v2663_v63  ;;  %v3192_v27 = vsel %vm3110_vm8, %v3187_v12, %v3191_v3  ;;  %v3188_v31 = vsel %vm3110_vm8, %v3184_v29, %v3187_v12 }
 0x371   : > { %v3190_v59 = vsel %vm3110_vm8, %v3185_v33, %v3189_v46 }
 0x373   : > { %3197 = vrot.lane.b32.xlu2 %v3186_v30, %s4346_s15  ;;  %3195 = vrot.lane.b32.xlu1 %v3184_v29, %s4346_s15 }
 0x374   : > { %3193 = vrot.lane.b32.xlu0 %v3183_v15, %s4346_s15  ;;  %v3272_v15 = vstv %s3959_s25 }
 0x375   : > { %v6674_v18 = vpop.permute.xlu2 %2804  ;;  %v2745_v11 = vpop.permute.xlu1 %2744  ;;  %v3273_v6 = vmul.f32 %v6607_v39, %v3272_v15  ;;  %v3275_v29 = vmul.f32 %v6601_v55, %v3272_v15 }
 0x376   : > { %v2820_v43 = vadd.f32 %v6674_v18, %v2768_v54  ;;  %v2743_v24 = vpop.permute.xlu0 %2742  ;;  %v2764_v23 = vadd.f32 %v2745_v11, %v2714_v37  ;;  %v3233_v54 = vrot.slane %v3221_v22, 6  ;;  %v3235_v37 = vrot.slane %v3223_v61, 6 }
 0x377   : > { %v2754_v13 = vsel %vm347_vm4, %v2743_v24, %v2745_v11  ;;  %v3285_v8 = vrot.slane %v3273_v6, 6  ;;  %v3287_v52 = vrot.slane %v3275_v29, 6  ;;  %v3276_v61 = vmul.f32 %v6366_v56, %v3272_v15 }
 0x378   : > { %v2763_v7 = vadd.f32 %v2754_v13, %v2713_v21  ;;  %v3234_v21 = vrot.slane %v3222_v48, 6  ;;  %v3236_v50 = vsel %vm3110_vm8, %v3233_v54, %v3235_v37  ;;  %v3322_v48 = vstv %s3960_s29 }
 0x379   : > { %v3288_v13 = vsel %vm3110_vm8, %v3285_v8, %v3287_v52  ;;  %v3328_v6 = vmul.f32 %v6445_v16, %v3322_v48  ;;  %v3327_v29 = vmul.f32 %v6451_v25, %v3322_v48 }
 0x37b   : > { %3203 = vrot.lane.b32.xlu2 %v3192_v27, %s4346_s15  ;;  %3201 = vrot.lane.b32.xlu1 %v3190_v59, %s4346_s15  ;;  %v6720_v27 = vld [vmem:[#allocation4 + $0x48] sm:$0xff] }
 0x37c   : > { %3199 = vrot.lane.b32.xlu0 %v3188_v31, %s4346_s15  ;;  %v3277_v59 = vmul.f32 %v6720_v27, %v3272_v15 }
 0x37d   : > { %v6687_v14 = vpop.permute.xlu2 %2848  ;;  %v2751_v0 = vpop.permute.xlu1 %2750 }
 0x37e   : > { %v2749_v28 = vpop.permute.xlu0 %2748  ;;  %v2756_v62 = vsel %vm347_vm4, %v2751_v0, %v6638_v51  ;;  %v3237_v51 = vrot.slane %v3224_v47, 6  ;;  %v3291_v31 = vrot.slane %v3277_v59, 6 }
 0x37f   : > { %v2755_v20 = vsel %vm347_vm4, %v6620_v49, %v2749_v28  ;;  %v2766_v26 = vadd.f32 %v2749_v28, %v2716_v5  ;;  %v2767_v58 = vadd.f32 %v2756_v62, %v2717_v36  ;;  %v3239_v49 = vrot.slane %v3225_v40, 6 }
 0x380   : > { %v2765_v4 = vadd.f32 %v2755_v20, %v2715_v44  ;;  %v3242_v5 = vsel %vm3110_vm8, %v3237_v51, %v3241_v1  ;;  %v3238_v30 = vsel %vm3110_vm8, %v3234_v21, %v3237_v51  ;;  %v3274_v44 = vmul.f32 %v6470_v38, %v3272_v15 }
 0x381   : > { %v3240_v36 = vsel %vm3110_vm8, %v3235_v37, %v3239_v49  ;;  %v3323_v62 = vmul.f32 %v6490_v57, %v3322_v48 }
 0x382   : > { %v3286_v11 = vrot.slane %v3274_v44, 6 }
 0x383   : > { %3247 = vrot.lane.b32.xlu2 %v3236_v50, %s4346_s15  ;;  %3245 = vrot.lane.b32.xlu1 %v3234_v21, %s4346_s15  ;;  %v3325_v21 = vmul.f32 %v6493_v42, %v3322_v48  ;;  %v3335_v47 = vrot.slane %v3323_v62, 6 }
 0x384   : > { %3243 = vrot.lane.b32.xlu0 %v3233_v54, %s4346_s15 }
 0x385   : > { %v6700_v33 = vpop.permute.xlu2 %2854  ;;  %v2797_v45 = vpop.permute.xlu1 %2796  ;;  %v3337_v32 = vrot.slane %v3325_v21, 6 }
 0x386   : > { %v2870_v34 = vadd.f32 %v6700_v33, %v2820_v43  ;;  %v2795_v60 = vpop.permute.xlu0 %2794  ;;  %v2816_v2 = vadd.f32 %v2797_v45, %v2764_v23 }
 0x387   : > { %v2806_v63 = vsel %vm430_vm5, %v2795_v60, %v2797_v45  ;;  %v3338_v60 = vsel %vm3110_vm8, %v3335_v47, %v3337_v32 }
 0x388   : > { %v2815_v35 = vadd.f32 %v2806_v63, %v2763_v7  ;;  %v3278_v7 = vmul.f32 %v6369_v53, %v3272_v15  ;;  %v3326_v63 = vmul.f32 %v6440_v9, %v3322_v48 }
 0x38b   : > { %3253 = vrot.lane.b32.xlu2 %v3242_v5, %s4346_s15  ;;  %3251 = vrot.lane.b32.xlu1 %v3240_v36, %s4346_s15  ;;  %v3343_v36 = vrot.slane %v3328_v6, 6 }
 0x38c   : > { %3249 = vrot.lane.b32.xlu0 %v3238_v30, %s4346_s15  ;;  %s3961_s15 = sld [smem:[#allocation5 + $0x2d]]  ;;  %v3341_v30 = vrot.slane %v3327_v29, 6 }
 0x38d   : > { %v2890_v10 = vpop.permute.xlu2 %2889  ;;  %v2803_v12 = vpop.permute.xlu1 %2802 }
 0x38e   : > { %v2899_v3 = vadd.f32 %v2890_v10, %v2870_v34  ;;  %v2801_v46 = vpop.permute.xlu0 %2800  ;;  %v2808_v17 = vsel %vm430_vm5, %v2803_v12, %v6674_v18  ;;  %v3293_v18 = vrot.slane %v3278_v7, 6 }
 0x38f   : > { %v2807_v43 = vsel %vm430_vm5, %v6661_v41, %v2801_v46  ;;  %v2818_v24 = vadd.f32 %v2801_v46, %v2766_v26  ;;  %v2819_v23 = vadd.f32 %v2808_v17, %v2767_v58  ;;  %v3289_v41 = vrot.slane %v3276_v61, 6 }
 0x390   : > { %v2817_v22 = vadd.f32 %v2807_v43, %v2765_v4  ;;  %v3292_v58 = vsel %vm3110_vm8, %v3287_v52, %v3291_v31  ;;  %v3324_v4 = vmul.f32 %v6497_v19, %v3322_v48  ;;  %v6750_v43 = vld [vmem:[#allocation4 + $0x50] sm:$0xff]  ;;  %v3401_v48 = vstv %s3962_s19 }
 0x391   : > { %v3294_v26 = vsel %vm3110_vm8, %v3289_v41, %v3293_v18  ;;  %v3290_v50 = vsel %vm3110_vm8, %v3286_v11, %v3289_v41 }
 0x392   : > { %v3336_v49 = vrot.slane %v3324_v4, 6  ;;  %v3374_v5 = vstv %s3961_s15 }
 0x393   : > { %3299 = vrot.lane.b32.xlu2 %v3288_v13, %s4347_s4  ;;  %3297 = vrot.lane.b32.xlu1 %v3286_v11, %s4347_s4  ;;  %v3342_v13 = vsel %vm3110_vm8, %v3337_v32, %v3341_v30 }
 0x394   : > { %3295 = vrot.lane.b32.xlu0 %v3285_v8, %s4347_s4 }
 0x395   : > { %v2917_v54 = vpop.permute.xlu2 %2916  ;;  %v2847_v37 = vpop.permute.xlu1 %2846 }
 0x396   : > { %v2926_v0 = vadd.f32 %v2917_v54, %v2899_v3  ;;  %v2845_v56 = vpop.permute.xlu0 %2844  ;;  %v2866_v28 = vadd.f32 %v2847_v37, %v2816_v2 }
 0x397   : > { %v2856_v53 = vsel %vm430_vm5, %v2845_v56, %v2847_v37 }
 0x398   : > { %v2865_v20 = vadd.f32 %v2856_v53, %v2815_v35 }
 0x39b   : > { %3305 = vrot.lane.b32.xlu2 %v3294_v26, %s4347_s4  ;;  %3303 = vrot.lane.b32.xlu1 %v3292_v58, %s4347_s4  ;;  %v6762_v26 = vld [vmem:[#allocation4 + $0x98] sm:$0xff] }
 0x39c   : > { %3301 = vrot.lane.b32.xlu0 %v3290_v50, %s4347_s4  ;;  %v3403_v58 = vmul.f32 %v6762_v26, %v3401_v48  ;;  %v6765_v50 = vld [vmem:[#allocation4 + $0xb0] sm:$0xff] }
 0x39d   : > { %v2946_v57 = vpop.permute.xlu2 %2945  ;;  %v2853_v42 = vpop.permute.xlu1 %2852  ;;  %v3404_v4 = vmul.f32 %v6765_v50, %v3401_v48 }
 0x39e   : > { %v2955_v40 = vadd.f32 %v2946_v57, %v2926_v0  ;;  %v2851_v51 = vpop.permute.xlu0 %2850  ;;  %v2858_v1 = vsel %vm430_vm5, %v2853_v42, %v6700_v33  ;;  %v3409_v32 = vrot.slane %v3403_v58, 6 }
 0x39f   : > { %v2857_v15 = vsel %vm430_vm5, %v6687_v14, %v2851_v51  ;;  %v2868_v45 = vadd.f32 %v2851_v51, %v2818_v24  ;;  %v2869_v34 = vadd.f32 %v2858_v1, %v2819_v23  ;;  %v3339_v14 = vrot.slane %v3326_v63, 6 }
 0x3a0   : > { %v2867_v2 = vadd.f32 %v2857_v15, %v2817_v22  ;;  %v3377_v24 = vmul.f32 %v6750_v43, %v3374_v5  ;;  %v3375_v22 = vmul.f32 %v6470_v38, %v3374_v5 }
 0x3a1   : > { %v2898_v35 = vadd.f32 %v2890_v10, %v2869_v34  ;;  %v6747_v10 = vld [vmem:[#allocation4 + $0x38] sm:$0xff]  ;;  %v3344_v23 = vsel %vm3110_vm8, %v3339_v14, %v3343_v36  ;;  %v3340_v61 = vsel %vm3110_vm8, %v3336_v49, %v3339_v14 }
 0x3a2   : > { %v3376_v3 = vmul.f32 %v6747_v10, %v3374_v5  ;;  %v3384_v59 = vrot.slane %v3377_v24, 6  ;;  %v3381_v41 = vrot.slane %v3375_v22, 6  ;;  %v6785_v22 = vstv %s3955_s22 }
 0x3a3   : > { %3349 = vrot.lane.b32.xlu2 %v3338_v60, %s4347_s4  ;;  %3347 = vrot.lane.b32.xlu1 %v3336_v49, %s4347_s4  ;;  %v2925_v33 = vadd.f32 %v2917_v54, %v2898_v35 }
 0x3a4   : > { %3345 = vrot.lane.b32.xlu0 %v3335_v47, %s4347_s4  ;;  %v3382_v7 = vrot.slane %v3376_v3, 6  ;;  %v3402_v47 = vmul.f32 %v6497_v19, %v3401_v48 }
 0x3a5   : > { %v2973_v44 = vpop.permute.xlu2 %2972  ;;  %v2954_v8 = vadd.f32 %v2946_v57, %v2925_v33  ;;  %v2888_v52 = vpop.permute.xlu1 %2887  ;;  %v3411_v57 = vrot.slane %v3404_v4, 6 }
 0x3a6   : > { %v2982_v9 = vadd.f32 %v2973_v44, %v2955_v40  ;;  %v2886_v16 = vpop.permute.xlu0 %2885  ;;  %v2896_v12 = vadd.f32 %v2888_v52, %v2867_v2  ;;  %v2897_v25 = vadd.f32 %v2888_v52, %v2868_v45  ;;  %v3385_v21 = vsel %vm3110_vm8, %v3382_v7, %v3384_v59 }
 0x3a7   : > { %v2981_v46 = vadd.f32 %v2973_v44, %v2954_v8  ;;  %v2894_v17 = vadd.f32 %v2886_v16, %v2865_v20  ;;  %v2895_v11 = vadd.f32 %v2886_v16, %v2866_v28  ;;  %v3383_v20 = vsel %vm3110_vm8, %v3381_v41, %v3382_v7 }
 0x3a8   : > { %v3408_v42 = vrot.slane %v3402_v47, 6  ;;  %v3430_v40 = vstv %s3963_s9  ;;  %v3412_v35 = vsel %vm3110_vm8, %v3409_v32, %v3411_v57 }
 0x3a9   : > { %v3432_v6 = vmul.f32 %v6747_v10, %v3430_v40  ;;  %v3433_v29 = vmul.f32 %v6750_v43, %v3430_v40  ;;  %v3431_v5 = vmul.f32 %v6470_v38, %v3430_v40 }
 0x3aa   : > { %v3410_v33 = vsel %vm3110_vm8, %v3408_v42, %v3409_v32  ;;  %v4164_v32 = vld [vmem:[#allocation4 + $0x20] sm:$0xff] }
 0x3ab   : > { %3355 = vrot.lane.b32.xlu2 %v3344_v23, %s4347_s4  ;;  %3353 = vrot.lane.b32.xlu1 %v3342_v13, %s4347_s4  ;;  %v3438_v14 = vrot.slane %v3432_v6, 6  ;;  %v3440_v36 = vrot.slane %v3433_v29, 6  ;;  %v3437_v30 = vrot.slane %v3431_v5, 6 }
 0x3ac   : > { %3351 = vrot.lane.b32.xlu0 %v3340_v61, %s4347_s4  ;;  %s3964_s4 = sld [smem:[#allocation5 + $0x5f]] }
 0x3ad   : > { %v3002_v18 = vpop.permute.xlu2 %3001  ;;  %v2915_v31 = vpop.permute.xlu1 %2914 }
 0x3ae   : > { %v3010_v54 = vadd.f32 %v3002_v18, %v2981_v46  ;;  %v3011_v37 = vadd.f32 %v3002_v18, %v2982_v9  ;;  %v2913_v0 = vpop.permute.xlu0 %2912  ;;  %v2923_v56 = vadd.f32 %v2915_v31, %v2896_v12  ;;  %v2924_v28 = vadd.f32 %v2915_v31, %v2897_v25 }
 0x3af   : > { %v2921_v53 = vadd.f32 %v2913_v0, %v2894_v17  ;;  %v2922_v62 = vadd.f32 %v2913_v0, %v2895_v11  ;;  %v3441_v17 = vsel %vm3110_vm8, %v3438_v14, %v3440_v36  ;;  %v3439_v11 = vsel %vm3110_vm8, %v3437_v30, %v3438_v14 }
 0x3b0   : > { %v6792_v18 = vmul.f32 %v6747_v10, %v6785_v22 }
 0x3b2   : > { %v3457_v52 = vstv %s3964_s4 }
 0x3b3   : > { %3390 = vrot.lane.b32.xlu2 %v3385_v21, %s4348_s21  ;;  %3388 = vrot.lane.b32.xlu1 %v3383_v20, %s4348_s21  ;;  %v3459_v24 = vmul.f32 %v6762_v26, %v3457_v52  ;;  %v3460_v23 = vmul.f32 %v6765_v50, %v3457_v52  ;;  %v3458_v13 = vmul.f32 %v6497_v19, %v3457_v52 }
 0x3b4   : > { %3386 = vrot.lane.b32.xlu0 %v3381_v41, %s4348_s21  ;;  %v3486_v41 = vstv %s3965_s26  ;;  %v3103_v19 = vmul.f32 %v6750_v43, %v6785_v22 }
 0x3b5   : > { %v3029_v51 = vpop.permute.xlu2 %3028  ;;  %v2944_v1 = vpop.permute.xlu1 %2943  ;;  %v3465_v61 = vrot.slane %v3459_v24, 6  ;;  %v3467_v7 = vrot.slane %v3460_v23, 6  ;;  %v3464_v59 = vrot.slane %v3458_v13, 6  ;;  %v3488_v20 = vmul.f32 %v6747_v10, %v3486_v41 }
 0x3b6   : > { %v3037_v49 = vadd.f32 %v3029_v51, %v3010_v54  ;;  %v3038_v15 = vadd.f32 %v3029_v51, %v3011_v37  ;;  %v2942_v45 = vpop.permute.xlu0 %2941  ;;  %v2952_v34 = vadd.f32 %v2944_v1, %v2923_v56  ;;  %v2953_v60 = vadd.f32 %v2944_v1, %v2924_v28 }
 0x3b7   : > { %v2950_v2 = vadd.f32 %v2942_v45, %v2921_v53  ;;  %v2951_v63 = vadd.f32 %v2942_v45, %v2922_v62  ;;  %v6796_v54 = vstv %s3956_s27  ;;  %v3489_v58 = vmul.f32 %v6750_v43, %v3486_v41 }
 0x3b8   : > { %v3468_v4 = vsel %vm3110_vm8, %v3465_v61, %v3467_v7  ;;  %v3466_v47 = vsel %vm3110_vm8, %v3464_v59, %v3465_v61  ;;  %v3487_v57 = vmul.f32 %v4164_v32, %v3486_v41  ;;  %v3119_v40 = vrot.slane %v3103_v19, 6 }
 0x3b9   : > { %v6807_v51 = vmul.f32 %v6762_v26, %v6796_v54  ;;  %v3139_v1 = vmul.f32 %v6765_v50, %v6796_v54 }
 0x3ba   : > { %v3493_v45 = vrot.slane %v3487_v57, 6 }
 0x3bb   : > { %3417 = vrot.lane.b32.xlu2 %v3412_v35, %s4348_s21  ;;  %3415 = vrot.lane.b32.xlu1 %v3410_v33, %s4348_s21  ;;  %v3150_v6 = vrot.slane %v6807_v51, 6  ;;  %v3154_v29 = vrot.slane %v3139_v1, 6 }
 0x3bc   : > { %3413 = vrot.lane.b32.xlu0 %v3408_v42, %s4348_s21  ;;  %s3966_s21 = sld [smem:[#allocation5 + $0x60]]  ;;  %v3115_v42 = vrot.slane %v6792_v18, 6 }
 0x3bd   : > { %v3058_v44 = vpop.permute.xlu2 %3057  ;;  %v2971_v8 = vpop.permute.xlu1 %2970 }
 0x3be   : > { %v3066_v9 = vadd.f32 %v3058_v44, %v3037_v49  ;;  %v3067_v16 = vadd.f32 %v3058_v44, %v3038_v15  ;;  %v2969_v12 = vpop.permute.xlu0 %2968  ;;  %v2979_v25 = vadd.f32 %v2971_v8, %v2952_v34  ;;  %v2980_v38 = vadd.f32 %v2971_v8, %v2953_v60 }
 0x3bf   : > { %v2977_v3 = vadd.f32 %v2969_v12, %v2950_v2  ;;  %v2978_v46 = vadd.f32 %v2969_v12, %v2951_v63  ;;  %v3494_v49 = vrot.slane %v3488_v20, 6  ;;  %v3496_v15 = vrot.slane %v3489_v58, 6 }
 0x3c0   : > { %v3120_v60 = vsel %vm3110_vm8, %v3115_v42, %v3119_v40 }
 0x3c1   : > { %v3495_v52 = vsel %vm3110_vm8, %v3493_v45, %v3494_v49 }
 0x3c2   : > { %v3513_v34 = vstv %s3966_s21 }
 0x3c3   : > { %3446 = vrot.lane.b32.xlu2 %v3441_v17, %s4349_s20  ;;  %3444 = vrot.lane.b32.xlu1 %v3439_v11, %s4349_s20  ;;  %v3515_v44 = vmul.f32 %v6762_v26, %v3513_v34  ;;  %v3542_v11 = vstv %s3967_s28 }
 0x3c4   : > { %3442 = vrot.lane.b32.xlu0 %v3437_v30, %s4349_s20  ;;  %v3497_v30 = vsel %vm3110_vm8, %v3494_v49, %v3496_v15 }
 0x3c5   : > { %v3085_v31 = vpop.permute.xlu2 %3084  ;;  %v3000_v48 = vpop.permute.xlu1 %2999 }
 0x3c6   : > { %v6798_v37 = vadd.f32 %v3085_v31, %v3066_v9  ;;  %v3094_v0 = vadd.f32 %v3085_v31, %v3067_v16  ;;  %v2998_v56 = vpop.permute.xlu0 %2997  ;;  %v3008_v28 = vadd.f32 %v3000_v48, %v2979_v25  ;;  %v3009_v53 = vadd.f32 %v3000_v48, %v2980_v38  ;;  %v4165_v16 = vld [vmem:[#allocation4 + $0x80] sm:$0xff] }
 0x3c7   : > { %v3006_v62 = vadd.f32 %v2998_v56, %v2977_v3  ;;  %v3007_v21 = vadd.f32 %v2998_v56, %v2978_v46  ;;  %v3516_v9 = vmul.f32 %v6765_v50, %v3513_v34  ;;  %v3514_v12 = vmul.f32 %v4165_v16, %v3513_v34 }
 0x3c8   : > { %v3132_v8 = vadd.f32 %v3120_v60, %v3094_v0  ;;  %v3155_v25 = vsel %vm3110_vm8, %v3150_v6, %v3154_v29  ;;  %v3521_v38 = vrot.slane %v3515_v44, 6  ;;  %v3544_v31 = vmul.f32 %v6747_v10, %v3542_v11 }
 0x3c9   : > { %v3523_v46 = vrot.slane %v3516_v9, 6  ;;  %v3520_v17 = vrot.slane %v3514_v12, 6  ;;  %v3545_v48 = vmul.f32 %v6750_v43, %v3542_v11  ;;  %v3135_v43 = vmul.f32 %v4165_v16, %v6796_v54 }
 0x3ca   : > { %v3167_v3 = vadd.f32 %v3155_v25, %v3132_v8  ;;  %v3550_v10 = vrot.slane %v3544_v31, 6  ;;  %v4168_v8 = vld [vmem:[#allocation4 + $0xa8] sm:$0xff] }
 0x3cb   : > { %3473 = vrot.lane.b32.xlu2 %v3468_v4, %s4349_s20  ;;  %3471 = vrot.lane.b32.xlu1 %v3466_v47, %s4349_s20  ;;  %v3524_v0 = vsel %vm3110_vm8, %v3521_v38, %v3523_v46  ;;  %v3522_v56 = vsel %vm3110_vm8, %v3520_v17, %v3521_v38  ;;  %v3552_v20 = vrot.slane %v3545_v48, 6  ;;  %v3102_v4 = vmul.f32 %v6720_v27, %v6785_v22 }
 0x3cc   : > { %3469 = vrot.lane.b32.xlu0 %v3464_v59, %s4349_s20  ;;  %s3968_s20 = sld [smem:[#allocation5 + $0x61]] }
 0x3cd   : > { %v6817_v2 = vpop.permute.xlu2 %3197  ;;  %v3027_v63 = vpop.permute.xlu1 %3026  ;;  %v3553_v29 = vsel %vm3110_vm8, %v3550_v10, %v3552_v20 }
 0x3ce   : > { %v3025_v35 = vpop.permute.xlu0 %3024  ;;  %v3035_v33 = vadd.f32 %v3027_v63, %v3008_v28  ;;  %v3036_v5 = vadd.f32 %v3027_v63, %v3009_v53  ;;  %v3543_v28 = vmul.f32 %v4164_v32, %v3542_v11  ;;  %v3100_v53 = vmul.f32 %v6601_v55, %v6785_v22 }
 0x3cf   : > { %v3033_v14 = vadd.f32 %v3025_v35, %v3006_v62  ;;  %v3034_v36 = vadd.f32 %v3025_v35, %v3007_v21  ;;  %v3099_v62 = vmul.f32 %v4164_v32, %v6785_v22  ;;  %v3098_v21 = vmul.f32 %v6607_v39, %v6785_v22 }
 0x3d0   : > { %v3549_v58 = vrot.slane %v3543_v28, 6  ;;  %v3113_v55 = vrot.slane %v3100_v53, 6  ;;  %v3147_v35 = vrot.slane %v3135_v43, 6 }
 0x3d1   : > { %v3112_v32 = vrot.slane %v3099_v62, 6  ;;  %v3111_v40 = vrot.slane %v3098_v21, 6 }
 0x3d2   : > { %v3569_v39 = vstv %s3968_s20  ;;  %v3551_v27 = vsel %vm3110_vm8, %v3549_v58, %v3550_v10 }
 0x3d3   : > { %3502 = vrot.lane.b32.xlu2 %v3497_v30, %s4350_s0  ;;  %3500 = vrot.lane.b32.xlu1 %v3495_v52, %s4350_s0  ;;  %v3571_v22 = vmul.f32 %v6762_v26, %v3569_v39  ;;  %v4167_v30 = vld [vmem:[#allocation4 + $0x90] sm:$0xff]  ;;  %v3138_v52 = vmul.f32 %v4168_v8, %v6796_v54 }
 0x3d4   : > { %3498 = vrot.lane.b32.xlu0 %v3493_v45, %s4350_s0  ;;  %v4166_v45 = vld [vmem:[#allocation4 + $0x78] sm:$0xff]  ;;  %v3136_v44 = vmul.f32 %v4167_v30, %v6796_v54 }
 0x3d5   : > { %v6830_v24 = vpop.permute.xlu2 %3203  ;;  %v3056_v23 = vpop.permute.xlu1 %3055  ;;  %v3134_v34 = vmul.f32 %v4166_v45, %v6796_v54  ;;  %v3577_v25 = vrot.slane %v3571_v22, 6  ;;  %v3152_v11 = vrot.slane %v3138_v52, 6  ;;  %v3116_v54 = vsel %vm3110_vm8, %v3112_v32, %v3115_v42 }
 0x3d6   : > { %v6833_v13 = vadd.f32 %v6830_v24, %v3167_v3  ;;  %v3054_v61 = vpop.permute.xlu0 %3053  ;;  %v3064_v7 = vadd.f32 %v3056_v23, %v3035_v33  ;;  %v3065_v59 = vadd.f32 %v3056_v23, %v3036_v5  ;;  %v3572_v33 = vmul.f32 %v6765_v50, %v3569_v39 }
 0x3d7   : > { %v3062_v41 = vadd.f32 %v3054_v61, %v3033_v14  ;;  %v3063_v19 = vadd.f32 %v3054_v61, %v3034_v36  ;;  %v3570_v5 = vmul.f32 %v4165_v16, %v3569_v39  ;;  %v3117_v14 = vrot.slane %v3102_v4, 6 }
 0x3d8   : > { %v3146_v12 = vrot.slane %v3134_v34, 6  ;;  %v3579_v50 = vrot.slane %v3572_v33, 6  ;;  %v3151_v42 = vsel %vm3110_vm8, %v3147_v35, %v3150_v6 }
 0x3d9   : > { %v3576_v16 = vrot.slane %v3570_v5, 6  ;;  %v3118_v38 = vsel %vm3110_vm8, %v3113_v55, %v3117_v14 }
 0x3da   : > { %v3580_v48 = vsel %vm3110_vm8, %v3577_v25, %v3579_v50 }
 0x3db   : > { %3529 = vrot.lane.b32.xlu2 %v3524_v0, %s4350_s0  ;;  %3527 = vrot.lane.b32.xlu1 %v3522_v56, %s4350_s0  ;;  %v3578_v0 = vsel %vm3110_vm8, %v3576_v16, %v3577_v25  ;;  %v3131_v56 = vadd.f32 %v3118_v38, %v6798_v37 }
 0x3dc   : > { %3525 = vrot.lane.b32.xlu0 %v3520_v17, %s4350_s0  ;;  %v3148_v17 = vrot.slane %v3136_v44, 6  ;;  %s4352_s0 = smov 3  }
 0x3dd   : > { %v6850_v47 = vpop.permute.xlu2 %3247  ;;  %v3083_v57 = vpop.permute.xlu1 %3082 }
 0x3de   : > { %v3081_v1 = vpop.permute.xlu0 %3080  ;;  %v3091_v49 = vadd.f32 %v3083_v57, %v3064_v7  ;;  %v3092_v15 = vadd.f32 %v3083_v57, %v3065_v59  ;;  %v3149_v53 = vsel %vm3110_vm8, %v3146_v12, %v3148_v17 }
 0x3df   : > { %v3089_v60 = vadd.f32 %v3081_v1, %v3062_v41  ;;  %v3090_v63 = vadd.f32 %v3081_v1, %v3063_v19  ;;  %v3114_v41 = vsel %vm3110_vm8, %v3111_v40, %v3113_v55 }
 0x3e0   : > { %v3130_v18 = vadd.f32 %v3116_v54, %v3092_v15  ;;  %v3129_v28 = vadd.f32 %v3114_v41, %v3091_v49 }
 0x3e1   : > { %v3128_v36 = vadd.f32 %v3112_v32, %v3090_v63  ;;  %v3127_v9 = vadd.f32 %v3111_v40, %v3089_v60 }
 0x3e2   : > { %v3165_v21 = vadd.f32 %v3151_v42, %v3130_v18  ;;  %v3164_v43 = vadd.f32 %v3149_v53, %v3129_v28 }
 0x3e3   : > { %3558 = vrot.lane.b32.xlu2 %v3553_v29, %s4351_s23  ;;  %3556 = vrot.lane.b32.xlu1 %v3551_v27, %s4351_s23  ;;  %v3163_v26 = vadd.f32 %v3147_v35, %v3128_v36  ;;  %v3162_v7 = vadd.f32 %v3146_v12, %v3127_v9 }
 0x3e4   : > { %3554 = vrot.lane.b32.xlu0 %v3549_v58, %s4351_s23 }
 0x3e5   : > { %v3254_v3 = vpop.permute.xlu2 %3253  ;;  %v3196_v46 = vpop.permute.xlu1 %3195 }
 0x3e6   : > { %v6867_v23 = vadd.f32 %v3254_v3, %v6833_v13  ;;  %v3194_v61 = vpop.permute.xlu0 %3193  ;;  %v3215_v59 = vadd.f32 %v3196_v46, %v3163_v26  ;;  %v3153_v13 = vsel %vm3110_vm8, %v3148_v17, %v3152_v11 }
 0x3e7   : > { %v3205_v19 = vsel %vm347_vm4, %v3194_v61, %v3196_v46  ;;  %v3166_v37 = vadd.f32 %v3153_v13, %v3131_v56 }
 0x3e8   : > { %v3214_v31 = vadd.f32 %v3205_v19, %v3162_v7 }
 0x3eb   : > { %3585 = vrot.lane.b32.xlu2 %v3580_v48, %s4351_s23  ;;  %3583 = vrot.lane.b32.xlu1 %v3578_v0, %s4351_s23 }
 0x3ec   : > { %3581 = vrot.lane.b32.xlu0 %v3576_v16, %s4351_s23 }
 0x3ed   : > { %v6882_v62 = vpop.permute.xlu2 %3299  ;;  %v3202_v10 = vpop.permute.xlu1 %3201 }
 0x3ee   : > { %v3200_v20 = vpop.permute.xlu0 %3199  ;;  %v3207_v51 = vsel %vm347_vm4, %v3202_v10, %v6830_v24 }
 0x3ef   : > { %v3206_v6 = vsel %vm347_vm4, %v6817_v2, %v3200_v20  ;;  %v3217_v58 = vadd.f32 %v3200_v20, %v3165_v21  ;;  %v3218_v4 = vadd.f32 %v3207_v51, %v3166_v37 }
 0x3f0   : > { %v3216_v55 = vadd.f32 %v3206_v6, %v3164_v43 }
 0x3f5   : > { %v3306_v32 = vpop.permute.xlu2 %3305  ;;  %v3246_v57 = vpop.permute.xlu1 %3245 }
 0x3f6   : > { %v3244_v39 = vpop.permute.xlu0 %3243  ;;  %v3265_v40 = vadd.f32 %v3246_v57, %v3215_v59  ;;  %v3321_v48 = vadd.f32 %v3306_v32, %v6867_v23 }
 0x3f7   : > { %v3255_v1 = vsel %vm347_vm4, %v3244_v39, %v3246_v57 }
 0x3f8   : > { %v3264_v49 = vadd.f32 %v3255_v1, %v3214_v31 }
 0x3fd   : > { %v6889_v15 = vpop.permute.xlu2 %3349  ;;  %v3252_v45 = vpop.permute.xlu1 %3251 }
 0x3fe   : > { %v3250_v34 = vpop.permute.xlu0 %3249  ;;  %v3257_v60 = vsel %vm347_vm4, %v3252_v45, %v3254_v3 }
 0x3ff   : > { %v3256_v24 = vsel %vm347_vm4, %v6850_v47, %v3250_v34  ;;  %v3267_v2 = vadd.f32 %v3250_v34, %v3217_v58  ;;  %v3268_v63 = vadd.f32 %v3257_v60, %v3218_v4 }
 0x400   : > { %v3266_v29 = vadd.f32 %v3256_v24, %v3216_v55 }
 0x405   : > { %v3356_v35 = vpop.permute.xlu2 %3355  ;;  %v3298_v27 = vpop.permute.xlu1 %3297 }
 0x406   : > { %v3296_v22 = vpop.permute.xlu0 %3295  ;;  %v3317_v33 = vadd.f32 %v3298_v27, %v3265_v40  ;;  %v3371_v56 = vadd.f32 %v3356_v35, %v3321_v48 }
 0x407   : > { %v3307_v5 = vsel %vm430_vm5, %v3296_v22, %v3298_v27 }
 0x408   : > { %v3316_v14 = vadd.f32 %v3307_v5, %v3264_v49 }
 0x40d   : > { %v3391_v36 = vpop.permute.xlu2 %3390  ;;  %v3304_v30 = vpop.permute.xlu1 %3303 }
 0x40e   : > { %v3302_v44 = vpop.permute.xlu0 %3301  ;;  %v3309_v8 = vsel %vm430_vm5, %v3304_v30, %v3306_v32  ;;  %v3400_v18 = vadd.f32 %v3391_v36, %v3371_v56 }
 0x40f   : > { %v3319_v52 = vadd.f32 %v3302_v44, %v3267_v2  ;;  %v3320_v9 = vadd.f32 %v3309_v8, %v3268_v63  ;;  %v3308_v32 = vsel %vm430_vm5, %v6882_v62, %v3302_v44 }
 0x410   : > { %v3318_v45 = vadd.f32 %v3308_v32, %v3266_v29 }
 0x415   : > { %v3418_v12 = vpop.permute.xlu2 %3417  ;;  %v3348_v26 = vpop.permute.xlu1 %3347 }
 0x416   : > { %v3346_v47 = vpop.permute.xlu0 %3345  ;;  %v3427_v53 = vadd.f32 %v3418_v12, %v3400_v18  ;;  %v3367_v5 = vadd.f32 %v3348_v26, %v3317_v33 }
 0x417   : > { %v3357_v34 = vsel %vm430_vm5, %v3346_v47, %v3348_v26 }
 0x418   : > { %v3366_v22 = vadd.f32 %v3357_v34, %v3316_v14 }
 0x41d   : > { %v3447_v25 = vpop.permute.xlu2 %3446  ;;  %v3354_v50 = vpop.permute.xlu1 %3353 }
 0x41e   : > { %v3352_v16 = vpop.permute.xlu0 %3351  ;;  %v3359_v54 = vsel %vm430_vm5, %v3354_v50, %v3356_v35  ;;  %v3456_v37 = vadd.f32 %v3447_v25, %v3427_v53 }
 0x41f   : > { %v3370_v7 = vadd.f32 %v3359_v54, %v3320_v9  ;;  %v3358_v49 = vsel %vm430_vm5, %v6889_v15, %v3352_v16  ;;  %v3369_v63 = vadd.f32 %v3352_v16, %v3319_v52 }
 0x420   : > { %v3368_v2 = vadd.f32 %v3358_v49, %v3318_v45 }
 0x421   : > { %v3399_v59 = vadd.f32 %v3391_v36, %v3370_v7 }
 0x423   : > { %v3426_v0 = vadd.f32 %v3418_v12, %v3399_v59 }
 0x425   : > { %v3474_v38 = vpop.permute.xlu2 %3473  ;;  %v3389_v3 = vpop.permute.xlu1 %3388  ;;  %v3455_v28 = vadd.f32 %v3447_v25, %v3426_v0 }
 0x426   : > { %v3387_v46 = vpop.permute.xlu0 %3386  ;;  %v3483_v20 = vadd.f32 %v3474_v38, %v3456_v37  ;;  %v3397_v36 = vadd.f32 %v3389_v3, %v3368_v2  ;;  %v3398_v30 = vadd.f32 %v3389_v3, %v3369_v63 }
 0x427   : > { %v3482_v10 = vadd.f32 %v3474_v38, %v3455_v28  ;;  %v3395_v8 = vadd.f32 %v3387_v46, %v3366_v22  ;;  %v3396_v62 = vadd.f32 %v3387_v46, %v3367_v5 }
 0x42d   : > { %v3503_v17 = vpop.permute.xlu2 %3502  ;;  %v3416_v11 = vpop.permute.xlu1 %3415 }
 0x42e   : > { %v3414_v61 = vpop.permute.xlu0 %3413  ;;  %v3511_v43 = vadd.f32 %v3503_v17, %v3482_v10  ;;  %v3512_v51 = vadd.f32 %v3503_v17, %v3483_v20  ;;  %v3424_v9 = vadd.f32 %v3416_v11, %v3397_v36  ;;  %v3425_v12 = vadd.f32 %v3416_v11, %v3398_v30 }
 0x42f   : > { %v3422_v15 = vadd.f32 %v3414_v61, %v3395_v8  ;;  %v3423_v29 = vadd.f32 %v3414_v61, %v3396_v62 }
 0x435   : > { %v3530_v41 = vpop.permute.xlu2 %3529  ;;  %v3445_v19 = vpop.permute.xlu1 %3444 }
 0x436   : > { %v3443_v31 = vpop.permute.xlu0 %3442  ;;  %v3538_v6 = vadd.f32 %v3530_v41, %v3511_v43  ;;  %v3539_v4 = vadd.f32 %v3530_v41, %v3512_v51  ;;  %v3453_v50 = vadd.f32 %v3445_v19, %v3424_v9  ;;  %v3454_v47 = vadd.f32 %v3445_v19, %v3425_v12 }
 0x437   : > { %v3451_v38 = vadd.f32 %v3443_v31, %v3422_v15  ;;  %v3452_v17 = vadd.f32 %v3443_v31, %v3423_v29 }
 0x43d   : > { %v3559_v42 = vpop.permute.xlu2 %3558  ;;  %v3472_v13 = vpop.permute.xlu1 %3471 }
 0x43e   : > { %v3470_v21 = vpop.permute.xlu0 %3469  ;;  %v3567_v39 = vadd.f32 %v3559_v42, %v3538_v6  ;;  %v3568_v23 = vadd.f32 %v3559_v42, %v3539_v4  ;;  %v3480_v16 = vadd.f32 %v3472_v13, %v3453_v50  ;;  %v3481_v54 = vadd.f32 %v3472_v13, %v3454_v47 }
 0x43f   : > { %v3478_v14 = vadd.f32 %v3470_v21, %v3451_v38  ;;  %v3479_v26 = vadd.f32 %v3470_v21, %v3452_v17 }
 0x445   : > { %v3501_v58 = vpop.permute.xlu1 %3500  ;;  %v3586_v55 = vpop.permute.xlu2 %3585 }
 0x446   : > { %v3499_v57 = vpop.permute.xlu0 %3498  ;;  %v3594_v40 = vadd.f32 %v3586_v55, %v3567_v39  ;;  %v3595_v1 = vadd.f32 %v3586_v55, %v3568_v23  ;;  %v3509_v3 = vadd.f32 %v3501_v58, %v3480_v16  ;;  %v3510_v46 = vadd.f32 %v3501_v58, %v3481_v54 }
 0x447   : > { %v3507_v7 = vadd.f32 %v3499_v57, %v3478_v14  ;;  %v3508_v59 = vadd.f32 %v3499_v57, %v3479_v26 }
 0x448   : > { %v3600_v60 = vsub.f32 0.0, %v3594_v40  ;;  %v3601_v35 = vsub.f32 0.0, %v3595_v1 }
 0x44a   : > { %v3610_v44 = vmul.f32 1.442695, %v3600_v60  ;;  %v3612_v25 = vmul.f32 1.442695, %v3601_v35 }
 0x44c   : > { %4101 = vpow2.f32 %v3610_v44 }
 0x44d   : > { %v3528_v24 = vpop.permute.xlu1 %3527  ;;  %4103 = vpow2.f32 %v3612_v25 }
 0x44e   : > { %v3526_v27 = vpop.permute.xlu0 %3525  ;;  %v3536_v11 = vadd.f32 %v3528_v24, %v3509_v3  ;;  %v3537_v41 = vadd.f32 %v3528_v24, %v3510_v46 }
 0x44f   : > { %v3534_v61 = vadd.f32 %v3526_v27, %v3507_v7  ;;  %v3535_v0 = vadd.f32 %v3526_v27, %v3508_v59 }
 0x452   : > { %v4102_v48 = vpop.eup %4101 }
 0x453   : > { %v4104_v19 = vpop.eup %4103  ;;  %v6903_v13 = vadd.f32 1.0, %v4102_v48 }
 0x454   : > { %v6905_v10 = vadd.f32 1.0, %v4104_v19 }
 0x455   : > { %v3557_v52 = vpop.permute.xlu1 %3556  ;;  %4105 = vrcp.f32 %v6903_v13 }
 0x456   : > { %v3555_v33 = vpop.permute.xlu0 %3554  ;;  %v3565_v56 = vadd.f32 %v3557_v52, %v3536_v11  ;;  %v3566_v31 = vadd.f32 %v3557_v52, %v3537_v41  ;;  %4107 = vrcp.f32 %v6905_v10  ;;  %vm3700_vm13 = vweird.f32 %v6905_v10 }
 0x457   : > { %v3563_v18 = vadd.f32 %v3555_v33, %v3534_v61  ;;  %v3564_v28 = vadd.f32 %v3555_v33, %v3535_v0 }
 0x45b   : > { %v6909_v32 = vpop.eup %4105 }
 0x45c   : > { %v6911_v40 = vpop.eup %4107  ;;  %v3681_v63 = vmul.f32 %v6909_v32, %v6903_v13 }
 0x45d   : > { %v3584_v42 = vpop.permute.xlu1 %3583  ;;  %v3696_v35 = vmul.f32 %v6911_v40, %v6905_v10  ;;  %vm3701_vm11 = vweird.f32 %v6911_v40 }
 0x45e   : > { %v3582_v53 = vpop.permute.xlu0 %3581  ;;  %v3592_v37 = vadd.f32 %v3584_v42, %v3565_v56  ;;  %v3593_v21 = vadd.f32 %v3584_v42, %v3566_v31  ;;  %v3682_v22 = vsub.f32 1.0, %v3681_v63 }
 0x45f   : > { %v3590_v20 = vadd.f32 %v3582_v53, %v3563_v18  ;;  %v3591_v43 = vadd.f32 %v3582_v53, %v3564_v28  ;;  %v3697_v5 = vsub.f32 1.0, %v3696_v35 }
 0x460   : > { %v3598_v51 = vsub.f32 0.0, %v3592_v37  ;;  %v3599_v6 = vsub.f32 0.0, %v3593_v21  ;;  %v3683_v9 = vmul.f32 %v6909_v32, %v3682_v22  ;;  %v3706_v21 = vand.u32 2147483648, %v6905_v10 }
 0x461   : > { %v3596_v58 = vsub.f32 0.0, %v3590_v20  ;;  %v3597_v4 = vsub.f32 0.0, %v3591_v43  ;;  %v3698_v12 = vmul.f32 %v6911_v40, %v3697_v5 }
 0x462   : > { %v3606_v55 = vmul.f32 1.442695, %v3598_v51  ;;  %v3608_v23 = vmul.f32 1.442695, %v3599_v6  ;;  %v3684_v43 = vadd.f32 %v6909_v32, %v3683_v9  ;;  %v3704_v51 = vand.u32 2147483647, %v6905_v10 }
 0x463   : > { %v3602_v57 = vmul.f32 1.442695, %v3596_v58  ;;  %v3604_v39 = vmul.f32 1.442695, %v3597_v4  ;;  %v3699_v53 = vadd.f32 %v6911_v40, %v3698_v12  ;;  %v3691_v58 = vand.u32 2147483648, %v6903_v13 }
 0x464   : > { %4109 = vpow2.f32 %v3606_v55  ;;  %v3689_v55 = vand.u32 2147483647, %v6903_v13 }
 0x465   : > { %4111 = vpow2.f32 %v3602_v57 }
 0x466   : > { %4113 = vpow2.f32 %v3604_v39  ;;  %v3707_v39 = vor.u32 1.1754944e-38, %v3706_v21 }
 0x467   : > { %4115 = vpow2.f32 %v3608_v23 }
 0x46a   : > { %v4110_v1 = vpop.eup %4109 }
 0x46b   : > { %v4112_v49 = vpop.eup %4111  ;;  %v3616_v45 = vadd.f32 1.0, %v4110_v1 }
 0x46c   : > { %v4114_v34 = vpop.eup %4113  ;;  %v3614_v60 = vadd.f32 1.0, %v4112_v49  ;;  %v3692_v49 = vor.u32 1.1754944e-38, %v3691_v58 }
 0x46d   : > { %v4116_v24 = vpop.eup %4115  ;;  %v3615_v2 = vadd.f32 1.0, %v4114_v34  ;;  %4117 = vrcp.f32 %v3616_v45  ;;  %vm3655_vm9 = vweird.f32 %v3616_v45  ;;  %v3659_v50 = vand.u32 2147483647, %v3616_v45 }
 0x46e   : > { %4119 = vrcp.f32 %v3614_v60  ;;  %v6917_v27 = vadd.f32 1.0, %v4116_v24  ;;  %vm3625_vm10 = vweird.f32 %v3614_v60  ;;  %v3629_v38 = vand.u32 2147483647, %v3614_v60 }
 0x46f   : > { %4121 = vrcp.f32 %v3615_v2  ;;  %v3661_v17 = vand.u32 2147483648, %v3616_v45  ;;  %v3631_v54 = vand.u32 2147483648, %v3614_v60  ;;  %v3646_v14 = vand.u32 2147483648, %v3615_v2 }
 0x470   : > { %4123 = vrcp.f32 %v6917_v27  ;;  %v3644_v7 = vand.u32 2147483647, %v3615_v2  ;;  %vm3640_vm1 = vweird.f32 %v3615_v2  ;;  %vm3660_vm4 = vcmp.eq.f32.partialorder %v3659_v50, 8.507059e+37 }
 0x471   : > { %v3662_v41 = vor.u32 1.1754944e-38, %v3661_v17  ;;  %v3632_v0 = vor.u32 1.1754944e-38, %v3631_v54  ;;  %v3647_v56 = vor.u32 1.1754944e-38, %v3646_v14  ;;  %vm3630_vm6 = vcmp.eq.f32.partialorder %v3629_v38, 8.507059e+37 }
 0x472   : > { %vm3645_vm7 = vcmp.eq.f32.partialorder %v3644_v7, 8.507059e+37  ;;  %v3676_v6 = vand.u32 2147483648, %v6917_v27  ;;  %v3674_v4 = vand.u32 2147483647, %v6917_v27 }
 0x473   : > { %v4118_v36 = vpop.eup %4117 }
 0x474   : > { %v4120_v30 = vpop.eup %4119  ;;  %v3651_v8 = vmul.f32 %v4118_v36, %v3616_v45  ;;  %vm3656_vm12 = vweird.f32 %v4118_v36  ;;  %v3677_v10 = vor.u32 1.1754944e-38, %v3676_v6 }
 0x475   : > { %v4122_v62 = vpop.eup %4121  ;;  %v3621_v44 = vmul.f32 %v4120_v30, %v3614_v60  ;;  %vm3626_vm14 = vweird.f32 %v4120_v30  ;;  %vm3657_vm2 = vmor %vm3655_vm9, %vm3656_vm12  ;;  %vm3686_vm9 = vweird.f32 %v6909_v32  ;;  %vm3670_vm12 = vweird.f32 %v6917_v27 }
 0x476   : > { %v6922_v25 = vpop.eup %4123  ;;  %v3636_v15 = vmul.f32 %v4122_v62, %v3615_v2  ;;  %v3652_v29 = vsub.f32 1.0, %v3651_v8  ;;  %vm3641_vm15 = vweird.f32 %v4122_v62  ;;  %vm3627_vm3 = vmor %vm3625_vm10, %vm3626_vm14  ;;  %vm3685_vm14 = vweird.f32 %v6903_v13 }
 0x477   : > { %v3622_v47 = vsub.f32 1.0, %v3621_v44  ;;  %v3666_v52 = vmul.f32 %v6922_v25, %v6917_v27  ;;  %vm3642_vm5 = vmor %vm3640_vm1, %vm3641_vm15  ;;  %vm3671_vm8 = vweird.f32 %v6922_v25 }
 0x478   : > { %v3637_v16 = vsub.f32 1.0, %v3636_v15  ;;  %v3653_v33 = vmul.f32 %v4118_v36, %v3652_v29  ;;  %vm3702_vm10 = vmor %vm3700_vm13, %vm3701_vm11  ;;  %vm3675_vm11 = vcmp.eq.f32.partialorder %v3674_v4, 8.507059e+37  ;;  %vm3690_vm13 = vcmp.eq.f32.partialorder %v3689_v55, 8.507059e+37 }
 0x479   : > { %v3623_v26 = vmul.f32 %v4120_v30, %v3622_v47  ;;  %v3667_v3 = vsub.f32 1.0, %v3666_v52  ;;  %v3703_v57 = vsel %vm3702_vm10, %v6911_v40, %v3699_v53  ;;  %vm3672_vm15 = vmor %vm3670_vm12, %vm3671_vm8 }
 0x47a   : > { %v3638_v46 = vmul.f32 %v4122_v62, %v3637_v16  ;;  %v3654_v59 = vadd.f32 %v4118_v36, %v3653_v33  ;;  %vm3687_vm1 = vmor %vm3685_vm14, %vm3686_vm9 }
 0x47b   : > { %v3624_v11 = vadd.f32 %v4120_v30, %v3623_v26  ;;  %v3668_v48 = vmul.f32 %v6922_v25, %v3667_v3  ;;  %v3688_v1 = vsel %vm3687_vm1, %v6909_v32, %v3684_v43 }
 0x47c   : > { %v3639_v61 = vadd.f32 %v4122_v62, %v3638_v46  ;;  %v3658_v19 = vsel %vm3657_vm2, %v4118_v36, %v3654_v59  ;;  %vm3705_vm2 = vcmp.eq.f32.partialorder %v3704_v51, 8.507059e+37  ;;  %v3693_v13 = vsel %vm3690_vm13, %v3692_v49, %v3688_v1 }
 0x47d   : > { %v3628_v31 = vsel %vm3627_vm3, %v4120_v30, %v3624_v11  ;;  %v3663_v18 = vsel %vm3660_vm4, %v3662_v41, %v3658_v19  ;;  %v3669_v20 = vadd.f32 %v6922_v25, %v3668_v48  ;;  %v3708_v45 = vsel %vm3705_vm2, %v3707_v39, %v3703_v57 }
 0x47e   : > { %v3643_v28 = vsel %vm3642_vm5, %v4122_v62, %v3639_v61  ;;  %v3633_v42 = vsel %vm3630_vm6, %v3632_v0, %v3628_v31  ;;  %3720 = vrot.lane.b32.xlu2 %v3663_v18, %s4352_s0  ;;  %vm3728_vm3 = vcmask 23552   ;;  %vm3735_vm4 = vcmask 130053  }
 0x47f   : > { %v3648_v37 = vsel %vm3645_vm7, %v3647_v56, %v3643_v28  ;;  %3716 = vrot.lane.b32.xlu0 %v3633_v42, %s4352_s0  ;;  %v3673_v23 = vsel %vm3672_vm15, %v6922_v25, %v3669_v20  ;;  %vm3738_vm5 = vcmask 126976  }
 0x480   : > { %3718 = vrot.lane.b32.xlu1 %v3648_v37, %s4352_s0  ;;  %v3678_v34 = vsel %vm3675_vm11, %v3677_v10, %v3673_v23 }
 0x486   : > { %3726 = vrot.lane.b32.xlu2 %v3708_v45, %s4352_s0 }
 0x487   : > { %3722 = vrot.lane.b32.xlu0 %v3678_v34, %s4352_s0 }
 0x488   : > { %3724 = vrot.lane.b32.xlu1 %v3693_v13, %s4352_s0 }
 0x4d8   : > { %v3721_v40 = vpop.permute.xlu2 %3720 }
 0x4e0   : > { %v3727_v63 = vpop.permute.xlu2 %3726 }
 0x4f1   : > { %v3717_v32 = vpop.permute.xlu0 %3716 }
 0x4f2   : > { %v3719_v60 = vpop.permute.xlu1 %3718 }
 0x4f3   : > { %v3729_v24 = vsel %vm3728_vm3, %v3717_v32, %v3719_v60 }
 0x4f4   : > { %3736 = vst.msk [vmem:[%s4528_s24 - $0x5] sm:$0xe0] %vm3735_vm4, %v3729_v24 }
 0x4f9   : > { %v3723_v2 = vpop.permute.xlu0 %3722 }
 0x4fa   : > { %v3725_v35 = vpop.permute.xlu1 %3724  ;;  %v3730_v27 = vsel %vm3728_vm3, %v3721_v40, %v3723_v2 }
 0x4fb   : > { %v3731_v22 = vsel %vm3728_vm3, %v3725_v35, %v3727_v63  ;;  %3737 = vst.msk [vmem:[%s4528_s24 + $0x3] sm:$0xff] %vm200_vm0, %v3730_v27 }
 0x4fc   : > { %3739 = vst.msk [vmem:[%s4528_s24 + $0xb] sm:$0x1f] %vm3738_vm5, %v3731_v22 }
 0x4fd PF: > { %s3975_s5 = sshll.u32 %s4328_s16, 4  ;;  %s7420_s3 = sld [smem:[#allocation127_spill]] }
 0x4fe   : > { %s3753_s25 = sshll.u32 %s4528_s24, 4  ;;  %s3741_s15 = scalar_lea.sflag [#allocation7], %s192_s2  ;;  %s3754_s25 = int_to_ptr.vmem [resolvable:$true] %s3753_s25 }
 0x503   : > { %s3752_s6 = scalar_lea.hbm %s7420_s3, %s3975_s5  ;;  %s4234_s16 = scalar_lea.hbm %s7420_s3, 32 }
 0x504   : > { %s3755_s29 = sshll.u32 %s3752_s6, 4  ;;  %s3756_s29 = int_to_ptr.hbm [resolvable:$true] %s3755_s29 }
 0x505   : > { %s4228_s19 = sshra.s32 %s3756_s29, 4  ;;  %s4229_s19 = int_to_ptr.hbm [resolvable:$true] %s4228_s19 }
 0x506   : > { %s4230_s9 = scalar_lea.hbm %s4229_s19, 16  ;;  %p4235_p5 = scmp.lt.s32.totalorder %s4229_s19, %s7420_s3 }
 0x507   : > { %p4231_p0 = scmp.ne.s32.totalorder %s4229_s19, %s4230_s9  ;;  %p4236_p7 = scmp.lt.s32.totalorder %s4234_s16, %s4230_s9 }
 0x509   : > { %p4232_p1 = pnand %p4231_p0, %p4449_p10  ;;  %p4237_p8 = por %p4236_p7, %p4235_p5 }
 0x50b   : > { %p4233_p2 = pneg %p4232_p1 }
 0x50d   : > { %p4238_p4 = pnand %p4237_p8, %p4233_p2 }
 0x50f   : > { %4241 = shalt.err (!%p4238_p4)
}
 0x510   : > { %s4353_s2 = smov 128   ;;  %s4354_s24 = smov 8  }
 0x511   : > { %3982 = dma.vmem_to_hbm [thread:$0]  (%p4449_p10), %s3754_s25, 256, %s3756_s29, %s3741_s15, %s4353_s2, %s4353_s2, %s4354_s24  }
 0x512 PF: > { %s7421_s21 = sld [smem:[#allocation16_spill]] }
 0x513   : > { %s7422_s28 = sld [smem:[#allocation14_spill]] }
 0x518   : > { %p3999_p9 = scmp.ge.s32.totalorder %s7421_s21, 2 }
 0x519   : > { %s3770_s0 = sand.u32 1, %s7422_s28  }
 0x51a   : > { %p3993_p11 = pnand %p3999_p9, %p4454_p12  ;;  %s3771_s5 = scalar_lea.sflag [#allocation7], %s3770_s0 }
 0x51c   : > { %p3994_p3 = pneg %p3993_p11 }
 0x51e   : > { %4295 = dma.done.wait (%p3994_p3), %s3771_s5, 256  }
 0x51f   : > { %4297 = vsyncadd (%p3994_p3), %s3771_s5, 4294967040  ;;  %s19_s19 = sadd.s32 1, %s7421_s21   ;;  %s7424_s15 = sld [smem:[#allocation15_spill]] }
 0x520   : > { %p16_p6 = scmp.ge.s32.totalorder %s19_s19, 6   ;;  %s7425_s23 = sld [smem:[#allocation19_spill]] }
 0x521   : > { %s7426_s9 = smov %s4304_s10  ;;  %s7427_s10 = smov %s4308_s11 }
 0x522   : > { %s7428_s11 = smov %s4497_s17  ;;  %s7429_s12 = smov %s4316_s13 }
 0x523   : > { %s7430_s13 = smov %s4320_s14  ;;  %s7431_s14 = smov %s4502_s30 }
 0x524   : > { %s7432_s16 = smov %s4336_s18  ;;  %s7434_s18 = smov %s7440_s8 }
 0x525   :  { %18 = sbr.rel (!%p16_p6) target bundleno = 13 (0xd), region = 91 }
 0x526   : > { %s7433_s17 = smov %s7425_s23 }
 0x52a   :  { %3777 = vsyncpa [#allocation6], 1 }
 0x52b   :  { %3779 = vsyncpa [#allocation6 + $0x1], 1 }
 0x52c   :  { %3780 = vsyncpa [#allocation7], 1 }
 0x52d   :  { %3782 = vsyncpa [#allocation7 + $0x1], 1 }
 0x52e   :  { %3783 = vsyncpa [#allocation8], 1 }
 0x52f   :  { %3785 = vsyncpa [#allocation8 + $0x1], 1 }

</bundles_post_ra>
